<compile_context>
chip_gen: v7x
topology: tpu7x:2x2x1
jax: 0.10.0
libtpu: 0.0.40
codegen_flags: <defaults>
</compile_context>

<pallas_src>
import jax
import jax.numpy as jnp
from jax.experimental import pallas as pl
from jax.experimental.pallas import tpu as pltpu


# --------------------- input projection / generic matmul+bias ----------------

def _matmul_bias_kernel(x_ref, w_ref, b_ref, o_ref):
    acc = jnp.dot(x_ref[...].astype(jnp.bfloat16), w_ref[...],
                  preferred_element_type=jnp.float32)
    o_ref[...] = (acc + b_ref[...]).astype(o_ref.dtype)


def matmul_bias(x2d, w_t_bf16, bias_row_f32, *, out_dtype, tm=512):
    """x2d: (M, K) any float dtype; w_t_bf16: (K, N) bf16; bias: (1, N) fp32."""
    M, K = x2d.shape
    N = w_t_bf16.shape[1]
    tm = min(tm, M)
    grid = (pl.cdiv(M, tm),)
    return pl.pallas_call(
        _matmul_bias_kernel,
        out_shape=jax.ShapeDtypeStruct((M, N), out_dtype),
        grid_spec=pltpu.PrefetchScalarGridSpec(
            num_scalar_prefetch=0,
            grid=grid,
            in_specs=[
                pl.BlockSpec((tm, K), lambda i: (i, 0)),
                pl.BlockSpec((K, N), lambda i: (0, 0)),
                pl.BlockSpec((1, N), lambda i: (0, 0)),
            ],
            out_specs=pl.BlockSpec((tm, N), lambda i: (i, 0)),
        ),
        compiler_params=pltpu.CompilerParams(
            dimension_semantics=("parallel",),
            vmem_limit_bytes=32 * 1024 * 1024,
        ),
    )(x2d, w_t_bf16, bias_row_f32)


# ----------------------------- LSTM recurrence kernel -------------------------

def _make_lstm_recurrence_kernel(fuse_fc):
    """Whole-sequence-resident LSTM recurrence; optionally fuses the fc head."""

    def kernel(*refs):
        if fuse_fc:
            xp_ref, whh_ref, fcw_ref, fcb_ref, o_ref, hseq_ref, h_ref, c_ref = refs
        else:
            xp_ref, whh_ref, o_ref, hseq_ref, h_ref, c_ref = refs

        S = xp_ref.shape[0]
        H = whh_ref.shape[0]

        # PyTorch nn.LSTM defaults to zero-initialized (h0, c0).
        h_ref[...] = jnp.zeros_like(h_ref)
        c_ref[...] = jnp.zeros_like(c_ref)

        def step(t, carry):
            # Input projection was precomputed; only h @ W_hh^T on the serial path.
            gates = xp_ref[t] + jnp.dot(
                h_ref[...].astype(jnp.bfloat16), whh_ref[...],
                preferred_element_type=jnp.float32)          # (B, 4H) fp32

            # PyTorch gate order: input, forget, cell(g), output.
            i_g = jax.nn.sigmoid(gates[:, 0 * H:1 * H])
            f_g = jax.nn.sigmoid(gates[:, 1 * H:2 * H])
            g_g = jnp.tanh(gates[:, 2 * H:3 * H])
            o_g = jax.nn.sigmoid(gates[:, 3 * H:4 * H])

            c_new = f_g * c_ref[...] + i_g * g_g
            h_new = o_g * jnp.tanh(c_new)

            c_ref[...] = c_new
            h_ref[...] = h_new
            hseq_ref[t] = h_new                               # buffer in VMEM
            return carry

        jax.lax.fori_loop(0, S, step, 0, unroll=True)

        if fuse_fc:
            B = hseq_ref.shape[1]
            h2d = hseq_ref[...].reshape(S * B, H).astype(jnp.bfloat16)
            out = jnp.dot(h2d, fcw_ref[...],
                          preferred_element_type=jnp.float32) + fcb_ref[...]
            o_ref[...] = out.reshape(S, B, -1).astype(o_ref.dtype)
        else:
            # Single bulk writeback of the whole layer output.
            o_ref[...] = hseq_ref[...].astype(o_ref.dtype)

    return kernel


def lstm_recurrence(x_proj, w_hh_t, *, out_dtype, fc_w_t=None, fc_b=None):
    """x_proj: (S, B, 4H) fp32 (already includes both biases).
    w_hh_t: (H, 4H) bf16. If fc_w_t/fc_b given, also applies the fc head."""
    S, B, G = x_proj.shape
    H = G // 4
    fuse_fc = fc_w_t is not None
    O = fc_w_t.shape[1] if fuse_fc else H

    in_specs = [
        pl.BlockSpec((S, B, G), lambda i: (0, 0, 0)),
        pl.BlockSpec((H, G), lambda i: (0, 0)),
    ]
    operands = [x_proj, w_hh_t]
    if fuse_fc:
        in_specs += [
            pl.BlockSpec((H, O), lambda i: (0, 0)),
            pl.BlockSpec((1, O), lambda i: (0, 0)),
        ]
        operands += [fc_w_t, fc_b]

    scratch_shapes = [
        pltpu.VMEM((S, B, H), jnp.float32),   # h sequence buffer
        pltpu.VMEM((B, H), jnp.float32),      # h state
        pltpu.VMEM((B, H), jnp.float32),      # c state
    ]

    return pl.pallas_call(
        _make_lstm_recurrence_kernel(fuse_fc),
        out_shape=jax.ShapeDtypeStruct((S, B, O), out_dtype),
        grid_spec=pltpu.PrefetchScalarGridSpec(
            num_scalar_prefetch=0,
            grid=(1,),                         # whole sequence in one grid step
            in_specs=in_specs,
            out_specs=pl.BlockSpec((S, B, O), lambda i: (0, 0, 0)),
            scratch_shapes=scratch_shapes,
        ),
        compiler_params=pltpu.CompilerParams(
            dimension_semantics=("arbitrary",),   # recurrence is sequential
            vmem_limit_bytes=32 * 1024 * 1024,
        ),
    )(*operands)


# ------------------------------- Full module ----------------------------------

def init_lstm_params(key, input_dim, hidden_dim, num_layers, output_dim):
    """PyTorch-default-style uniform(-1/sqrt(H), 1/sqrt(H)); weights stored
    pre-transposed / pre-cast (bf16) and biases pre-added (fp32)."""
    k = 1.0 / jnp.sqrt(jnp.float32(hidden_dim))
    layers = []
    for layer in range(num_layers):
        d_in = input_dim if layer == 0 else hidden_dim
        key, k1, k2, k3, k4 = jax.random.split(key, 5)
        w_ih = jax.random.uniform(k1, (4 * hidden_dim, d_in), jnp.float32, -k, k)
        w_hh = jax.random.uniform(k2, (4 * hidden_dim, hidden_dim), jnp.float32, -k, k)
        b_ih = jax.random.uniform(k3, (4 * hidden_dim,), jnp.float32, -k, k)
        b_hh = jax.random.uniform(k4, (4 * hidden_dim,), jnp.float32, -k, k)
        layers.append({
            "w_ih_t": w_ih.T.astype(jnp.bfloat16),                      # (D, 4H)
            "w_hh_t": w_hh.T.astype(jnp.bfloat16),                      # (H, 4H)
            "bias": (b_ih + b_hh).reshape(1, 4 * hidden_dim).astype(jnp.float32),
        })
    key, k1, k2 = jax.random.split(key, 3)
    fc_w = jax.random.uniform(k1, (output_dim, hidden_dim), jnp.float32, -k, k)
    fc_b = jax.random.uniform(k2, (output_dim,), jnp.float32, -k, k)
    return {
        "layers": layers,
        "fc_w_t": fc_w.T.astype(jnp.bfloat16),                          # (H, O)
        "fc_b": fc_b.reshape(1, output_dim).astype(jnp.float32),        # (1, O)
    }


@jax.jit
def lstm_model_forward(params, x):
    """x: (S, B, input_dim) -> (S, B, output_dim)  (matches PyTorch module)."""
    S, B, _ = x.shape
    h = x
    n_layers = len(params["layers"])
    for li, layer in enumerate(params["layers"]):
        d_in = h.shape[-1]
        # Big, pipelined input-projection matmul (off the serial critical path).
        x_proj = matmul_bias(h.reshape(S * B, d_in), layer["w_ih_t"], layer["bias"],
                             out_dtype=jnp.float32).reshape(S, B, -1)
        if li == n_layers - 1:
            # Last layer: fuse the fc head into the recurrence kernel.
            h = lstm_recurrence(x_proj, layer["w_hh_t"], out_dtype=x.dtype,
                                fc_w_t=params["fc_w_t"], fc_b=params["fc_b"])
        else:
            # Inter-layer activations in bf16 to halve HBM traffic.
            h = lstm_recurrence(x_proj, layer["w_hh_t"], out_dtype=jnp.bfloat16)
    return h


# ----------------------------------- main --------------------------------------

if __name__ == "__main__":
    # seq=8, batch=8 (sublane-aligned), input_dim=16, hidden=32 (4H=128 lanes),
    # num_layers=2, output_dim=4.
    SEQ, BATCH = 8, 8
    INPUT_DIM, HIDDEN_DIM, NUM_LAYERS, OUTPUT_DIM = 16, 32, 2, 4

    key = jax.random.PRNGKey(0)
    key, kx = jax.random.split(key)
    x = jax.random.normal(kx, (SEQ, BATCH, INPUT_DIM), jnp.float32)

    params = init_lstm_params(key, INPUT_DIM, HIDDEN_DIM, NUM_LAYERS, OUTPUT_DIM)

    out = lstm_model_forward(params, x)
    out = jax.block_until_ready(out)
    assert out.shape == (SEQ, BATCH, OUTPUT_DIM), out.shape
    print("KERNEL_OK")
</pallas_src>

<mosaic_0001>
module attributes {stable_mosaic.version = 11 : i64} {
  func.func @_matmul_bias_kernel(%arg0: i32, %arg1: memref<64x16xf32, #tpu.memory_space<vmem>>, %arg2: memref<16x128xbf16, #tpu.memory_space<vmem>>, %arg3: memref<1x128xf32, #tpu.memory_space<vmem>>, %arg4: memref<64x128xf32, #tpu.memory_space<vmem>>) attributes {dimension_semantics = [#tpu.dimension_semantics<parallel>], iteration_bounds = array<i64: 1>, scalar_prefetch = 0 : i64, scratch_operands = 0 : i64, tpu.core_type = #tpu.core_type<tc>, window_params = [{transform_indices = @transform_0, window_bounds = array<i64: 64, 16>}, {pipeline_mode = #tpu.pipeline_mode<synchronous>, transform_indices = @transform_1, window_bounds = array<i64: 16, 128>}, {pipeline_mode = #tpu.pipeline_mode<synchronous>, transform_indices = @transform_2, window_bounds = array<i64: 1, 128>}, {transform_indices = @transform_3, window_bounds = array<i64: 64, 128>}]} {
    %c0 = arith.constant 0 : index
    %c0_0 = arith.constant 0 : index
    %0 = vector.load %arg1[%c0, %c0_0] : memref<64x16xf32, #tpu.memory_space<vmem>>, vector<64x16xf32>
    %1 = arith.truncf %0 : vector<64x16xf32> to vector<64x16xbf16>
    %c0_1 = arith.constant 0 : index
    %c0_2 = arith.constant 0 : index
    %2 = vector.load %arg2[%c0_1, %c0_2] : memref<16x128xbf16, #tpu.memory_space<vmem>>, vector<16x128xbf16>
    %cst = arith.constant dense<0.000000e+00> : vector<64x128xf32>
    %3 = tpu.matmul %1, %2, %cst {dimension_numbers = #tpu.dot_dimension_numbers<[1], [0], [0], [1], [0, 0, 1, 1], [], []>} : vector<64x16xbf16>, vector<16x128xbf16>, vector<64x128xf32> -> vector<64x128xf32>
    %c0_3 = arith.constant 0 : index
    %c0_4 = arith.constant 0 : index
    %4 = vector.load %arg3[%c0_3, %c0_4] : memref<1x128xf32, #tpu.memory_space<vmem>>, vector<1x128xf32>
    %5 = vector.broadcast %4 : vector<1x128xf32> to vector<64x128xf32>
    %6 = arith.addf %3, %5 : vector<64x128xf32>
    %c0_5 = arith.constant 0 : index
    %c0_6 = arith.constant 0 : index
    %7 = vector.load %arg4[%c0_5, %c0_6] : memref<64x128xf32, #tpu.memory_space<vmem>>, vector<64x128xf32>
    tpu.vector_store %arg4[%c0_5, %c0_6], %6 {strides = array<i32>} : memref<64x128xf32, #tpu.memory_space<vmem>>, vector<64x128xf32>,
    return
  }
  func.func @transform_0(%arg0: i32) -> (i32, i32) {
    %c0_i32 = arith.constant 0 : i32
    %c0_i32_0 = arith.constant 0 : i32
    return %arg0, %c0_i32 : i32, i32
  }
  func.func @transform_1(%arg0: i32) -> (i32, i32) {
    %c0_i32 = arith.constant 0 : i32
    %c0_i32_0 = arith.constant 0 : i32
    %c0_i32_1 = arith.constant 0 : i32
    return %c0_i32, %c0_i32_0 : i32, i32
  }
  func.func @transform_2(%arg0: i32) -> (i32, i32) {
    %c0_i32 = arith.constant 0 : i32
    %c0_i32_0 = arith.constant 0 : i32
    %c0_i32_1 = arith.constant 0 : i32
    return %c0_i32, %c0_i32_0 : i32, i32
  }
  func.func @transform_3(%arg0: i32) -> (i32, i32) {
    %c0_i32 = arith.constant 0 : i32
    %c0_i32_0 = arith.constant 0 : i32
    return %arg0, %c0_i32 : i32, i32
  }
}

module attributes {stable_mosaic.version = 11 : i64} {
  func.func @_matmul_bias_kernel(%arg0: i32, %arg1: memref<64x32xbf16, #tpu.memory_space<vmem>>, %arg2: memref<32x128xbf16, #tpu.memory_space<vmem>>, %arg3: memref<1x128xf32, #tpu.memory_space<vmem>>, %arg4: memref<64x128xf32, #tpu.memory_space<vmem>>) attributes {dimension_semantics = [#tpu.dimension_semantics<parallel>], iteration_bounds = array<i64: 1>, scalar_prefetch = 0 : i64, scratch_operands = 0 : i64, tpu.core_type = #tpu.core_type<tc>, window_params = [{transform_indices = @transform_0, window_bounds = array<i64: 64, 32>}, {pipeline_mode = #tpu.pipeline_mode<synchronous>, transform_indices = @transform_1, window_bounds = array<i64: 32, 128>}, {pipeline_mode = #tpu.pipeline_mode<synchronous>, transform_indices = @transform_2, window_bounds = array<i64: 1, 128>}, {transform_indices = @transform_3, window_bounds = array<i64: 64, 128>}]} {
    %c0 = arith.constant 0 : index
    %c0_0 = arith.constant 0 : index
    %0 = vector.load %arg1[%c0, %c0_0] : memref<64x32xbf16, #tpu.memory_space<vmem>>, vector<64x32xbf16>
    %c0_1 = arith.constant 0 : index
    %c0_2 = arith.constant 0 : index
    %1 = vector.load %arg2[%c0_1, %c0_2] : memref<32x128xbf16, #tpu.memory_space<vmem>>, vector<32x128xbf16>
    %cst = arith.constant dense<0.000000e+00> : vector<64x128xf32>
    %2 = tpu.matmul %0, %1, %cst {dimension_numbers = #tpu.dot_dimension_numbers<[1], [0], [0], [1], [0, 0, 1, 1], [], []>} : vector<64x32xbf16>, vector<32x128xbf16>, vector<64x128xf32> -> vector<64x128xf32>
    %c0_3 = arith.constant 0 : index
    %c0_4 = arith.constant 0 : index
    %3 = vector.load %arg3[%c0_3, %c0_4] : memref<1x128xf32, #tpu.memory_space<vmem>>, vector<1x128xf32>
    %4 = vector.broadcast %3 : vector<1x128xf32> to vector<64x128xf32>
    %5 = arith.addf %2, %4 : vector<64x128xf32>
    %c0_5 = arith.constant 0 : index
    %c0_6 = arith.constant 0 : index
    %6 = vector.load %arg4[%c0_5, %c0_6] : memref<64x128xf32, #tpu.memory_space<vmem>>, vector<64x128xf32>
    tpu.vector_store %arg4[%c0_5, %c0_6], %5 {strides = array<i32>} : memref<64x128xf32, #tpu.memory_space<vmem>>, vector<64x128xf32>,
    return
  }
  func.func @transform_0(%arg0: i32) -> (i32, i32) {
    %c0_i32 = arith.constant 0 : i32
    %c0_i32_0 = arith.constant 0 : i32
    return %arg0, %c0_i32 : i32, i32
  }
  func.func @transform_1(%arg0: i32) -> (i32, i32) {
    %c0_i32 = arith.constant 0 : i32
    %c0_i32_0 = arith.constant 0 : i32
    %c0_i32_1 = arith.constant 0 : i32
    return %c0_i32, %c0_i32_0 : i32, i32
  }
  func.func @transform_2(%arg0: i32) -> (i32, i32) {
    %c0_i32 = arith.constant 0 : i32
    %c0_i32_0 = arith.constant 0 : i32
    %c0_i32_1 = arith.constant 0 : i32
    return %c0_i32, %c0_i32_0 : i32, i32
  }
  func.func @transform_3(%arg0: i32) -> (i32, i32) {
    %c0_i32 = arith.constant 0 : i32
    %c0_i32_0 = arith.constant 0 : i32
    return %arg0, %c0_i32 : i32, i32
  }
}

module attributes {stable_mosaic.version = 11 : i64} {
  func.func @kernel(%arg0: i32, %arg1: memref<8x8x128xf32, #tpu.memory_space<vmem>>, %arg2: memref<32x128xbf16, #tpu.memory_space<vmem>>, %arg3: memref<8x8x32xbf16, #tpu.memory_space<vmem>>, %arg4: memref<8x8x32xf32, #tpu.memory_space<vmem>>, %arg5: memref<8x32xf32, #tpu.memory_space<vmem>>, %arg6: memref<8x32xf32, #tpu.memory_space<vmem>>) attributes {dimension_semantics = [#tpu.dimension_semantics<arbitrary>], iteration_bounds = array<i64: 1>, scalar_prefetch = 0 : i64, scratch_operands = 3 : i64, tpu.core_type = #tpu.core_type<tc>, window_params = [{pipeline_mode = #tpu.pipeline_mode<synchronous>, transform_indices = @transform_0, window_bounds = array<i64: 8, 8, 128>}, {pipeline_mode = #tpu.pipeline_mode<synchronous>, transform_indices = @transform_1, window_bounds = array<i64: 32, 128>}, {pipeline_mode = #tpu.pipeline_mode<synchronous>, transform_indices = @transform_2, window_bounds = array<i64: 8, 8, 32>}]} {
    %cst = arith.constant 0.000000e+00 : f32
    %0 = vector.broadcast %cst : f32 to vector<8x32xf32>
    %c0 = arith.constant 0 : index
    %c0_0 = arith.constant 0 : index
    %1 = vector.load %arg5[%c0, %c0_0] : memref<8x32xf32, #tpu.memory_space<vmem>>, vector<8x32xf32>
    tpu.vector_store %arg5[%c0, %c0_0], %0 {strides = array<i32>} : memref<8x32xf32, #tpu.memory_space<vmem>>, vector<8x32xf32>,
    %cst_1 = arith.constant 0.000000e+00 : f32
    %2 = vector.broadcast %cst_1 : f32 to vector<8x32xf32>
    %c0_2 = arith.constant 0 : index
    %c0_3 = arith.constant 0 : index
    %3 = vector.load %arg6[%c0_2, %c0_3] : memref<8x32xf32, #tpu.memory_space<vmem>>, vector<8x32xf32>
    tpu.vector_store %arg6[%c0_2, %c0_3], %2 {strides = array<i32>} : memref<8x32xf32, #tpu.memory_space<vmem>>, vector<8x32xf32>,
    %c0_i32 = arith.constant 0 : i32
    %4 = arith.index_cast %c0_i32 : i32 to index
    %c0_4 = arith.constant 0 : index
    %c0_5 = arith.constant 0 : index
    %5 = vector.load %arg1[%4, %c0_4, %c0_5] : memref<8x8x128xf32, #tpu.memory_space<vmem>>, vector<1x8x128xf32>
    %6 = vector.shape_cast %5 : vector<1x8x128xf32> to vector<8x128xf32>
    %c0_6 = arith.constant 0 : index
    %c0_7 = arith.constant 0 : index
    %7 = vector.load %arg5[%c0_6, %c0_7] : memref<8x32xf32, #tpu.memory_space<vmem>>, vector<8x32xf32>
    %8 = arith.truncf %7 : vector<8x32xf32> to vector<8x32xbf16>
    %c0_8 = arith.constant 0 : index
    %c0_9 = arith.constant 0 : index
    %9 = vector.load %arg2[%c0_8, %c0_9] : memref<32x128xbf16, #tpu.memory_space<vmem>>, vector<32x128xbf16>
    %cst_10 = arith.constant dense<0.000000e+00> : vector<8x128xf32>
    %10 = tpu.matmul %8, %9, %cst_10 {dimension_numbers = #tpu.dot_dimension_numbers<[1], [0], [0], [1], [0, 0, 1, 1], [], []>} : vector<8x32xbf16>, vector<32x128xbf16>, vector<8x128xf32> -> vector<8x128xf32>
    %11 = arith.addf %6, %10 : vector<8x128xf32>
    %12 = vector.extract_strided_slice %11 {offsets = [0, 0], sizes = [8, 32], strides = [1, 1]} : vector<8x128xf32> to vector<8x32xf32>
    %13 = arith.negf %12 : vector<8x32xf32>
    %14 = math.exp %13 : vector<8x32xf32>
    %cst_11 = arith.constant 1.000000e+00 : f32
    %15 = vector.broadcast %cst_11 : f32 to vector<8x32xf32>
    %16 = arith.addf %15, %14 : vector<8x32xf32>
    %17 = arith.divf %15, %16 : vector<8x32xf32>
    %18 = vector.extract_strided_slice %11 {offsets = [0, 32], sizes = [8, 32], strides = [1, 1]} : vector<8x128xf32> to vector<8x32xf32>
    %19 = arith.negf %18 : vector<8x32xf32>
    %20 = math.exp %19 : vector<8x32xf32>
    %cst_12 = arith.constant 1.000000e+00 : f32
    %21 = vector.broadcast %cst_12 : f32 to vector<8x32xf32>
    %22 = arith.addf %21, %20 : vector<8x32xf32>
    %23 = arith.divf %21, %22 : vector<8x32xf32>
    %24 = vector.extract_strided_slice %11 {offsets = [0, 64], sizes = [8, 32], strides = [1, 1]} : vector<8x128xf32> to vector<8x32xf32>
    %25 = math.tanh %24 : vector<8x32xf32>
    %26 = vector.extract_strided_slice %11 {offsets = [0, 96], sizes = [8, 32], strides = [1, 1]} : vector<8x128xf32> to vector<8x32xf32>
    %27 = arith.negf %26 : vector<8x32xf32>
    %28 = math.exp %27 : vector<8x32xf32>
    %cst_13 = arith.constant 1.000000e+00 : f32
    %29 = vector.broadcast %cst_13 : f32 to vector<8x32xf32>
    %30 = arith.addf %29, %28 : vector<8x32xf32>
    %31 = arith.divf %29, %30 : vector<8x32xf32>
    %c0_14 = arith.constant 0 : index
    %c0_15 = arith.constant 0 : index
    %32 = vector.load %arg6[%c0_14, %c0_15] : memref<8x32xf32, #tpu.memory_space<vmem>>, vector<8x32xf32>
    %33 = arith.mulf %23, %32 : vector<8x32xf32>
    %34 = arith.mulf %17, %25 : vector<8x32xf32>
    %35 = arith.addf %33, %34 : vector<8x32xf32>
    %36 = math.tanh %35 : vector<8x32xf32>
    %37 = arith.mulf %31, %36 : vector<8x32xf32>
    %c0_16 = arith.constant 0 : index
    %c0_17 = arith.constant 0 : index
    %38 = vector.load %arg6[%c0_16, %c0_17] : memref<8x32xf32, #tpu.memory_space<vmem>>, vector<8x32xf32>
    tpu.vector_store %arg6[%c0_16, %c0_17], %35 {strides = array<i32>} : memref<8x32xf32, #tpu.memory_space<vmem>>, vector<8x32xf32>,
    %c0_18 = arith.constant 0 : index
    %c0_19 = arith.constant 0 : index
    %39 = vector.load %arg5[%c0_18, %c0_19] : memref<8x32xf32, #tpu.memory_space<vmem>>, vector<8x32xf32>
    tpu.vector_store %arg5[%c0_18, %c0_19], %37 {strides = array<i32>} : memref<8x32xf32, #tpu.memory_space<vmem>>, vector<8x32xf32>,
    %40 = arith.index_cast %c0_i32 : i32 to index
    %c0_20 = arith.constant 0 : index
    %c0_21 = arith.constant 0 : index
    %41 = vector.load %arg4[%40, %c0_20, %c0_21] : memref<8x8x32xf32, #tpu.memory_space<vmem>>, vector<1x8x32xf32>
    %42 = vector.shape_cast %41 : vector<1x8x32xf32> to vector<8x32xf32>
    %43 = vector.shape_cast %37 : vector<8x32xf32> to vector<1x8x32xf32>
    tpu.vector_store %arg4[%40, %c0_20, %c0_21], %43 {strides = array<i32>} : memref<8x8x32xf32, #tpu.memory_space<vmem>>, vector<1x8x32xf32>,
    %c1_i32 = arith.constant 1 : i32
    %44 = arith.index_cast %c1_i32 : i32 to index
    %c0_22 = arith.constant 0 : index
    %c0_23 = arith.constant 0 : index
    %45 = vector.load %arg1[%44, %c0_22, %c0_23] : memref<8x8x128xf32, #tpu.memory_space<vmem>>, vector<1x8x128xf32>
    %46 = vector.shape_cast %45 : vector<1x8x128xf32> to vector<8x128xf32>
    %c0_24 = arith.constant 0 : index
    %c0_25 = arith.constant 0 : index
    %47 = vector.load %arg5[%c0_24, %c0_25] : memref<8x32xf32, #tpu.memory_space<vmem>>, vector<8x32xf32>
    %48 = arith.truncf %47 : vector<8x32xf32> to vector<8x32xbf16>
    %c0_26 = arith.constant 0 : index
    %c0_27 = arith.constant 0 : index
    %49 = vector.load %arg2[%c0_26, %c0_27] : memref<32x128xbf16, #tpu.memory_space<vmem>>, vector<32x128xbf16>
    %cst_28 = arith.constant dense<0.000000e+00> : vector<8x128xf32>
    %50 = tpu.matmul %48, %49, %cst_28 {dimension_numbers = #tpu.dot_dimension_numbers<[1], [0], [0], [1], [0, 0, 1, 1], [], []>} : vector<8x32xbf16>, vector<32x128xbf16>, vector<8x128xf32> -> vector<8x128xf32>
    %51 = arith.addf %46, %50 : vector<8x128xf32>
    %52 = vector.extract_strided_slice %51 {offsets = [0, 0], sizes = [8, 32], strides = [1, 1]} : vector<8x128xf32> to vector<8x32xf32>
    %53 = arith.negf %52 : vector<8x32xf32>
    %54 = math.exp %53 : vector<8x32xf32>
    %cst_29 = arith.constant 1.000000e+00 : f32
    %55 = vector.broadcast %cst_29 : f32 to vector<8x32xf32>
    %56 = arith.addf %55, %54 : vector<8x32xf32>
    %57 = arith.divf %55, %56 : vector<8x32xf32>
    %58 = vector.extract_strided_slice %51 {offsets = [0, 32], sizes = [8, 32], strides = [1, 1]} : vector<8x128xf32> to vector<8x32xf32>
    %59 = arith.negf %58 : vector<8x32xf32>
    %60 = math.exp %59 : vector<8x32xf32>
    %cst_30 = arith.constant 1.000000e+00 : f32
    %61 = vector.broadcast %cst_30 : f32 to vector<8x32xf32>
    %62 = arith.addf %61, %60 : vector<8x32xf32>
    %63 = arith.divf %61, %62 : vector<8x32xf32>
    %64 = vector.extract_strided_slice %51 {offsets = [0, 64], sizes = [8, 32], strides = [1, 1]} : vector<8x128xf32> to vector<8x32xf32>
    %65 = math.tanh %64 : vector<8x32xf32>
    %66 = vector.extract_strided_slice %51 {offsets = [0, 96], sizes = [8, 32], strides = [1, 1]} : vector<8x128xf32> to vector<8x32xf32>
    %67 = arith.negf %66 : vector<8x32xf32>
    %68 = math.exp %67 : vector<8x32xf32>
    %cst_31 = arith.constant 1.000000e+00 : f32
    %69 = vector.broadcast %cst_31 : f32 to vector<8x32xf32>
    %70 = arith.addf %69, %68 : vector<8x32xf32>
    %71 = arith.divf %69, %70 : vector<8x32xf32>
    %c0_32 = arith.constant 0 : index
    %c0_33 = arith.constant 0 : index
    %72 = vector.load %arg6[%c0_32, %c0_33] : memref<8x32xf32, #tpu.memory_space<vmem>>, vector<8x32xf32>
    %73 = arith.mulf %63, %72 : vector<8x32xf32>
    %74 = arith.mulf %57, %65 : vector<8x32xf32>
    %75 = arith.addf %73, %74 : vector<8x32xf32>
    %76 = math.tanh %75 : vector<8x32xf32>
    %77 = arith.mulf %71, %76 : vector<8x32xf32>
    %c0_34 = arith.constant 0 : index
    %c0_35 = arith.constant 0 : index
    %78 = vector.load %arg6[%c0_34, %c0_35] : memref<8x32xf32, #tpu.memory_space<vmem>>, vector<8x32xf32>
    tpu.vector_store %arg6[%c0_34, %c0_35], %75 {strides = array<i32>} : memref<8x32xf32, #tpu.memory_space<vmem>>, vector<8x32xf32>,
    %c0_36 = arith.constant 0 : index
    %c0_37 = arith.constant 0 : index
    %79 = vector.load %arg5[%c0_36, %c0_37] : memref<8x32xf32, #tpu.memory_space<vmem>>, vector<8x32xf32>
    tpu.vector_store %arg5[%c0_36, %c0_37], %77 {strides = array<i32>} : memref<8x32xf32, #tpu.memory_space<vmem>>, vector<8x32xf32>,
    %80 = arith.index_cast %c1_i32 : i32 to index
    %c0_38 = arith.constant 0 : index
    %c0_39 = arith.constant 0 : index
    %81 = vector.load %arg4[%80, %c0_38, %c0_39] : memref<8x8x32xf32, #tpu.memory_space<vmem>>, vector<1x8x32xf32>
    %82 = vector.shape_cast %81 : vector<1x8x32xf32> to vector<8x32xf32>
    %83 = vector.shape_cast %77 : vector<8x32xf32> to vector<1x8x32xf32>
    tpu.vector_store %arg4[%80, %c0_38, %c0_39], %83 {strides = array<i32>} : memref<8x8x32xf32, #tpu.memory_space<vmem>>, vector<1x8x32xf32>,
    %c2_i32 = arith.constant 2 : i32
    %84 = arith.index_cast %c2_i32 : i32 to index
    %c0_40 = arith.constant 0 : index
    %c0_41 = arith.constant 0 : index
    %85 = vector.load %arg1[%84, %c0_40, %c0_41] : memref<8x8x128xf32, #tpu.memory_space<vmem>>, vector<1x8x128xf32>
    %86 = vector.shape_cast %85 : vector<1x8x128xf32> to vector<8x128xf32>
    %c0_42 = arith.constant 0 : index
    %c0_43 = arith.constant 0 : index
    %87 = vector.load %arg5[%c0_42, %c0_43] : memref<8x32xf32, #tpu.memory_space<vmem>>, vector<8x32xf32>
    %88 = arith.truncf %87 : vector<8x32xf32> to vector<8x32xbf16>
    %c0_44 = arith.constant 0 : index
    %c0_45 = arith.constant 0 : index
    %89 = vector.load %arg2[%c0_44, %c0_45] : memref<32x128xbf16, #tpu.memory_space<vmem>>, vector<32x128xbf16>
    %cst_46 = arith.constant dense<0.000000e+00> : vector<8x128xf32>
    %90 = tpu.matmul %88, %89, %cst_46 {dimension_numbers = #tpu.dot_dimension_numbers<[1], [0], [0], [1], [0, 0, 1, 1], [], []>} : vector<8x32xbf16>, vector<32x128xbf16>, vector<8x128xf32> -> vector<8x128xf32>
    %91 = arith.addf %86, %90 : vector<8x128xf32>
    %92 = vector.extract_strided_slice %91 {offsets = [0, 0], sizes = [8, 32], strides = [1, 1]} : vector<8x128xf32> to vector<8x32xf32>
    %93 = arith.negf %92 : vector<8x32xf32>
    %94 = math.exp %93 : vector<8x32xf32>
    %cst_47 = arith.constant 1.000000e+00 : f32
    %95 = vector.broadcast %cst_47 : f32 to vector<8x32xf32>
    %96 = arith.addf %95, %94 : vector<8x32xf32>
    %97 = arith.divf %95, %96 : vector<8x32xf32>
    %98 = vector.extract_strided_slice %91 {offsets = [0, 32], sizes = [8, 32], strides = [1, 1]} : vector<8x128xf32> to vector<8x32xf32>
    %99 = arith.negf %98 : vector<8x32xf32>
    %100 = math.exp %99 : vector<8x32xf32>
    %cst_48 = arith.constant 1.000000e+00 : f32
    %101 = vector.broadcast %cst_48 : f32 to vector<8x32xf32>
    %102 = arith.addf %101, %100 : vector<8x32xf32>
    %103 = arith.divf %101, %102 : vector<8x32xf32>
    %104 = vector.extract_strided_slice %91 {offsets = [0, 64], sizes = [8, 32], strides = [1, 1]} : vector<8x128xf32> to vector<8x32xf32>
    %105 = math.tanh %104 : vector<8x32xf32>
    %106 = vector.extract_strided_slice %91 {offsets = [0, 96], sizes = [8, 32], strides = [1, 1]} : vector<8x128xf32> to vector<8x32xf32>
    %107 = arith.negf %106 : vector<8x32xf32>
    %108 = math.exp %107 : vector<8x32xf32>
    %cst_49 = arith.constant 1.000000e+00 : f32
    %109 = vector.broadcast %cst_49 : f32 to vector<8x32xf32>
    %110 = arith.addf %109, %108 : vector<8x32xf32>
    %111 = arith.divf %109, %110 : vector<8x32xf32>
    %c0_50 = arith.constant 0 : index
    %c0_51 = arith.constant 0 : index
    %112 = vector.load %arg6[%c0_50, %c0_51] : memref<8x32xf32, #tpu.memory_space<vmem>>, vector<8x32xf32>
    %113 = arith.mulf %103, %112 : vector<8x32xf32>
    %114 = arith.mulf %97, %105 : vector<8x32xf32>
    %115 = arith.addf %113, %114 : vector<8x32xf32>
    %116 = math.tanh %115 : vector<8x32xf32>
    %117 = arith.mulf %111, %116 : vector<8x32xf32>
    %c0_52 = arith.constant 0 : index
    %c0_53 = arith.constant 0 : index
    %118 = vector.load %arg6[%c0_52, %c0_53] : memref<8x32xf32, #tpu.memory_space<vmem>>, vector<8x32xf32>
    tpu.vector_store %arg6[%c0_52, %c0_53], %115 {strides = array<i32>} : memref<8x32xf32, #tpu.memory_space<vmem>>, vector<8x32xf32>,
    %c0_54 = arith.constant 0 : index
    %c0_55 = arith.constant 0 : index
    %119 = vector.load %arg5[%c0_54, %c0_55] : memref<8x32xf32, #tpu.memory_space<vmem>>, vector<8x32xf32>
    tpu.vector_store %arg5[%c0_54, %c0_55], %117 {strides = array<i32>} : memref<8x32xf32, #tpu.memory_space<vmem>>, vector<8x32xf32>,
    %120 = arith.index_cast %c2_i32 : i32 to index
    %c0_56 = arith.constant 0 : index
    %c0_57 = arith.constant 0 : index
    %121 = vector.load %arg4[%120, %c0_56, %c0_57] : memref<8x8x32xf32, #tpu.memory_space<vmem>>, vector<1x8x32xf32>
    %122 = vector.shape_cast %121 : vector<1x8x32xf32> to vector<8x32xf32>
    %123 = vector.shape_cast %117 : vector<8x32xf32> to vector<1x8x32xf32>
    tpu.vector_store %arg4[%120, %c0_56, %c0_57], %123 {strides = array<i32>} : memref<8x8x32xf32, #tpu.memory_space<vmem>>, vector<1x8x32xf32>,
    %c3_i32 = arith.constant 3 : i32
    %124 = arith.index_cast %c3_i32 : i32 to index
    %c0_58 = arith.constant 0 : index
    %c0_59 = arith.constant 0 : index
    %125 = vector.load %arg1[%124, %c0_58, %c0_59] : memref<8x8x128xf32, #tpu.memory_space<vmem>>, vector<1x8x128xf32>
    %126 = vector.shape_cast %125 : vector<1x8x128xf32> to vector<8x128xf32>
    %c0_60 = arith.constant 0 : index
    %c0_61 = arith.constant 0 : index
    %127 = vector.load %arg5[%c0_60, %c0_61] : memref<8x32xf32, #tpu.memory_space<vmem>>, vector<8x32xf32>
    %128 = arith.truncf %127 : vector<8x32xf32> to vector<8x32xbf16>
    %c0_62 = arith.constant 0 : index
    %c0_63 = arith.constant 0 : index
    %129 = vector.load %arg2[%c0_62, %c0_63] : memref<32x128xbf16, #tpu.memory_space<vmem>>, vector<32x128xbf16>
    %cst_64 = arith.constant dense<0.000000e+00> : vector<8x128xf32>
    %130 = tpu.matmul %128, %129, %cst_64 {dimension_numbers = #tpu.dot_dimension_numbers<[1], [0], [0], [1], [0, 0, 1, 1], [], []>} : vector<8x32xbf16>, vector<32x128xbf16>, vector<8x128xf32> -> vector<8x128xf32>
    %131 = arith.addf %126, %130 : vector<8x128xf32>
    %132 = vector.extract_strided_slice %131 {offsets = [0, 0], sizes = [8, 32], strides = [1, 1]} : vector<8x128xf32> to vector<8x32xf32>
    %133 = arith.negf %132 : vector<8x32xf32>
    %134 = math.exp %133 : vector<8x32xf32>
    %cst_65 = arith.constant 1.000000e+00 : f32
    %135 = vector.broadcast %cst_65 : f32 to vector<8x32xf32>
    %136 = arith.addf %135, %134 : vector<8x32xf32>
    %137 = arith.divf %135, %136 : vector<8x32xf32>
    %138 = vector.extract_strided_slice %131 {offsets = [0, 32], sizes = [8, 32], strides = [1, 1]} : vector<8x128xf32> to vector<8x32xf32>
    %139 = arith.negf %138 : vector<8x32xf32>
    %140 = math.exp %139 : vector<8x32xf32>
    %cst_66 = arith.constant 1.000000e+00 : f32
    %141 = vector.broadcast %cst_66 : f32 to vector<8x32xf32>
    %142 = arith.addf %141, %140 : vector<8x32xf32>
    %143 = arith.divf %141, %142 : vector<8x32xf32>
    %144 = vector.extract_strided_slice %131 {offsets = [0, 64], sizes = [8, 32], strides = [1, 1]} : vector<8x128xf32> to vector<8x32xf32>
    %145 = math.tanh %144 : vector<8x32xf32>
    %146 = vector.extract_strided_slice %131 {offsets = [0, 96], sizes = [8, 32], strides = [1, 1]} : vector<8x128xf32> to vector<8x32xf32>
    %147 = arith.negf %146 : vector<8x32xf32>
    %148 = math.exp %147 : vector<8x32xf32>
    %cst_67 = arith.constant 1.000000e+00 : f32
    %149 = vector.broadcast %cst_67 : f32 to vector<8x32xf32>
    %150 = arith.addf %149, %148 : vector<8x32xf32>
    %151 = arith.divf %149, %150 : vector<8x32xf32>
    %c0_68 = arith.constant 0 : index
    %c0_69 = arith.constant 0 : index
    %152 = vector.load %arg6[%c0_68, %c0_69] : memref<8x32xf32, #tpu.memory_space<vmem>>, vector<8x32xf32>
    %153 = arith.mulf %143, %152 : vector<8x32xf32>
    %154 = arith.mulf %137, %145 : vector<8x32xf32>
    %155 = arith.addf %153, %154 : vector<8x32xf32>
    %156 = math.tanh %155 : vector<8x32xf32>
    %157 = arith.mulf %151, %156 : vector<8x32xf32>
    %c0_70 = arith.constant 0 : index
    %c0_71 = arith.constant 0 : index
    %158 = vector.load %arg6[%c0_70, %c0_71] : memref<8x32xf32, #tpu.memory_space<vmem>>, vector<8x32xf32>
    tpu.vector_store %arg6[%c0_70, %c0_71], %155 {strides = array<i32>} : memref<8x32xf32, #tpu.memory_space<vmem>>, vector<8x32xf32>,
    %c0_72 = arith.constant 0 : index
    %c0_73 = arith.constant 0 : index
    %159 = vector.load %arg5[%c0_72, %c0_73] : memref<8x32xf32, #tpu.memory_space<vmem>>, vector<8x32xf32>
    tpu.vector_store %arg5[%c0_72, %c0_73], %157 {strides = array<i32>} : memref<8x32xf32, #tpu.memory_space<vmem>>, vector<8x32xf32>,
    %160 = arith.index_cast %c3_i32 : i32 to index
    %c0_74 = arith.constant 0 : index
    %c0_75 = arith.constant 0 : index
    %161 = vector.load %arg4[%160, %c0_74, %c0_75] : memref<8x8x32xf32, #tpu.memory_space<vmem>>, vector<1x8x32xf32>
    %162 = vector.shape_cast %161 : vector<1x8x32xf32> to vector<8x32xf32>
    %163 = vector.shape_cast %157 : vector<8x32xf32> to vector<1x8x32xf32>
    tpu.vector_store %arg4[%160, %c0_74, %c0_75], %163 {strides = array<i32>} : memref<8x8x32xf32, #tpu.memory_space<vmem>>, vector<1x8x32xf32>,
    %c4_i32 = arith.constant 4 : i32
    %164 = arith.index_cast %c4_i32 : i32 to index
    %c0_76 = arith.constant 0 : index
    %c0_77 = arith.constant 0 : index
    %165 = vector.load %arg1[%164, %c0_76, %c0_77] : memref<8x8x128xf32, #tpu.memory_space<vmem>>, vector<1x8x128xf32>
    %166 = vector.shape_cast %165 : vector<1x8x128xf32> to vector<8x128xf32>
    %c0_78 = arith.constant 0 : index
    %c0_79 = arith.constant 0 : index
    %167 = vector.load %arg5[%c0_78, %c0_79] : memref<8x32xf32, #tpu.memory_space<vmem>>, vector<8x32xf32>
    %168 = arith.truncf %167 : vector<8x32xf32> to vector<8x32xbf16>
    %c0_80 = arith.constant 0 : index
    %c0_81 = arith.constant 0 : index
    %169 = vector.load %arg2[%c0_80, %c0_81] : memref<32x128xbf16, #tpu.memory_space<vmem>>, vector<32x128xbf16>
    %cst_82 = arith.constant dense<0.000000e+00> : vector<8x128xf32>
    %170 = tpu.matmul %168, %169, %cst_82 {dimension_numbers = #tpu.dot_dimension_numbers<[1], [0], [0], [1], [0, 0, 1, 1], [], []>} : vector<8x32xbf16>, vector<32x128xbf16>, vector<8x128xf32> -> vector<8x128xf32>
    %171 = arith.addf %166, %170 : vector<8x128xf32>
    %172 = vector.extract_strided_slice %171 {offsets = [0, 0], sizes = [8, 32], strides = [1, 1]} : vector<8x128xf32> to vector<8x32xf32>
    %173 = arith.negf %172 : vector<8x32xf32>
    %174 = math.exp %173 : vector<8x32xf32>
    %cst_83 = arith.constant 1.000000e+00 : f32
    %175 = vector.broadcast %cst_83 : f32 to vector<8x32xf32>
    %176 = arith.addf %175, %174 : vector<8x32xf32>
    %177 = arith.divf %175, %176 : vector<8x32xf32>
    %178 = vector.extract_strided_slice %171 {offsets = [0, 32], sizes = [8, 32], strides = [1, 1]} : vector<8x128xf32> to vector<8x32xf32>
    %179 = arith.negf %178 : vector<8x32xf32>
    %180 = math.exp %179 : vector<8x32xf32>
    %cst_84 = arith.constant 1.000000e+00 : f32
    %181 = vector.broadcast %cst_84 : f32 to vector<8x32xf32>
    %182 = arith.addf %181, %180 : vector<8x32xf32>
    %183 = arith.divf %181, %182 : vector<8x32xf32>
    %184 = vector.extract_strided_slice %171 {offsets = [0, 64], sizes = [8, 32], strides = [1, 1]} : vector<8x128xf32> to vector<8x32xf32>
    %185 = math.tanh %184 : vector<8x32xf32>
    %186 = vector.extract_strided_slice %171 {offsets = [0, 96], sizes = [8, 32], strides = [1, 1]} : vector<8x128xf32> to vector<8x32xf32>
    %187 = arith.negf %186 : vector<8x32xf32>
    %188 = math.exp %187 : vector<8x32xf32>
    %cst_85 = arith.constant 1.000000e+00 : f32
    %189 = vector.broadcast %cst_85 : f32 to vector<8x32xf32>
    %190 = arith.addf %189, %188 : vector<8x32xf32>
    %191 = arith.divf %189, %190 : vector<8x32xf32>
    %c0_86 = arith.constant 0 : index
    %c0_87 = arith.constant 0 : index
    %192 = vector.load %arg6[%c0_86, %c0_87] : memref<8x32xf32, #tpu.memory_space<vmem>>, vector<8x32xf32>
    %193 = arith.mulf %183, %192 : vector<8x32xf32>
    %194 = arith.mulf %177, %185 : vector<8x32xf32>
    %195 = arith.addf %193, %194 : vector<8x32xf32>
    %196 = math.tanh %195 : vector<8x32xf32>
    %197 = arith.mulf %191, %196 : vector<8x32xf32>
    %c0_88 = arith.constant 0 : index
    %c0_89 = arith.constant 0 : index
    %198 = vector.load %arg6[%c0_88, %c0_89] : memref<8x32xf32, #tpu.memory_space<vmem>>, vector<8x32xf32>
    tpu.vector_store %arg6[%c0_88, %c0_89], %195 {strides = array<i32>} : memref<8x32xf32, #tpu.memory_space<vmem>>, vector<8x32xf32>,
    %c0_90 = arith.constant 0 : index
    %c0_91 = arith.constant 0 : index
    %199 = vector.load %arg5[%c0_90, %c0_91] : memref<8x32xf32, #tpu.memory_space<vmem>>, vector<8x32xf32>
    tpu.vector_store %arg5[%c0_90, %c0_91], %197 {strides = array<i32>} : memref<8x32xf32, #tpu.memory_space<vmem>>, vector<8x32xf32>,
    %200 = arith.index_cast %c4_i32 : i32 to index
    %c0_92 = arith.constant 0 : index
    %c0_93 = arith.constant 0 : index
    %201 = vector.load %arg4[%200, %c0_92, %c0_93] : memref<8x8x32xf32, #tpu.memory_space<vmem>>, vector<1x8x32xf32>
    %202 = vector.shape_cast %201 : vector<1x8x32xf32> to vector<8x32xf32>
    %203 = vector.shape_cast %197 : vector<8x32xf32> to vector<1x8x32xf32>
    tpu.vector_store %arg4[%200, %c0_92, %c0_93], %203 {strides = array<i32>} : memref<8x8x32xf32, #tpu.memory_space<vmem>>, vector<1x8x32xf32>,
    %c5_i32 = arith.constant 5 : i32
    %204 = arith.index_cast %c5_i32 : i32 to index
    %c0_94 = arith.constant 0 : index
    %c0_95 = arith.constant 0 : index
    %205 = vector.load %arg1[%204, %c0_94, %c0_95] : memref<8x8x128xf32, #tpu.memory_space<vmem>>, vector<1x8x128xf32>
    %206 = vector.shape_cast %205 : vector<1x8x128xf32> to vector<8x128xf32>
    %c0_96 = arith.constant 0 : index
    %c0_97 = arith.constant 0 : index
    %207 = vector.load %arg5[%c0_96, %c0_97] : memref<8x32xf32, #tpu.memory_space<vmem>>, vector<8x32xf32>
    %208 = arith.truncf %207 : vector<8x32xf32> to vector<8x32xbf16>
    %c0_98 = arith.constant 0 : index
    %c0_99 = arith.constant 0 : index
    %209 = vector.load %arg2[%c0_98, %c0_99] : memref<32x128xbf16, #tpu.memory_space<vmem>>, vector<32x128xbf16>
    %cst_100 = arith.constant dense<0.000000e+00> : vector<8x128xf32>
    %210 = tpu.matmul %208, %209, %cst_100 {dimension_numbers = #tpu.dot_dimension_numbers<[1], [0], [0], [1], [0, 0, 1, 1], [], []>} : vector<8x32xbf16>, vector<32x128xbf16>, vector<8x128xf32> -> vector<8x128xf32>
    %211 = arith.addf %206, %210 : vector<8x128xf32>
    %212 = vector.extract_strided_slice %211 {offsets = [0, 0], sizes = [8, 32], strides = [1, 1]} : vector<8x128xf32> to vector<8x32xf32>
    %213 = arith.negf %212 : vector<8x32xf32>
    %214 = math.exp %213 : vector<8x32xf32>
    %cst_101 = arith.constant 1.000000e+00 : f32
    %215 = vector.broadcast %cst_101 : f32 to vector<8x32xf32>
    %216 = arith.addf %215, %214 : vector<8x32xf32>
    %217 = arith.divf %215, %216 : vector<8x32xf32>
    %218 = vector.extract_strided_slice %211 {offsets = [0, 32], sizes = [8, 32], strides = [1, 1]} : vector<8x128xf32> to vector<8x32xf32>
    %219 = arith.negf %218 : vector<8x32xf32>
    %220 = math.exp %219 : vector<8x32xf32>
    %cst_102 = arith.constant 1.000000e+00 : f32
    %221 = vector.broadcast %cst_102 : f32 to vector<8x32xf32>
    %222 = arith.addf %221, %220 : vector<8x32xf32>
    %223 = arith.divf %221, %222 : vector<8x32xf32>
    %224 = vector.extract_strided_slice %211 {offsets = [0, 64], sizes = [8, 32], strides = [1, 1]} : vector<8x128xf32> to vector<8x32xf32>
    %225 = math.tanh %224 : vector<8x32xf32>
    %226 = vector.extract_strided_slice %211 {offsets = [0, 96], sizes = [8, 32], strides = [1, 1]} : vector<8x128xf32> to vector<8x32xf32>
    %227 = arith.negf %226 : vector<8x32xf32>
    %228 = math.exp %227 : vector<8x32xf32>
    %cst_103 = arith.constant 1.000000e+00 : f32
    %229 = vector.broadcast %cst_103 : f32 to vector<8x32xf32>
    %230 = arith.addf %229, %228 : vector<8x32xf32>
    %231 = arith.divf %229, %230 : vector<8x32xf32>
    %c0_104 = arith.constant 0 : index
    %c0_105 = arith.constant 0 : index
    %232 = vector.load %arg6[%c0_104, %c0_105] : memref<8x32xf32, #tpu.memory_space<vmem>>, vector<8x32xf32>
    %233 = arith.mulf %223, %232 : vector<8x32xf32>
    %234 = arith.mulf %217, %225 : vector<8x32xf32>
    %235 = arith.addf %233, %234 : vector<8x32xf32>
    %236 = math.tanh %235 : vector<8x32xf32>
    %237 = arith.mulf %231, %236 : vector<8x32xf32>
    %c0_106 = arith.constant 0 : index
    %c0_107 = arith.constant 0 : index
    %238 = vector.load %arg6[%c0_106, %c0_107] : memref<8x32xf32, #tpu.memory_space<vmem>>, vector<8x32xf32>
    tpu.vector_store %arg6[%c0_106, %c0_107], %235 {strides = array<i32>} : memref<8x32xf32, #tpu.memory_space<vmem>>, vector<8x32xf32>,
    %c0_108 = arith.constant 0 : index
    %c0_109 = arith.constant 0 : index
    %239 = vector.load %arg5[%c0_108, %c0_109] : memref<8x32xf32, #tpu.memory_space<vmem>>, vector<8x32xf32>
    tpu.vector_store %arg5[%c0_108, %c0_109], %237 {strides = array<i32>} : memref<8x32xf32, #tpu.memory_space<vmem>>, vector<8x32xf32>,
    %240 = arith.index_cast %c5_i32 : i32 to index
    %c0_110 = arith.constant 0 : index
    %c0_111 = arith.constant 0 : index
    %241 = vector.load %arg4[%240, %c0_110, %c0_111] : memref<8x8x32xf32, #tpu.memory_space<vmem>>, vector<1x8x32xf32>
    %242 = vector.shape_cast %241 : vector<1x8x32xf32> to vector<8x32xf32>
    %243 = vector.shape_cast %237 : vector<8x32xf32> to vector<1x8x32xf32>
    tpu.vector_store %arg4[%240, %c0_110, %c0_111], %243 {strides = array<i32>} : memref<8x8x32xf32, #tpu.memory_space<vmem>>, vector<1x8x32xf32>,
    %c6_i32 = arith.constant 6 : i32
    %244 = arith.index_cast %c6_i32 : i32 to index
    %c0_112 = arith.constant 0 : index
    %c0_113 = arith.constant 0 : index
    %245 = vector.load %arg1[%244, %c0_112, %c0_113] : memref<8x8x128xf32, #tpu.memory_space<vmem>>, vector<1x8x128xf32>
    %246 = vector.shape_cast %245 : vector<1x8x128xf32> to vector<8x128xf32>
    %c0_114 = arith.constant 0 : index
    %c0_115 = arith.constant 0 : index
    %247 = vector.load %arg5[%c0_114, %c0_115] : memref<8x32xf32, #tpu.memory_space<vmem>>, vector<8x32xf32>
    %248 = arith.truncf %247 : vector<8x32xf32> to vector<8x32xbf16>
    %c0_116 = arith.constant 0 : index
    %c0_117 = arith.constant 0 : index
    %249 = vector.load %arg2[%c0_116, %c0_117] : memref<32x128xbf16, #tpu.memory_space<vmem>>, vector<32x128xbf16>
    %cst_118 = arith.constant dense<0.000000e+00> : vector<8x128xf32>
    %250 = tpu.matmul %248, %249, %cst_118 {dimension_numbers = #tpu.dot_dimension_numbers<[1], [0], [0], [1], [0, 0, 1, 1], [], []>} : vector<8x32xbf16>, vector<32x128xbf16>, vector<8x128xf32> -> vector<8x128xf32>
    %251 = arith.addf %246, %250 : vector<8x128xf32>
    %252 = vector.extract_strided_slice %251 {offsets = [0, 0], sizes = [8, 32], strides = [1, 1]} : vector<8x128xf32> to vector<8x32xf32>
    %253 = arith.negf %252 : vector<8x32xf32>
    %254 = math.exp %253 : vector<8x32xf32>
    %cst_119 = arith.constant 1.000000e+00 : f32
    %255 = vector.broadcast %cst_119 : f32 to vector<8x32xf32>
    %256 = arith.addf %255, %254 : vector<8x32xf32>
    %257 = arith.divf %255, %256 : vector<8x32xf32>
    %258 = vector.extract_strided_slice %251 {offsets = [0, 32], sizes = [8, 32], strides = [1, 1]} : vector<8x128xf32> to vector<8x32xf32>
    %259 = arith.negf %258 : vector<8x32xf32>
    %260 = math.exp %259 : vector<8x32xf32>
    %cst_120 = arith.constant 1.000000e+00 : f32
    %261 = vector.broadcast %cst_120 : f32 to vector<8x32xf32>
    %262 = arith.addf %261, %260 : vector<8x32xf32>
    %263 = arith.divf %261, %262 : vector<8x32xf32>
    %264 = vector.extract_strided_slice %251 {offsets = [0, 64], sizes = [8, 32], strides = [1, 1]} : vector<8x128xf32> to vector<8x32xf32>
    %265 = math.tanh %264 : vector<8x32xf32>
    %266 = vector.extract_strided_slice %251 {offsets = [0, 96], sizes = [8, 32], strides = [1, 1]} : vector<8x128xf32> to vector<8x32xf32>
    %267 = arith.negf %266 : vector<8x32xf32>
    %268 = math.exp %267 : vector<8x32xf32>
    %cst_121 = arith.constant 1.000000e+00 : f32
    %269 = vector.broadcast %cst_121 : f32 to vector<8x32xf32>
    %270 = arith.addf %269, %268 : vector<8x32xf32>
    %271 = arith.divf %269, %270 : vector<8x32xf32>
    %c0_122 = arith.constant 0 : index
    %c0_123 = arith.constant 0 : index
    %272 = vector.load %arg6[%c0_122, %c0_123] : memref<8x32xf32, #tpu.memory_space<vmem>>, vector<8x32xf32>
    %273 = arith.mulf %263, %272 : vector<8x32xf32>
    %274 = arith.mulf %257, %265 : vector<8x32xf32>
    %275 = arith.addf %273, %274 : vector<8x32xf32>
    %276 = math.tanh %275 : vector<8x32xf32>
    %277 = arith.mulf %271, %276 : vector<8x32xf32>
    %c0_124 = arith.constant 0 : index
    %c0_125 = arith.constant 0 : index
    %278 = vector.load %arg6[%c0_124, %c0_125] : memref<8x32xf32, #tpu.memory_space<vmem>>, vector<8x32xf32>
    tpu.vector_store %arg6[%c0_124, %c0_125], %275 {strides = array<i32>} : memref<8x32xf32, #tpu.memory_space<vmem>>, vector<8x32xf32>,
    %c0_126 = arith.constant 0 : index
    %c0_127 = arith.constant 0 : index
    %279 = vector.load %arg5[%c0_126, %c0_127] : memref<8x32xf32, #tpu.memory_space<vmem>>, vector<8x32xf32>
    tpu.vector_store %arg5[%c0_126, %c0_127], %277 {strides = array<i32>} : memref<8x32xf32, #tpu.memory_space<vmem>>, vector<8x32xf32>,
    %280 = arith.index_cast %c6_i32 : i32 to index
    %c0_128 = arith.constant 0 : index
    %c0_129 = arith.constant 0 : index
    %281 = vector.load %arg4[%280, %c0_128, %c0_129] : memref<8x8x32xf32, #tpu.memory_space<vmem>>, vector<1x8x32xf32>
    %282 = vector.shape_cast %281 : vector<1x8x32xf32> to vector<8x32xf32>
    %283 = vector.shape_cast %277 : vector<8x32xf32> to vector<1x8x32xf32>
    tpu.vector_store %arg4[%280, %c0_128, %c0_129], %283 {strides = array<i32>} : memref<8x8x32xf32, #tpu.memory_space<vmem>>, vector<1x8x32xf32>,
    %c7_i32 = arith.constant 7 : i32
    %284 = arith.index_cast %c7_i32 : i32 to index
    %c0_130 = arith.constant 0 : index
    %c0_131 = arith.constant 0 : index
    %285 = vector.load %arg1[%284, %c0_130, %c0_131] : memref<8x8x128xf32, #tpu.memory_space<vmem>>, vector<1x8x128xf32>
    %286 = vector.shape_cast %285 : vector<1x8x128xf32> to vector<8x128xf32>
    %c0_132 = arith.constant 0 : index
    %c0_133 = arith.constant 0 : index
    %287 = vector.load %arg5[%c0_132, %c0_133] : memref<8x32xf32, #tpu.memory_space<vmem>>, vector<8x32xf32>
    %288 = arith.truncf %287 : vector<8x32xf32> to vector<8x32xbf16>
    %c0_134 = arith.constant 0 : index
    %c0_135 = arith.constant 0 : index
    %289 = vector.load %arg2[%c0_134, %c0_135] : memref<32x128xbf16, #tpu.memory_space<vmem>>, vector<32x128xbf16>
    %cst_136 = arith.constant dense<0.000000e+00> : vector<8x128xf32>
    %290 = tpu.matmul %288, %289, %cst_136 {dimension_numbers = #tpu.dot_dimension_numbers<[1], [0], [0], [1], [0, 0, 1, 1], [], []>} : vector<8x32xbf16>, vector<32x128xbf16>, vector<8x128xf32> -> vector<8x128xf32>
    %291 = arith.addf %286, %290 : vector<8x128xf32>
    %292 = vector.extract_strided_slice %291 {offsets = [0, 0], sizes = [8, 32], strides = [1, 1]} : vector<8x128xf32> to vector<8x32xf32>
    %293 = arith.negf %292 : vector<8x32xf32>
    %294 = math.exp %293 : vector<8x32xf32>
    %cst_137 = arith.constant 1.000000e+00 : f32
    %295 = vector.broadcast %cst_137 : f32 to vector<8x32xf32>
    %296 = arith.addf %295, %294 : vector<8x32xf32>
    %297 = arith.divf %295, %296 : vector<8x32xf32>
    %298 = vector.extract_strided_slice %291 {offsets = [0, 32], sizes = [8, 32], strides = [1, 1]} : vector<8x128xf32> to vector<8x32xf32>
    %299 = arith.negf %298 : vector<8x32xf32>
    %300 = math.exp %299 : vector<8x32xf32>
    %cst_138 = arith.constant 1.000000e+00 : f32
    %301 = vector.broadcast %cst_138 : f32 to vector<8x32xf32>
    %302 = arith.addf %301, %300 : vector<8x32xf32>
    %303 = arith.divf %301, %302 : vector<8x32xf32>
    %304 = vector.extract_strided_slice %291 {offsets = [0, 64], sizes = [8, 32], strides = [1, 1]} : vector<8x128xf32> to vector<8x32xf32>
    %305 = math.tanh %304 : vector<8x32xf32>
    %306 = vector.extract_strided_slice %291 {offsets = [0, 96], sizes = [8, 32], strides = [1, 1]} : vector<8x128xf32> to vector<8x32xf32>
    %307 = arith.negf %306 : vector<8x32xf32>
    %308 = math.exp %307 : vector<8x32xf32>
    %cst_139 = arith.constant 1.000000e+00 : f32
    %309 = vector.broadcast %cst_139 : f32 to vector<8x32xf32>
    %310 = arith.addf %309, %308 : vector<8x32xf32>
    %311 = arith.divf %309, %310 : vector<8x32xf32>
    %c0_140 = arith.constant 0 : index
    %c0_141 = arith.constant 0 : index
    %312 = vector.load %arg6[%c0_140, %c0_141] : memref<8x32xf32, #tpu.memory_space<vmem>>, vector<8x32xf32>
    %313 = arith.mulf %303, %312 : vector<8x32xf32>
    %314 = arith.mulf %297, %305 : vector<8x32xf32>
    %315 = arith.addf %313, %314 : vector<8x32xf32>
    %316 = math.tanh %315 : vector<8x32xf32>
    %317 = arith.mulf %311, %316 : vector<8x32xf32>
    %c0_142 = arith.constant 0 : index
    %c0_143 = arith.constant 0 : index
    %318 = vector.load %arg6[%c0_142, %c0_143] : memref<8x32xf32, #tpu.memory_space<vmem>>, vector<8x32xf32>
    tpu.vector_store %arg6[%c0_142, %c0_143], %315 {strides = array<i32>} : memref<8x32xf32, #tpu.memory_space<vmem>>, vector<8x32xf32>,
    %c0_144 = arith.constant 0 : index
    %c0_145 = arith.constant 0 : index
    %319 = vector.load %arg5[%c0_144, %c0_145] : memref<8x32xf32, #tpu.memory_space<vmem>>, vector<8x32xf32>
    tpu.vector_store %arg5[%c0_144, %c0_145], %317 {strides = array<i32>} : memref<8x32xf32, #tpu.memory_space<vmem>>, vector<8x32xf32>,
    %320 = arith.index_cast %c7_i32 : i32 to index
    %c0_146 = arith.constant 0 : index
    %c0_147 = arith.constant 0 : index
    %321 = vector.load %arg4[%320, %c0_146, %c0_147] : memref<8x8x32xf32, #tpu.memory_space<vmem>>, vector<1x8x32xf32>
    %322 = vector.shape_cast %321 : vector<1x8x32xf32> to vector<8x32xf32>
    %323 = vector.shape_cast %317 : vector<8x32xf32> to vector<1x8x32xf32>
    tpu.vector_store %arg4[%320, %c0_146, %c0_147], %323 {strides = array<i32>} : memref<8x8x32xf32, #tpu.memory_space<vmem>>, vector<1x8x32xf32>,
    %c8_i32 = arith.constant 8 : i32
    %c0_148 = arith.constant 0 : index
    %c0_149 = arith.constant 0 : index
    %c0_150 = arith.constant 0 : index
    %324 = vector.load %arg4[%c0_148, %c0_149, %c0_150] : memref<8x8x32xf32, #tpu.memory_space<vmem>>, vector<8x8x32xf32>
    %325 = arith.truncf %324 : vector<8x8x32xf32> to vector<8x8x32xbf16>
    %c0_151 = arith.constant 0 : index
    %c0_152 = arith.constant 0 : index
    %c0_153 = arith.constant 0 : index
    %326 = vector.load %arg3[%c0_151, %c0_152, %c0_153] : memref<8x8x32xbf16, #tpu.memory_space<vmem>>, vector<8x8x32xbf16>
    tpu.vector_store %arg3[%c0_151, %c0_152, %c0_153], %325 {strides = array<i32>} : memref<8x8x32xbf16, #tpu.memory_space<vmem>>, vector<8x8x32xbf16>,
    return
  }
  func.func @transform_0(%arg0: i32) -> (i32, i32, i32) {
    %c0_i32 = arith.constant 0 : i32
    %c0_i32_0 = arith.constant 0 : i32
    %c0_i32_1 = arith.constant 0 : i32
    %c0_i32_2 = arith.constant 0 : i32
    return %c0_i32, %c0_i32_0, %c0_i32_1 : i32, i32, i32
  }
  func.func @transform_1(%arg0: i32) -> (i32, i32) {
    %c0_i32 = arith.constant 0 : i32
    %c0_i32_0 = arith.constant 0 : i32
    %c0_i32_1 = arith.constant 0 : i32
    return %c0_i32, %c0_i32_0 : i32, i32
  }
  func.func @transform_2(%arg0: i32) -> (i32, i32, i32) {
    %c0_i32 = arith.constant 0 : i32
    %c0_i32_0 = arith.constant 0 : i32
    %c0_i32_1 = arith.constant 0 : i32
    %c0_i32_2 = arith.constant 0 : i32
    return %c0_i32, %c0_i32_0, %c0_i32_1 : i32, i32, i32
  }
}

module attributes {stable_mosaic.version = 11 : i64} {
  func.func @kernel(%arg0: i32, %arg1: memref<8x8x128xf32, #tpu.memory_space<vmem>>, %arg2: memref<32x128xbf16, #tpu.memory_space<vmem>>, %arg3: memref<32x4xbf16, #tpu.memory_space<vmem>>, %arg4: memref<1x4xf32, #tpu.memory_space<vmem>>, %arg5: memref<8x8x4xf32, #tpu.memory_space<vmem>>, %arg6: memref<8x8x32xf32, #tpu.memory_space<vmem>>, %arg7: memref<8x32xf32, #tpu.memory_space<vmem>>, %arg8: memref<8x32xf32, #tpu.memory_space<vmem>>) attributes {dimension_semantics = [#tpu.dimension_semantics<arbitrary>], iteration_bounds = array<i64: 1>, scalar_prefetch = 0 : i64, scratch_operands = 3 : i64, tpu.core_type = #tpu.core_type<tc>, window_params = [{pipeline_mode = #tpu.pipeline_mode<synchronous>, transform_indices = @transform_0, window_bounds = array<i64: 8, 8, 128>}, {pipeline_mode = #tpu.pipeline_mode<synchronous>, transform_indices = @transform_1, window_bounds = array<i64: 32, 128>}, {pipeline_mode = #tpu.pipeline_mode<synchronous>, transform_indices = @transform_2, window_bounds = array<i64: 32, 4>}, {pipeline_mode = #tpu.pipeline_mode<synchronous>, transform_indices = @transform_3, window_bounds = array<i64: 1, 4>}, {pipeline_mode = #tpu.pipeline_mode<synchronous>, transform_indices = @transform_4, window_bounds = array<i64: 8, 8, 4>}]} {
    %cst = arith.constant 0.000000e+00 : f32
    %0 = vector.broadcast %cst : f32 to vector<8x32xf32>
    %c0 = arith.constant 0 : index
    %c0_0 = arith.constant 0 : index
    %1 = vector.load %arg7[%c0, %c0_0] : memref<8x32xf32, #tpu.memory_space<vmem>>, vector<8x32xf32>
    tpu.vector_store %arg7[%c0, %c0_0], %0 {strides = array<i32>} : memref<8x32xf32, #tpu.memory_space<vmem>>, vector<8x32xf32>,
    %cst_1 = arith.constant 0.000000e+00 : f32
    %2 = vector.broadcast %cst_1 : f32 to vector<8x32xf32>
    %c0_2 = arith.constant 0 : index
    %c0_3 = arith.constant 0 : index
    %3 = vector.load %arg8[%c0_2, %c0_3] : memref<8x32xf32, #tpu.memory_space<vmem>>, vector<8x32xf32>
    tpu.vector_store %arg8[%c0_2, %c0_3], %2 {strides = array<i32>} : memref<8x32xf32, #tpu.memory_space<vmem>>, vector<8x32xf32>,
    %c0_i32 = arith.constant 0 : i32
    %4 = arith.index_cast %c0_i32 : i32 to index
    %c0_4 = arith.constant 0 : index
    %c0_5 = arith.constant 0 : index
    %5 = vector.load %arg1[%4, %c0_4, %c0_5] : memref<8x8x128xf32, #tpu.memory_space<vmem>>, vector<1x8x128xf32>
    %6 = vector.shape_cast %5 : vector<1x8x128xf32> to vector<8x128xf32>
    %c0_6 = arith.constant 0 : index
    %c0_7 = arith.constant 0 : index
    %7 = vector.load %arg7[%c0_6, %c0_7] : memref<8x32xf32, #tpu.memory_space<vmem>>, vector<8x32xf32>
    %8 = arith.truncf %7 : vector<8x32xf32> to vector<8x32xbf16>
    %c0_8 = arith.constant 0 : index
    %c0_9 = arith.constant 0 : index
    %9 = vector.load %arg2[%c0_8, %c0_9] : memref<32x128xbf16, #tpu.memory_space<vmem>>, vector<32x128xbf16>
    %cst_10 = arith.constant dense<0.000000e+00> : vector<8x128xf32>
    %10 = tpu.matmul %8, %9, %cst_10 {dimension_numbers = #tpu.dot_dimension_numbers<[1], [0], [0], [1], [0, 0, 1, 1], [], []>} : vector<8x32xbf16>, vector<32x128xbf16>, vector<8x128xf32> -> vector<8x128xf32>
    %11 = arith.addf %6, %10 : vector<8x128xf32>
    %12 = vector.extract_strided_slice %11 {offsets = [0, 0], sizes = [8, 32], strides = [1, 1]} : vector<8x128xf32> to vector<8x32xf32>
    %13 = arith.negf %12 : vector<8x32xf32>
    %14 = math.exp %13 : vector<8x32xf32>
    %cst_11 = arith.constant 1.000000e+00 : f32
    %15 = vector.broadcast %cst_11 : f32 to vector<8x32xf32>
    %16 = arith.addf %15, %14 : vector<8x32xf32>
    %17 = arith.divf %15, %16 : vector<8x32xf32>
    %18 = vector.extract_strided_slice %11 {offsets = [0, 32], sizes = [8, 32], strides = [1, 1]} : vector<8x128xf32> to vector<8x32xf32>
    %19 = arith.negf %18 : vector<8x32xf32>
    %20 = math.exp %19 : vector<8x32xf32>
    %cst_12 = arith.constant 1.000000e+00 : f32
    %21 = vector.broadcast %cst_12 : f32 to vector<8x32xf32>
    %22 = arith.addf %21, %20 : vector<8x32xf32>
    %23 = arith.divf %21, %22 : vector<8x32xf32>
    %24 = vector.extract_strided_slice %11 {offsets = [0, 64], sizes = [8, 32], strides = [1, 1]} : vector<8x128xf32> to vector<8x32xf32>
    %25 = math.tanh %24 : vector<8x32xf32>
    %26 = vector.extract_strided_slice %11 {offsets = [0, 96], sizes = [8, 32], strides = [1, 1]} : vector<8x128xf32> to vector<8x32xf32>
    %27 = arith.negf %26 : vector<8x32xf32>
    %28 = math.exp %27 : vector<8x32xf32>
    %cst_13 = arith.constant 1.000000e+00 : f32
    %29 = vector.broadcast %cst_13 : f32 to vector<8x32xf32>
    %30 = arith.addf %29, %28 : vector<8x32xf32>
    %31 = arith.divf %29, %30 : vector<8x32xf32>
    %c0_14 = arith.constant 0 : index
    %c0_15 = arith.constant 0 : index
    %32 = vector.load %arg8[%c0_14, %c0_15] : memref<8x32xf32, #tpu.memory_space<vmem>>, vector<8x32xf32>
    %33 = arith.mulf %23, %32 : vector<8x32xf32>
    %34 = arith.mulf %17, %25 : vector<8x32xf32>
    %35 = arith.addf %33, %34 : vector<8x32xf32>
    %36 = math.tanh %35 : vector<8x32xf32>
    %37 = arith.mulf %31, %36 : vector<8x32xf32>
    %c0_16 = arith.constant 0 : index
    %c0_17 = arith.constant 0 : index
    %38 = vector.load %arg8[%c0_16, %c0_17] : memref<8x32xf32, #tpu.memory_space<vmem>>, vector<8x32xf32>
    tpu.vector_store %arg8[%c0_16, %c0_17], %35 {strides = array<i32>} : memref<8x32xf32, #tpu.memory_space<vmem>>, vector<8x32xf32>,
    %c0_18 = arith.constant 0 : index
    %c0_19 = arith.constant 0 : index
    %39 = vector.load %arg7[%c0_18, %c0_19] : memref<8x32xf32, #tpu.memory_space<vmem>>, vector<8x32xf32>
    tpu.vector_store %arg7[%c0_18, %c0_19], %37 {strides = array<i32>} : memref<8x32xf32, #tpu.memory_space<vmem>>, vector<8x32xf32>,
    %40 = arith.index_cast %c0_i32 : i32 to index
    %c0_20 = arith.constant 0 : index
    %c0_21 = arith.constant 0 : index
    %41 = vector.load %arg6[%40, %c0_20, %c0_21] : memref<8x8x32xf32, #tpu.memory_space<vmem>>, vector<1x8x32xf32>
    %42 = vector.shape_cast %41 : vector<1x8x32xf32> to vector<8x32xf32>
    %43 = vector.shape_cast %37 : vector<8x32xf32> to vector<1x8x32xf32>
    tpu.vector_store %arg6[%40, %c0_20, %c0_21], %43 {strides = array<i32>} : memref<8x8x32xf32, #tpu.memory_space<vmem>>, vector<1x8x32xf32>,
    %c1_i32 = arith.constant 1 : i32
    %44 = arith.index_cast %c1_i32 : i32 to index
    %c0_22 = arith.constant 0 : index
    %c0_23 = arith.constant 0 : index
    %45 = vector.load %arg1[%44, %c0_22, %c0_23] : memref<8x8x128xf32, #tpu.memory_space<vmem>>, vector<1x8x128xf32>
    %46 = vector.shape_cast %45 : vector<1x8x128xf32> to vector<8x128xf32>
    %c0_24 = arith.constant 0 : index
    %c0_25 = arith.constant 0 : index
    %47 = vector.load %arg7[%c0_24, %c0_25] : memref<8x32xf32, #tpu.memory_space<vmem>>, vector<8x32xf32>
    %48 = arith.truncf %47 : vector<8x32xf32> to vector<8x32xbf16>
    %c0_26 = arith.constant 0 : index
    %c0_27 = arith.constant 0 : index
    %49 = vector.load %arg2[%c0_26, %c0_27] : memref<32x128xbf16, #tpu.memory_space<vmem>>, vector<32x128xbf16>
    %cst_28 = arith.constant dense<0.000000e+00> : vector<8x128xf32>
    %50 = tpu.matmul %48, %49, %cst_28 {dimension_numbers = #tpu.dot_dimension_numbers<[1], [0], [0], [1], [0, 0, 1, 1], [], []>} : vector<8x32xbf16>, vector<32x128xbf16>, vector<8x128xf32> -> vector<8x128xf32>
    %51 = arith.addf %46, %50 : vector<8x128xf32>
    %52 = vector.extract_strided_slice %51 {offsets = [0, 0], sizes = [8, 32], strides = [1, 1]} : vector<8x128xf32> to vector<8x32xf32>
    %53 = arith.negf %52 : vector<8x32xf32>
    %54 = math.exp %53 : vector<8x32xf32>
    %cst_29 = arith.constant 1.000000e+00 : f32
    %55 = vector.broadcast %cst_29 : f32 to vector<8x32xf32>
    %56 = arith.addf %55, %54 : vector<8x32xf32>
    %57 = arith.divf %55, %56 : vector<8x32xf32>
    %58 = vector.extract_strided_slice %51 {offsets = [0, 32], sizes = [8, 32], strides = [1, 1]} : vector<8x128xf32> to vector<8x32xf32>
    %59 = arith.negf %58 : vector<8x32xf32>
    %60 = math.exp %59 : vector<8x32xf32>
    %cst_30 = arith.constant 1.000000e+00 : f32
    %61 = vector.broadcast %cst_30 : f32 to vector<8x32xf32>
    %62 = arith.addf %61, %60 : vector<8x32xf32>
    %63 = arith.divf %61, %62 : vector<8x32xf32>
    %64 = vector.extract_strided_slice %51 {offsets = [0, 64], sizes = [8, 32], strides = [1, 1]} : vector<8x128xf32> to vector<8x32xf32>
    %65 = math.tanh %64 : vector<8x32xf32>
    %66 = vector.extract_strided_slice %51 {offsets = [0, 96], sizes = [8, 32], strides = [1, 1]} : vector<8x128xf32> to vector<8x32xf32>
    %67 = arith.negf %66 : vector<8x32xf32>
    %68 = math.exp %67 : vector<8x32xf32>
    %cst_31 = arith.constant 1.000000e+00 : f32
    %69 = vector.broadcast %cst_31 : f32 to vector<8x32xf32>
    %70 = arith.addf %69, %68 : vector<8x32xf32>
    %71 = arith.divf %69, %70 : vector<8x32xf32>
    %c0_32 = arith.constant 0 : index
    %c0_33 = arith.constant 0 : index
    %72 = vector.load %arg8[%c0_32, %c0_33] : memref<8x32xf32, #tpu.memory_space<vmem>>, vector<8x32xf32>
    %73 = arith.mulf %63, %72 : vector<8x32xf32>
    %74 = arith.mulf %57, %65 : vector<8x32xf32>
    %75 = arith.addf %73, %74 : vector<8x32xf32>
    %76 = math.tanh %75 : vector<8x32xf32>
    %77 = arith.mulf %71, %76 : vector<8x32xf32>
    %c0_34 = arith.constant 0 : index
    %c0_35 = arith.constant 0 : index
    %78 = vector.load %arg8[%c0_34, %c0_35] : memref<8x32xf32, #tpu.memory_space<vmem>>, vector<8x32xf32>
    tpu.vector_store %arg8[%c0_34, %c0_35], %75 {strides = array<i32>} : memref<8x32xf32, #tpu.memory_space<vmem>>, vector<8x32xf32>,
    %c0_36 = arith.constant 0 : index
    %c0_37 = arith.constant 0 : index
    %79 = vector.load %arg7[%c0_36, %c0_37] : memref<8x32xf32, #tpu.memory_space<vmem>>, vector<8x32xf32>
    tpu.vector_store %arg7[%c0_36, %c0_37], %77 {strides = array<i32>} : memref<8x32xf32, #tpu.memory_space<vmem>>, vector<8x32xf32>,
    %80 = arith.index_cast %c1_i32 : i32 to index
    %c0_38 = arith.constant 0 : index
    %c0_39 = arith.constant 0 : index
    %81 = vector.load %arg6[%80, %c0_38, %c0_39] : memref<8x8x32xf32, #tpu.memory_space<vmem>>, vector<1x8x32xf32>
    %82 = vector.shape_cast %81 : vector<1x8x32xf32> to vector<8x32xf32>
    %83 = vector.shape_cast %77 : vector<8x32xf32> to vector<1x8x32xf32>
    tpu.vector_store %arg6[%80, %c0_38, %c0_39], %83 {strides = array<i32>} : memref<8x8x32xf32, #tpu.memory_space<vmem>>, vector<1x8x32xf32>,
    %c2_i32 = arith.constant 2 : i32
    %84 = arith.index_cast %c2_i32 : i32 to index
    %c0_40 = arith.constant 0 : index
    %c0_41 = arith.constant 0 : index
    %85 = vector.load %arg1[%84, %c0_40, %c0_41] : memref<8x8x128xf32, #tpu.memory_space<vmem>>, vector<1x8x128xf32>
    %86 = vector.shape_cast %85 : vector<1x8x128xf32> to vector<8x128xf32>
    %c0_42 = arith.constant 0 : index
    %c0_43 = arith.constant 0 : index
    %87 = vector.load %arg7[%c0_42, %c0_43] : memref<8x32xf32, #tpu.memory_space<vmem>>, vector<8x32xf32>
    %88 = arith.truncf %87 : vector<8x32xf32> to vector<8x32xbf16>
    %c0_44 = arith.constant 0 : index
    %c0_45 = arith.constant 0 : index
    %89 = vector.load %arg2[%c0_44, %c0_45] : memref<32x128xbf16, #tpu.memory_space<vmem>>, vector<32x128xbf16>
    %cst_46 = arith.constant dense<0.000000e+00> : vector<8x128xf32>
    %90 = tpu.matmul %88, %89, %cst_46 {dimension_numbers = #tpu.dot_dimension_numbers<[1], [0], [0], [1], [0, 0, 1, 1], [], []>} : vector<8x32xbf16>, vector<32x128xbf16>, vector<8x128xf32> -> vector<8x128xf32>
    %91 = arith.addf %86, %90 : vector<8x128xf32>
    %92 = vector.extract_strided_slice %91 {offsets = [0, 0], sizes = [8, 32], strides = [1, 1]} : vector<8x128xf32> to vector<8x32xf32>
    %93 = arith.negf %92 : vector<8x32xf32>
    %94 = math.exp %93 : vector<8x32xf32>
    %cst_47 = arith.constant 1.000000e+00 : f32
    %95 = vector.broadcast %cst_47 : f32 to vector<8x32xf32>
    %96 = arith.addf %95, %94 : vector<8x32xf32>
    %97 = arith.divf %95, %96 : vector<8x32xf32>
    %98 = vector.extract_strided_slice %91 {offsets = [0, 32], sizes = [8, 32], strides = [1, 1]} : vector<8x128xf32> to vector<8x32xf32>
    %99 = arith.negf %98 : vector<8x32xf32>
    %100 = math.exp %99 : vector<8x32xf32>
    %cst_48 = arith.constant 1.000000e+00 : f32
    %101 = vector.broadcast %cst_48 : f32 to vector<8x32xf32>
    %102 = arith.addf %101, %100 : vector<8x32xf32>
    %103 = arith.divf %101, %102 : vector<8x32xf32>
    %104 = vector.extract_strided_slice %91 {offsets = [0, 64], sizes = [8, 32], strides = [1, 1]} : vector<8x128xf32> to vector<8x32xf32>
    %105 = math.tanh %104 : vector<8x32xf32>
    %106 = vector.extract_strided_slice %91 {offsets = [0, 96], sizes = [8, 32], strides = [1, 1]} : vector<8x128xf32> to vector<8x32xf32>
    %107 = arith.negf %106 : vector<8x32xf32>
    %108 = math.exp %107 : vector<8x32xf32>
    %cst_49 = arith.constant 1.000000e+00 : f32
    %109 = vector.broadcast %cst_49 : f32 to vector<8x32xf32>
    %110 = arith.addf %109, %108 : vector<8x32xf32>
    %111 = arith.divf %109, %110 : vector<8x32xf32>
    %c0_50 = arith.constant 0 : index
    %c0_51 = arith.constant 0 : index
    %112 = vector.load %arg8[%c0_50, %c0_51] : memref<8x32xf32, #tpu.memory_space<vmem>>, vector<8x32xf32>
    %113 = arith.mulf %103, %112 : vector<8x32xf32>
    %114 = arith.mulf %97, %105 : vector<8x32xf32>
    %115 = arith.addf %113, %114 : vector<8x32xf32>
    %116 = math.tanh %115 : vector<8x32xf32>
    %117 = arith.mulf %111, %116 : vector<8x32xf32>
    %c0_52 = arith.constant 0 : index
    %c0_53 = arith.constant 0 : index
    %118 = vector.load %arg8[%c0_52, %c0_53] : memref<8x32xf32, #tpu.memory_space<vmem>>, vector<8x32xf32>
    tpu.vector_store %arg8[%c0_52, %c0_53], %115 {strides = array<i32>} : memref<8x32xf32, #tpu.memory_space<vmem>>, vector<8x32xf32>,
    %c0_54 = arith.constant 0 : index
    %c0_55 = arith.constant 0 : index
    %119 = vector.load %arg7[%c0_54, %c0_55] : memref<8x32xf32, #tpu.memory_space<vmem>>, vector<8x32xf32>
    tpu.vector_store %arg7[%c0_54, %c0_55], %117 {strides = array<i32>} : memref<8x32xf32, #tpu.memory_space<vmem>>, vector<8x32xf32>,
    %120 = arith.index_cast %c2_i32 : i32 to index
    %c0_56 = arith.constant 0 : index
    %c0_57 = arith.constant 0 : index
    %121 = vector.load %arg6[%120, %c0_56, %c0_57] : memref<8x8x32xf32, #tpu.memory_space<vmem>>, vector<1x8x32xf32>
    %122 = vector.shape_cast %121 : vector<1x8x32xf32> to vector<8x32xf32>
    %123 = vector.shape_cast %117 : vector<8x32xf32> to vector<1x8x32xf32>
    tpu.vector_store %arg6[%120, %c0_56, %c0_57], %123 {strides = array<i32>} : memref<8x8x32xf32, #tpu.memory_space<vmem>>, vector<1x8x32xf32>,
    %c3_i32 = arith.constant 3 : i32
    %124 = arith.index_cast %c3_i32 : i32 to index
    %c0_58 = arith.constant 0 : index
    %c0_59 = arith.constant 0 : index
    %125 = vector.load %arg1[%124, %c0_58, %c0_59] : memref<8x8x128xf32, #tpu.memory_space<vmem>>, vector<1x8x128xf32>
    %126 = vector.shape_cast %125 : vector<1x8x128xf32> to vector<8x128xf32>
    %c0_60 = arith.constant 0 : index
    %c0_61 = arith.constant 0 : index
    %127 = vector.load %arg7[%c0_60, %c0_61] : memref<8x32xf32, #tpu.memory_space<vmem>>, vector<8x32xf32>
    %128 = arith.truncf %127 : vector<8x32xf32> to vector<8x32xbf16>
    %c0_62 = arith.constant 0 : index
    %c0_63 = arith.constant 0 : index
    %129 = vector.load %arg2[%c0_62, %c0_63] : memref<32x128xbf16, #tpu.memory_space<vmem>>, vector<32x128xbf16>
    %cst_64 = arith.constant dense<0.000000e+00> : vector<8x128xf32>
    %130 = tpu.matmul %128, %129, %cst_64 {dimension_numbers = #tpu.dot_dimension_numbers<[1], [0], [0], [1], [0, 0, 1, 1], [], []>} : vector<8x32xbf16>, vector<32x128xbf16>, vector<8x128xf32> -> vector<8x128xf32>
    %131 = arith.addf %126, %130 : vector<8x128xf32>
    %132 = vector.extract_strided_slice %131 {offsets = [0, 0], sizes = [8, 32], strides = [1, 1]} : vector<8x128xf32> to vector<8x32xf32>
    %133 = arith.negf %132 : vector<8x32xf32>
    %134 = math.exp %133 : vector<8x32xf32>
    %cst_65 = arith.constant 1.000000e+00 : f32
    %135 = vector.broadcast %cst_65 : f32 to vector<8x32xf32>
    %136 = arith.addf %135, %134 : vector<8x32xf32>
    %137 = arith.divf %135, %136 : vector<8x32xf32>
    %138 = vector.extract_strided_slice %131 {offsets = [0, 32], sizes = [8, 32], strides = [1, 1]} : vector<8x128xf32> to vector<8x32xf32>
    %139 = arith.negf %138 : vector<8x32xf32>
    %140 = math.exp %139 : vector<8x32xf32>
    %cst_66 = arith.constant 1.000000e+00 : f32
    %141 = vector.broadcast %cst_66 : f32 to vector<8x32xf32>
    %142 = arith.addf %141, %140 : vector<8x32xf32>
    %143 = arith.divf %141, %142 : vector<8x32xf32>
    %144 = vector.extract_strided_slice %131 {offsets = [0, 64], sizes = [8, 32], strides = [1, 1]} : vector<8x128xf32> to vector<8x32xf32>
    %145 = math.tanh %144 : vector<8x32xf32>
    %146 = vector.extract_strided_slice %131 {offsets = [0, 96], sizes = [8, 32], strides = [1, 1]} : vector<8x128xf32> to vector<8x32xf32>
    %147 = arith.negf %146 : vector<8x32xf32>
    %148 = math.exp %147 : vector<8x32xf32>
    %cst_67 = arith.constant 1.000000e+00 : f32
    %149 = vector.broadcast %cst_67 : f32 to vector<8x32xf32>
    %150 = arith.addf %149, %148 : vector<8x32xf32>
    %151 = arith.divf %149, %150 : vector<8x32xf32>
    %c0_68 = arith.constant 0 : index
    %c0_69 = arith.constant 0 : index
    %152 = vector.load %arg8[%c0_68, %c0_69] : memref<8x32xf32, #tpu.memory_space<vmem>>, vector<8x32xf32>
    %153 = arith.mulf %143, %152 : vector<8x32xf32>
    %154 = arith.mulf %137, %145 : vector<8x32xf32>
    %155 = arith.addf %153, %154 : vector<8x32xf32>
    %156 = math.tanh %155 : vector<8x32xf32>
    %157 = arith.mulf %151, %156 : vector<8x32xf32>
    %c0_70 = arith.constant 0 : index
    %c0_71 = arith.constant 0 : index
    %158 = vector.load %arg8[%c0_70, %c0_71] : memref<8x32xf32, #tpu.memory_space<vmem>>, vector<8x32xf32>
    tpu.vector_store %arg8[%c0_70, %c0_71], %155 {strides = array<i32>} : memref<8x32xf32, #tpu.memory_space<vmem>>, vector<8x32xf32>,
    %c0_72 = arith.constant 0 : index
    %c0_73 = arith.constant 0 : index
    %159 = vector.load %arg7[%c0_72, %c0_73] : memref<8x32xf32, #tpu.memory_space<vmem>>, vector<8x32xf32>
    tpu.vector_store %arg7[%c0_72, %c0_73], %157 {strides = array<i32>} : memref<8x32xf32, #tpu.memory_space<vmem>>, vector<8x32xf32>,
    %160 = arith.index_cast %c3_i32 : i32 to index
    %c0_74 = arith.constant 0 : index
    %c0_75 = arith.constant 0 : index
    %161 = vector.load %arg6[%160, %c0_74, %c0_75] : memref<8x8x32xf32, #tpu.memory_space<vmem>>, vector<1x8x32xf32>
    %162 = vector.shape_cast %161 : vector<1x8x32xf32> to vector<8x32xf32>
    %163 = vector.shape_cast %157 : vector<8x32xf32> to vector<1x8x32xf32>
    tpu.vector_store %arg6[%160, %c0_74, %c0_75], %163 {strides = array<i32>} : memref<8x8x32xf32, #tpu.memory_space<vmem>>, vector<1x8x32xf32>,
    %c4_i32 = arith.constant 4 : i32
    %164 = arith.index_cast %c4_i32 : i32 to index
    %c0_76 = arith.constant 0 : index
    %c0_77 = arith.constant 0 : index
    %165 = vector.load %arg1[%164, %c0_76, %c0_77] : memref<8x8x128xf32, #tpu.memory_space<vmem>>, vector<1x8x128xf32>
    %166 = vector.shape_cast %165 : vector<1x8x128xf32> to vector<8x128xf32>
    %c0_78 = arith.constant 0 : index
    %c0_79 = arith.constant 0 : index
    %167 = vector.load %arg7[%c0_78, %c0_79] : memref<8x32xf32, #tpu.memory_space<vmem>>, vector<8x32xf32>
    %168 = arith.truncf %167 : vector<8x32xf32> to vector<8x32xbf16>
    %c0_80 = arith.constant 0 : index
    %c0_81 = arith.constant 0 : index
    %169 = vector.load %arg2[%c0_80, %c0_81] : memref<32x128xbf16, #tpu.memory_space<vmem>>, vector<32x128xbf16>
    %cst_82 = arith.constant dense<0.000000e+00> : vector<8x128xf32>
    %170 = tpu.matmul %168, %169, %cst_82 {dimension_numbers = #tpu.dot_dimension_numbers<[1], [0], [0], [1], [0, 0, 1, 1], [], []>} : vector<8x32xbf16>, vector<32x128xbf16>, vector<8x128xf32> -> vector<8x128xf32>
    %171 = arith.addf %166, %170 : vector<8x128xf32>
    %172 = vector.extract_strided_slice %171 {offsets = [0, 0], sizes = [8, 32], strides = [1, 1]} : vector<8x128xf32> to vector<8x32xf32>
    %173 = arith.negf %172 : vector<8x32xf32>
    %174 = math.exp %173 : vector<8x32xf32>
    %cst_83 = arith.constant 1.000000e+00 : f32
    %175 = vector.broadcast %cst_83 : f32 to vector<8x32xf32>
    %176 = arith.addf %175, %174 : vector<8x32xf32>
    %177 = arith.divf %175, %176 : vector<8x32xf32>
    %178 = vector.extract_strided_slice %171 {offsets = [0, 32], sizes = [8, 32], strides = [1, 1]} : vector<8x128xf32> to vector<8x32xf32>
    %179 = arith.negf %178 : vector<8x32xf32>
    %180 = math.exp %179 : vector<8x32xf32>
    %cst_84 = arith.constant 1.000000e+00 : f32
    %181 = vector.broadcast %cst_84 : f32 to vector<8x32xf32>
    %182 = arith.addf %181, %180 : vector<8x32xf32>
    %183 = arith.divf %181, %182 : vector<8x32xf32>
    %184 = vector.extract_strided_slice %171 {offsets = [0, 64], sizes = [8, 32], strides = [1, 1]} : vector<8x128xf32> to vector<8x32xf32>
    %185 = math.tanh %184 : vector<8x32xf32>
    %186 = vector.extract_strided_slice %171 {offsets = [0, 96], sizes = [8, 32], strides = [1, 1]} : vector<8x128xf32> to vector<8x32xf32>
    %187 = arith.negf %186 : vector<8x32xf32>
    %188 = math.exp %187 : vector<8x32xf32>
    %cst_85 = arith.constant 1.000000e+00 : f32
    %189 = vector.broadcast %cst_85 : f32 to vector<8x32xf32>
    %190 = arith.addf %189, %188 : vector<8x32xf32>
    %191 = arith.divf %189, %190 : vector<8x32xf32>
    %c0_86 = arith.constant 0 : index
    %c0_87 = arith.constant 0 : index
    %192 = vector.load %arg8[%c0_86, %c0_87] : memref<8x32xf32, #tpu.memory_space<vmem>>, vector<8x32xf32>
    %193 = arith.mulf %183, %192 : vector<8x32xf32>
    %194 = arith.mulf %177, %185 : vector<8x32xf32>
    %195 = arith.addf %193, %194 : vector<8x32xf32>
    %196 = math.tanh %195 : vector<8x32xf32>
    %197 = arith.mulf %191, %196 : vector<8x32xf32>
    %c0_88 = arith.constant 0 : index
    %c0_89 = arith.constant 0 : index
    %198 = vector.load %arg8[%c0_88, %c0_89] : memref<8x32xf32, #tpu.memory_space<vmem>>, vector<8x32xf32>
    tpu.vector_store %arg8[%c0_88, %c0_89], %195 {strides = array<i32>} : memref<8x32xf32, #tpu.memory_space<vmem>>, vector<8x32xf32>,
    %c0_90 = arith.constant 0 : index
    %c0_91 = arith.constant 0 : index
    %199 = vector.load %arg7[%c0_90, %c0_91] : memref<8x32xf32, #tpu.memory_space<vmem>>, vector<8x32xf32>
    tpu.vector_store %arg7[%c0_90, %c0_91], %197 {strides = array<i32>} : memref<8x32xf32, #tpu.memory_space<vmem>>, vector<8x32xf32>,
    %200 = arith.index_cast %c4_i32 : i32 to index
    %c0_92 = arith.constant 0 : index
    %c0_93 = arith.constant 0 : index
    %201 = vector.load %arg6[%200, %c0_92, %c0_93] : memref<8x8x32xf32, #tpu.memory_space<vmem>>, vector<1x8x32xf32>
    %202 = vector.shape_cast %201 : vector<1x8x32xf32> to vector<8x32xf32>
    %203 = vector.shape_cast %197 : vector<8x32xf32> to vector<1x8x32xf32>
    tpu.vector_store %arg6[%200, %c0_92, %c0_93], %203 {strides = array<i32>} : memref<8x8x32xf32, #tpu.memory_space<vmem>>, vector<1x8x32xf32>,
    %c5_i32 = arith.constant 5 : i32
    %204 = arith.index_cast %c5_i32 : i32 to index
    %c0_94 = arith.constant 0 : index
    %c0_95 = arith.constant 0 : index
    %205 = vector.load %arg1[%204, %c0_94, %c0_95] : memref<8x8x128xf32, #tpu.memory_space<vmem>>, vector<1x8x128xf32>
    %206 = vector.shape_cast %205 : vector<1x8x128xf32> to vector<8x128xf32>
    %c0_96 = arith.constant 0 : index
    %c0_97 = arith.constant 0 : index
    %207 = vector.load %arg7[%c0_96, %c0_97] : memref<8x32xf32, #tpu.memory_space<vmem>>, vector<8x32xf32>
    %208 = arith.truncf %207 : vector<8x32xf32> to vector<8x32xbf16>
    %c0_98 = arith.constant 0 : index
    %c0_99 = arith.constant 0 : index
    %209 = vector.load %arg2[%c0_98, %c0_99] : memref<32x128xbf16, #tpu.memory_space<vmem>>, vector<32x128xbf16>
    %cst_100 = arith.constant dense<0.000000e+00> : vector<8x128xf32>
    %210 = tpu.matmul %208, %209, %cst_100 {dimension_numbers = #tpu.dot_dimension_numbers<[1], [0], [0], [1], [0, 0, 1, 1], [], []>} : vector<8x32xbf16>, vector<32x128xbf16>, vector<8x128xf32> -> vector<8x128xf32>
    %211 = arith.addf %206, %210 : vector<8x128xf32>
    %212 = vector.extract_strided_slice %211 {offsets = [0, 0], sizes = [8, 32], strides = [1, 1]} : vector<8x128xf32> to vector<8x32xf32>
    %213 = arith.negf %212 : vector<8x32xf32>
    %214 = math.exp %213 : vector<8x32xf32>
    %cst_101 = arith.constant 1.000000e+00 : f32
    %215 = vector.broadcast %cst_101 : f32 to vector<8x32xf32>
    %216 = arith.addf %215, %214 : vector<8x32xf32>
    %217 = arith.divf %215, %216 : vector<8x32xf32>
    %218 = vector.extract_strided_slice %211 {offsets = [0, 32], sizes = [8, 32], strides = [1, 1]} : vector<8x128xf32> to vector<8x32xf32>
    %219 = arith.negf %218 : vector<8x32xf32>
    %220 = math.exp %219 : vector<8x32xf32>
    %cst_102 = arith.constant 1.000000e+00 : f32
    %221 = vector.broadcast %cst_102 : f32 to vector<8x32xf32>
    %222 = arith.addf %221, %220 : vector<8x32xf32>
    %223 = arith.divf %221, %222 : vector<8x32xf32>
    %224 = vector.extract_strided_slice %211 {offsets = [0, 64], sizes = [8, 32], strides = [1, 1]} : vector<8x128xf32> to vector<8x32xf32>
    %225 = math.tanh %224 : vector<8x32xf32>
    %226 = vector.extract_strided_slice %211 {offsets = [0, 96], sizes = [8, 32], strides = [1, 1]} : vector<8x128xf32> to vector<8x32xf32>
    %227 = arith.negf %226 : vector<8x32xf32>
    %228 = math.exp %227 : vector<8x32xf32>
    %cst_103 = arith.constant 1.000000e+00 : f32
    %229 = vector.broadcast %cst_103 : f32 to vector<8x32xf32>
    %230 = arith.addf %229, %228 : vector<8x32xf32>
    %231 = arith.divf %229, %230 : vector<8x32xf32>
    %c0_104 = arith.constant 0 : index
    %c0_105 = arith.constant 0 : index
    %232 = vector.load %arg8[%c0_104, %c0_105] : memref<8x32xf32, #tpu.memory_space<vmem>>, vector<8x32xf32>
    %233 = arith.mulf %223, %232 : vector<8x32xf32>
    %234 = arith.mulf %217, %225 : vector<8x32xf32>
    %235 = arith.addf %233, %234 : vector<8x32xf32>
    %236 = math.tanh %235 : vector<8x32xf32>
    %237 = arith.mulf %231, %236 : vector<8x32xf32>
    %c0_106 = arith.constant 0 : index
    %c0_107 = arith.constant 0 : index
    %238 = vector.load %arg8[%c0_106, %c0_107] : memref<8x32xf32, #tpu.memory_space<vmem>>, vector<8x32xf32>
    tpu.vector_store %arg8[%c0_106, %c0_107], %235 {strides = array<i32>} : memref<8x32xf32, #tpu.memory_space<vmem>>, vector<8x32xf32>,
    %c0_108 = arith.constant 0 : index
    %c0_109 = arith.constant 0 : index
    %239 = vector.load %arg7[%c0_108, %c0_109] : memref<8x32xf32, #tpu.memory_space<vmem>>, vector<8x32xf32>
    tpu.vector_store %arg7[%c0_108, %c0_109], %237 {strides = array<i32>} : memref<8x32xf32, #tpu.memory_space<vmem>>, vector<8x32xf32>,
    %240 = arith.index_cast %c5_i32 : i32 to index
    %c0_110 = arith.constant 0 : index
    %c0_111 = arith.constant 0 : index
    %241 = vector.load %arg6[%240, %c0_110, %c0_111] : memref<8x8x32xf32, #tpu.memory_space<vmem>>, vector<1x8x32xf32>
    %242 = vector.shape_cast %241 : vector<1x8x32xf32> to vector<8x32xf32>
    %243 = vector.shape_cast %237 : vector<8x32xf32> to vector<1x8x32xf32>
    tpu.vector_store %arg6[%240, %c0_110, %c0_111], %243 {strides = array<i32>} : memref<8x8x32xf32, #tpu.memory_space<vmem>>, vector<1x8x32xf32>,
    %c6_i32 = arith.constant 6 : i32
    %244 = arith.index_cast %c6_i32 : i32 to index
    %c0_112 = arith.constant 0 : index
    %c0_113 = arith.constant 0 : index
    %245 = vector.load %arg1[%244, %c0_112, %c0_113] : memref<8x8x128xf32, #tpu.memory_space<vmem>>, vector<1x8x128xf32>
    %246 = vector.shape_cast %245 : vector<1x8x128xf32> to vector<8x128xf32>
    %c0_114 = arith.constant 0 : index
    %c0_115 = arith.constant 0 : index
    %247 = vector.load %arg7[%c0_114, %c0_115] : memref<8x32xf32, #tpu.memory_space<vmem>>, vector<8x32xf32>
    %248 = arith.truncf %247 : vector<8x32xf32> to vector<8x32xbf16>
    %c0_116 = arith.constant 0 : index
    %c0_117 = arith.constant 0 : index
    %249 = vector.load %arg2[%c0_116, %c0_117] : memref<32x128xbf16, #tpu.memory_space<vmem>>, vector<32x128xbf16>
    %cst_118 = arith.constant dense<0.000000e+00> : vector<8x128xf32>
    %250 = tpu.matmul %248, %249, %cst_118 {dimension_numbers = #tpu.dot_dimension_numbers<[1], [0], [0], [1], [0, 0, 1, 1], [], []>} : vector<8x32xbf16>, vector<32x128xbf16>, vector<8x128xf32> -> vector<8x128xf32>
    %251 = arith.addf %246, %250 : vector<8x128xf32>
    %252 = vector.extract_strided_slice %251 {offsets = [0, 0], sizes = [8, 32], strides = [1, 1]} : vector<8x128xf32> to vector<8x32xf32>
    %253 = arith.negf %252 : vector<8x32xf32>
    %254 = math.exp %253 : vector<8x32xf32>
    %cst_119 = arith.constant 1.000000e+00 : f32
    %255 = vector.broadcast %cst_119 : f32 to vector<8x32xf32>
    %256 = arith.addf %255, %254 : vector<8x32xf32>
    %257 = arith.divf %255, %256 : vector<8x32xf32>
    %258 = vector.extract_strided_slice %251 {offsets = [0, 32], sizes = [8, 32], strides = [1, 1]} : vector<8x128xf32> to vector<8x32xf32>
    %259 = arith.negf %258 : vector<8x32xf32>
    %260 = math.exp %259 : vector<8x32xf32>
    %cst_120 = arith.constant 1.000000e+00 : f32
    %261 = vector.broadcast %cst_120 : f32 to vector<8x32xf32>
    %262 = arith.addf %261, %260 : vector<8x32xf32>
    %263 = arith.divf %261, %262 : vector<8x32xf32>
    %264 = vector.extract_strided_slice %251 {offsets = [0, 64], sizes = [8, 32], strides = [1, 1]} : vector<8x128xf32> to vector<8x32xf32>
    %265 = math.tanh %264 : vector<8x32xf32>
    %266 = vector.extract_strided_slice %251 {offsets = [0, 96], sizes = [8, 32], strides = [1, 1]} : vector<8x128xf32> to vector<8x32xf32>
    %267 = arith.negf %266 : vector<8x32xf32>
    %268 = math.exp %267 : vector<8x32xf32>
    %cst_121 = arith.constant 1.000000e+00 : f32
    %269 = vector.broadcast %cst_121 : f32 to vector<8x32xf32>
    %270 = arith.addf %269, %268 : vector<8x32xf32>
    %271 = arith.divf %269, %270 : vector<8x32xf32>
    %c0_122 = arith.constant 0 : index
    %c0_123 = arith.constant 0 : index
    %272 = vector.load %arg8[%c0_122, %c0_123] : memref<8x32xf32, #tpu.memory_space<vmem>>, vector<8x32xf32>
    %273 = arith.mulf %263, %272 : vector<8x32xf32>
    %274 = arith.mulf %257, %265 : vector<8x32xf32>
    %275 = arith.addf %273, %274 : vector<8x32xf32>
    %276 = math.tanh %275 : vector<8x32xf32>
    %277 = arith.mulf %271, %276 : vector<8x32xf32>
    %c0_124 = arith.constant 0 : index
    %c0_125 = arith.constant 0 : index
    %278 = vector.load %arg8[%c0_124, %c0_125] : memref<8x32xf32, #tpu.memory_space<vmem>>, vector<8x32xf32>
    tpu.vector_store %arg8[%c0_124, %c0_125], %275 {strides = array<i32>} : memref<8x32xf32, #tpu.memory_space<vmem>>, vector<8x32xf32>,
    %c0_126 = arith.constant 0 : index
    %c0_127 = arith.constant 0 : index
    %279 = vector.load %arg7[%c0_126, %c0_127] : memref<8x32xf32, #tpu.memory_space<vmem>>, vector<8x32xf32>
    tpu.vector_store %arg7[%c0_126, %c0_127], %277 {strides = array<i32>} : memref<8x32xf32, #tpu.memory_space<vmem>>, vector<8x32xf32>,
    %280 = arith.index_cast %c6_i32 : i32 to index
    %c0_128 = arith.constant 0 : index
    %c0_129 = arith.constant 0 : index
    %281 = vector.load %arg6[%280, %c0_128, %c0_129] : memref<8x8x32xf32, #tpu.memory_space<vmem>>, vector<1x8x32xf32>
    %282 = vector.shape_cast %281 : vector<1x8x32xf32> to vector<8x32xf32>
    %283 = vector.shape_cast %277 : vector<8x32xf32> to vector<1x8x32xf32>
    tpu.vector_store %arg6[%280, %c0_128, %c0_129], %283 {strides = array<i32>} : memref<8x8x32xf32, #tpu.memory_space<vmem>>, vector<1x8x32xf32>,
    %c7_i32 = arith.constant 7 : i32
    %284 = arith.index_cast %c7_i32 : i32 to index
    %c0_130 = arith.constant 0 : index
    %c0_131 = arith.constant 0 : index
    %285 = vector.load %arg1[%284, %c0_130, %c0_131] : memref<8x8x128xf32, #tpu.memory_space<vmem>>, vector<1x8x128xf32>
    %286 = vector.shape_cast %285 : vector<1x8x128xf32> to vector<8x128xf32>
    %c0_132 = arith.constant 0 : index
    %c0_133 = arith.constant 0 : index
    %287 = vector.load %arg7[%c0_132, %c0_133] : memref<8x32xf32, #tpu.memory_space<vmem>>, vector<8x32xf32>
    %288 = arith.truncf %287 : vector<8x32xf32> to vector<8x32xbf16>
    %c0_134 = arith.constant 0 : index
    %c0_135 = arith.constant 0 : index
    %289 = vector.load %arg2[%c0_134, %c0_135] : memref<32x128xbf16, #tpu.memory_space<vmem>>, vector<32x128xbf16>
    %cst_136 = arith.constant dense<0.000000e+00> : vector<8x128xf32>
    %290 = tpu.matmul %288, %289, %cst_136 {dimension_numbers = #tpu.dot_dimension_numbers<[1], [0], [0], [1], [0, 0, 1, 1], [], []>} : vector<8x32xbf16>, vector<32x128xbf16>, vector<8x128xf32> -> vector<8x128xf32>
    %291 = arith.addf %286, %290 : vector<8x128xf32>
    %292 = vector.extract_strided_slice %291 {offsets = [0, 0], sizes = [8, 32], strides = [1, 1]} : vector<8x128xf32> to vector<8x32xf32>
    %293 = arith.negf %292 : vector<8x32xf32>
    %294 = math.exp %293 : vector<8x32xf32>
    %cst_137 = arith.constant 1.000000e+00 : f32
    %295 = vector.broadcast %cst_137 : f32 to vector<8x32xf32>
    %296 = arith.addf %295, %294 : vector<8x32xf32>
    %297 = arith.divf %295, %296 : vector<8x32xf32>
    %298 = vector.extract_strided_slice %291 {offsets = [0, 32], sizes = [8, 32], strides = [1, 1]} : vector<8x128xf32> to vector<8x32xf32>
    %299 = arith.negf %298 : vector<8x32xf32>
    %300 = math.exp %299 : vector<8x32xf32>
    %cst_138 = arith.constant 1.000000e+00 : f32
    %301 = vector.broadcast %cst_138 : f32 to vector<8x32xf32>
    %302 = arith.addf %301, %300 : vector<8x32xf32>
    %303 = arith.divf %301, %302 : vector<8x32xf32>
    %304 = vector.extract_strided_slice %291 {offsets = [0, 64], sizes = [8, 32], strides = [1, 1]} : vector<8x128xf32> to vector<8x32xf32>
    %305 = math.tanh %304 : vector<8x32xf32>
    %306 = vector.extract_strided_slice %291 {offsets = [0, 96], sizes = [8, 32], strides = [1, 1]} : vector<8x128xf32> to vector<8x32xf32>
    %307 = arith.negf %306 : vector<8x32xf32>
    %308 = math.exp %307 : vector<8x32xf32>
    %cst_139 = arith.constant 1.000000e+00 : f32
    %309 = vector.broadcast %cst_139 : f32 to vector<8x32xf32>
    %310 = arith.addf %309, %308 : vector<8x32xf32>
    %311 = arith.divf %309, %310 : vector<8x32xf32>
    %c0_140 = arith.constant 0 : index
    %c0_141 = arith.constant 0 : index
    %312 = vector.load %arg8[%c0_140, %c0_141] : memref<8x32xf32, #tpu.memory_space<vmem>>, vector<8x32xf32>
    %313 = arith.mulf %303, %312 : vector<8x32xf32>
    %314 = arith.mulf %297, %305 : vector<8x32xf32>
    %315 = arith.addf %313, %314 : vector<8x32xf32>
    %316 = math.tanh %315 : vector<8x32xf32>
    %317 = arith.mulf %311, %316 : vector<8x32xf32>
    %c0_142 = arith.constant 0 : index
    %c0_143 = arith.constant 0 : index
    %318 = vector.load %arg8[%c0_142, %c0_143] : memref<8x32xf32, #tpu.memory_space<vmem>>, vector<8x32xf32>
    tpu.vector_store %arg8[%c0_142, %c0_143], %315 {strides = array<i32>} : memref<8x32xf32, #tpu.memory_space<vmem>>, vector<8x32xf32>,
    %c0_144 = arith.constant 0 : index
    %c0_145 = arith.constant 0 : index
    %319 = vector.load %arg7[%c0_144, %c0_145] : memref<8x32xf32, #tpu.memory_space<vmem>>, vector<8x32xf32>
    tpu.vector_store %arg7[%c0_144, %c0_145], %317 {strides = array<i32>} : memref<8x32xf32, #tpu.memory_space<vmem>>, vector<8x32xf32>,
    %320 = arith.index_cast %c7_i32 : i32 to index
    %c0_146 = arith.constant 0 : index
    %c0_147 = arith.constant 0 : index
    %321 = vector.load %arg6[%320, %c0_146, %c0_147] : memref<8x8x32xf32, #tpu.memory_space<vmem>>, vector<1x8x32xf32>
    %322 = vector.shape_cast %321 : vector<1x8x32xf32> to vector<8x32xf32>
    %323 = vector.shape_cast %317 : vector<8x32xf32> to vector<1x8x32xf32>
    tpu.vector_store %arg6[%320, %c0_146, %c0_147], %323 {strides = array<i32>} : memref<8x8x32xf32, #tpu.memory_space<vmem>>, vector<1x8x32xf32>,
    %c8_i32 = arith.constant 8 : i32
    %c0_148 = arith.constant 0 : index
    %c0_149 = arith.constant 0 : index
    %c0_150 = arith.constant 0 : index
    %324 = vector.load %arg6[%c0_148, %c0_149, %c0_150] : memref<8x8x32xf32, #tpu.memory_space<vmem>>, vector<8x8x32xf32>
    %325 = vector.shape_cast %324 : vector<8x8x32xf32> to vector<64x32xf32>
    %326 = arith.truncf %325 : vector<64x32xf32> to vector<64x32xbf16>
    %c0_151 = arith.constant 0 : index
    %c0_152 = arith.constant 0 : index
    %327 = vector.load %arg3[%c0_151, %c0_152] : memref<32x4xbf16, #tpu.memory_space<vmem>>, vector<32x4xbf16>
    %cst_153 = arith.constant dense<0.000000e+00> : vector<64x4xf32>
    %328 = tpu.matmul %326, %327, %cst_153 {dimension_numbers = #tpu.dot_dimension_numbers<[1], [0], [0], [1], [0, 0, 1, 1], [], []>} : vector<64x32xbf16>, vector<32x4xbf16>, vector<64x4xf32> -> vector<64x4xf32>
    %c0_154 = arith.constant 0 : index
    %c0_155 = arith.constant 0 : index
    %329 = vector.load %arg4[%c0_154, %c0_155] : memref<1x4xf32, #tpu.memory_space<vmem>>, vector<1x4xf32>
    %330 = vector.broadcast %329 : vector<1x4xf32> to vector<64x4xf32>
    %331 = arith.addf %328, %330 : vector<64x4xf32>
    %332 = vector.shape_cast %331 : vector<64x4xf32> to vector<8x8x4xf32>
    %c0_156 = arith.constant 0 : index
    %c0_157 = arith.constant 0 : index
    %c0_158 = arith.constant 0 : index
    %333 = vector.load %arg5[%c0_156, %c0_157, %c0_158] : memref<8x8x4xf32, #tpu.memory_space<vmem>>, vector<8x8x4xf32>
    tpu.vector_store %arg5[%c0_156, %c0_157, %c0_158], %332 {strides = array<i32>} : memref<8x8x4xf32, #tpu.memory_space<vmem>>, vector<8x8x4xf32>,
    return
  }
  func.func @transform_0(%arg0: i32) -> (i32, i32, i32) {
    %c0_i32 = arith.constant 0 : i32
    %c0_i32_0 = arith.constant 0 : i32
    %c0_i32_1 = arith.constant 0 : i32
    %c0_i32_2 = arith.constant 0 : i32
    return %c0_i32, %c0_i32_0, %c0_i32_1 : i32, i32, i32
  }
  func.func @transform_1(%arg0: i32) -> (i32, i32) {
    %c0_i32 = arith.constant 0 : i32
    %c0_i32_0 = arith.constant 0 : i32
    %c0_i32_1 = arith.constant 0 : i32
    return %c0_i32, %c0_i32_0 : i32, i32
  }
  func.func @transform_2(%arg0: i32) -> (i32, i32) {
    %c0_i32 = arith.constant 0 : i32
    %c0_i32_0 = arith.constant 0 : i32
    %c0_i32_1 = arith.constant 0 : i32
    return %c0_i32, %c0_i32_0 : i32, i32
  }
  func.func @transform_3(%arg0: i32) -> (i32, i32) {
    %c0_i32 = arith.constant 0 : i32
    %c0_i32_0 = arith.constant 0 : i32
    %c0_i32_1 = arith.constant 0 : i32
    return %c0_i32, %c0_i32_0 : i32, i32
  }
  func.func @transform_4(%arg0: i32) -> (i32, i32, i32) {
    %c0_i32 = arith.constant 0 : i32
    %c0_i32_0 = arith.constant 0 : i32
    %c0_i32_1 = arith.constant 0 : i32
    %c0_i32_2 = arith.constant 0 : i32
    return %c0_i32, %c0_i32_0, %c0_i32_1 : i32, i32, i32
  }
}

</mosaic_0001>

<bundles_post_ra>
// kernel: lstm_model_forward.4
= control target key start
LH: loop header
LB: loop body
LE: loop exit
PB: predicated region body
PF: predicated region fallthrough
CT: control target
= control target key end

     0   :  { %8 = vsyncpa [#allocation3], 0  ;;  %s198_s12 = smov [#allocation2]   ;;  %s267_s0 = inlined_call_operand.hbm [shape: f32[64,16], index: 0, kind: input, shape index: {}]   ;;  %s268_s1 = inlined_call_operand.vmem [shape: bf16[16,128], index: 1, kind: input, shape index: {}]   ;;  %s269_s2 = inlined_call_operand.vmem [shape: f32[1,128], index: 2, kind: input, shape index: {}]   ;;  %s270_s3 = inlined_call_operand.vmem [shape: f32[64,128], index: 3, kind: output, shape index: {}]  }
   0x1   :  { %s14_s13 = sshll.u32 %s198_s12, 4  ;;  %s174_s16 = scalar_lea.hbm %s267_s0, 1024  ;;  %s15_s13 = int_to_ptr.vmem [resolvable:$true] %s14_s13 }
   0x2   :  { %p175_p0 = scmp.ne.s32.totalorder %s267_s0, %s174_s16  ;;  %p178_p1 = scmp.lt.u32.totalorder %s174_s16, %s267_s0 }
   0x4   :  { %p180_p2 = pnand %p178_p1, %p175_p0 }
   0x6   :  { %183 = shalt.err (!%p180_p2)
}
   0x7   :  { %s184_s21 = scalar_lea.vmem %s15_s13, 1024  ;;  %p189_p4 = scmp.lt.s32.totalorder %s15_s13, %s15_s13 }
   0x8   :  { %p185_p3 = scmp.ne.s32.totalorder %s15_s13, %s184_s21  ;;  %p190_p5 = scmp.lt.s32.totalorder %s184_s21, %s184_s21 }
   0xa   :  { %p191_p6 = por %p190_p5, %p189_p4 }
   0xc   :  { %p192_p7 = pnand %p191_p6, %p185_p3 }
   0xe   :  { %195 = shalt.err (!%p192_p7)
}
   0xf   :  { %s199_s22 = smov 128   ;;  %s200_s23 = smov 8  }
  0x10   :  { %20 = dma.hbm_to_vmem [thread:$0]  %s267_s0, 1024, %s15_s13, [#allocation3], %s199_s22, %s199_s22, %s200_s23  }
  0x11   :  { %196 = dma.done.wait [#allocation3], 1024  }
  0x12   :  { %197 = vsyncadd [#allocation3], 4294966272  ;;  %v173_v0 = vld [vmem:[%s268_s1] sm:$0xff]   ;;  %v30_v2 = vld [vmem:[#allocation2 + $0x8] sm:$0xff]  ;;  %vm56_vm0 = vcmask 130048  }
  0x13   :  { %v29_v1 = vld [vmem:[#allocation2] sm:$0xff]  ;;  %158 = vmatprep.subr.bf16.mxu0 %v173_v0  ;;  %168 = vmatprep.subr.bf16.mxu1 %v173_v0  ;;  %v34_v5 = vld [vmem:[#allocation2 + $0x28] sm:$0xff]  ;;  %v31_v6 = vld [vmem:[#allocation2 + $0x10] sm:$0xff] }
  0x14   :  { %v33_v3 = vld [vmem:[#allocation2 + $0x20] sm:$0xff]  ;;  %v37_v4 = vpack.c.bf16 %v30_v2, %v29_v1  ;;  %v32_v7 = vld [vmem:[#allocation2 + $0x18] sm:$0xff]  ;;  %159 = vmatpush3.bf16.msra.mxu0 %v173_v0  ;;  %169 = vmatpush3.bf16.msra.mxu1 %v173_v0  ;;  %v35_v10 = vld [vmem:[#allocation2 + $0x30] sm:$0xff] }
  0x15   :  { %v39_v8 = vpack.c.bf16 %v34_v5, %v33_v3  ;;  %v38_v9 = vpack.c.bf16 %v32_v7, %v31_v6  ;;  %v36_v11 = vld [vmem:[#allocation2 + $0x38] sm:$0xff]  ;;  %v147_v13 = vld [vmem:[%s269_s2] ss:$0 sm:$0xff] }
  0x16   :  { %160 = vmatprep.mubr.msk.bf16.mxu0 %vm56_vm0, %v37_v4  ;;  %v40_v12 = vpack.c.bf16 %v36_v11, %v35_v10 }
  0x17   :  { %164 = vmatprep.mubr.msk.bf16.mxu1 %vm56_vm0, %v39_v8  ;;  %161 = vmatmul.mubr.msk.bf16.vlgmr.msra.gmra.mrb[0].mxu0 %vm56_vm0, %v38_v9 }
  0x18   :  { %165 = vmatmul.mubr.msk.bf16.vlgmr.msra.gmra.mrb[0].mxu1 %vm56_vm0, %v40_v12 }
  0xea   :  { %v162_v14 = vpop.f32.mrb[0].mxu0 }
  0xeb   :  { %v166_v15 = vpop.f32.mrb[0].mxu1  ;;  %v112_v16 = vadd.f32 %v162_v14, %v147_v13  ;;  %v103_v18 = vpop.f32.mrb[1].mxu0 }
  0xec   :  { %v128_v17 = vadd.f32 %v166_v15, %v147_v13  ;;  %v119_v19 = vpop.f32.mrb[1].mxu1  ;;  %v104_v20 = vadd.f32 %v147_v13, %v103_v18  ;;  %v163_v22 = vpop.f32.mrb[2].mxu0 }
  0xed   :  { %v120_v21 = vadd.f32 %v147_v13, %v119_v19  ;;  %v167_v23 = vpop.f32.mrb[2].mxu1  ;;  %136 = vst [vmem:[%s270_s3 + $0x10] sm:$0xff] %v112_v16  ;;  %v115_v24 = vadd.f32 %v163_v22, %v147_v13  ;;  %v106_v26 = vpop.f32.mrb[3].mxu0 }
  0xee   :  { %140 = vst [vmem:[%s270_s3 + $0x30] sm:$0xff] %v128_v17  ;;  %v131_v25 = vadd.f32 %v167_v23, %v147_v13  ;;  %v122_v27 = vpop.f32.mrb[3].mxu1  ;;  %134 = vst [vmem:[%s270_s3] sm:$0xff] %v104_v20  ;;  %v107_v28 = vadd.f32 %v147_v13, %v106_v26 }
  0xef   :  { %138 = vst [vmem:[%s270_s3 + $0x20] sm:$0xff] %v120_v21  ;;  %v123_v29 = vadd.f32 %v147_v13, %v122_v27  ;;  %137 = vst [vmem:[%s270_s3 + $0x18] sm:$0xff] %v115_v24 }
  0xf0   :  { %141 = vst [vmem:[%s270_s3 + $0x38] sm:$0xff] %v131_v25  ;;  %135 = vst [vmem:[%s270_s3 + $0x8] sm:$0xff] %v107_v28 }
  0xf1   :  { %139 = vst [vmem:[%s270_s3 + $0x28] sm:$0xff] %v123_v29 }
  0xf2   :  { %146 = vsyncpa [#allocation3], 1 }

// kernel: lstm_model_forward.6
= control target key start
LH: loop header
LB: loop body
LE: loop exit
PB: predicated region body
PF: predicated region fallthrough
CT: control target
= control target key end

     0   :  { %vm66_vm0 = vcmask 261120   ;;  %s260_s1 = inlined_call_operand.vmem [shape: bf16[32,128], index: 1, kind: input, shape index: {}]   ;;  %s261_s0 = inlined_call_operand.vmem [shape: bf16[64,32], index: 0, kind: input, shape index: {}]   ;;  %s262_s2 = inlined_call_operand.vmem [shape: f32[1,128], index: 2, kind: input, shape index: {}]   ;;  %s263_s3 = inlined_call_operand.vmem [shape: f32[64,128], index: 3, kind: output, shape index: {}]  }
   0x1   :  { %v189_v0 = vld [vmem:[%s260_s1] sm:$0xff]   ;;  %v190_v1 = vld [vmem:[%s260_s1 + $0x8] sm:$0xff]   ;;  %v192_v3 = vld [vmem:[%s261_s0 + $0x10] sm:$0xff]  }
   0x2   :  { %173 = vmatprep.subr.bf16.mxu0 %v189_v0  ;;  %185 = vmatprep.subr.bf16.mxu1 %v189_v0  ;;  %v191_v2 = vld [vmem:[%s261_s0] sm:$0xff]   ;;  %v193_v4 = vld [vmem:[%s261_s0 + $0x8] sm:$0xff]   ;;  %v194_v5 = vld [vmem:[%s261_s0 + $0x18] sm:$0xff]  }
   0x3   :  { %174 = vmatpush3.bf16.msra.mxu0 %v189_v0  ;;  %187 = vmatpush3.bf16.msra.mxu1 %v189_v0  ;;  %v156_v6 = vld [vmem:[%s262_s2] ss:$0 sm:$0xff] }
   0x4   :  { %175 = vmatprep.subr.bf16.mxu0 %v190_v1  ;;  %186 = vmatprep.subr.bf16.mxu1 %v190_v1 }
   0x5   :  { %177 = vmatprep.mubr.msk.bf16.mxu0 %vm66_vm0, %v191_v2  ;;  %181 = vmatprep.mubr.msk.bf16.mxu1 %vm66_vm0, %v192_v3 }
   0x7   :  { %176 = vmatpush3.bf16.msra.mxu0 %v190_v1  ;;  %188 = vmatpush3.bf16.msra.mxu1 %v190_v1 }
   0xa   :  { %178 = vmatmul.mubr.msk.bf16.vlgmr.msra.gmra.mrb[0].mxu0 %vm66_vm0, %v193_v4  ;;  %182 = vmatmul.mubr.msk.bf16.vlgmr.msra.gmra.mrb[0].mxu1 %vm66_vm0, %v194_v5 }
  0xdd   :  { %v179_v7 = vpop.f32.mrb[0].mxu0  ;;  %v183_v8 = vpop.f32.mrb[0].mxu1 }
  0xde   :  { %v122_v9 = vadd.f32 %v179_v7, %v156_v6  ;;  %v138_v10 = vadd.f32 %v183_v8, %v156_v6  ;;  %v113_v11 = vpop.f32.mrb[1].mxu0  ;;  %v129_v12 = vpop.f32.mrb[1].mxu1 }
  0xdf   :  { %v114_v13 = vadd.f32 %v156_v6, %v113_v11  ;;  %v130_v14 = vadd.f32 %v156_v6, %v129_v12  ;;  %v180_v15 = vpop.f32.mrb[2].mxu0  ;;  %v184_v16 = vpop.f32.mrb[2].mxu1 }
  0xe0   :  { %146 = vst [vmem:[%s263_s3 + $0x10] sm:$0xff] %v122_v9  ;;  %150 = vst [vmem:[%s263_s3 + $0x30] sm:$0xff] %v138_v10  ;;  %v125_v17 = vadd.f32 %v180_v15, %v156_v6  ;;  %v141_v18 = vadd.f32 %v184_v16, %v156_v6  ;;  %v116_v19 = vpop.f32.mrb[3].mxu0  ;;  %v132_v20 = vpop.f32.mrb[3].mxu1 }
  0xe1   :  { %144 = vst [vmem:[%s263_s3] sm:$0xff] %v114_v13  ;;  %148 = vst [vmem:[%s263_s3 + $0x20] sm:$0xff] %v130_v14  ;;  %v117_v21 = vadd.f32 %v156_v6, %v116_v19  ;;  %v133_v22 = vadd.f32 %v156_v6, %v132_v20 }
  0xe2   :  { %147 = vst [vmem:[%s263_s3 + $0x18] sm:$0xff] %v125_v17  ;;  %151 = vst [vmem:[%s263_s3 + $0x38] sm:$0xff] %v141_v18 }
  0xe3   :  { %145 = vst [vmem:[%s263_s3 + $0x8] sm:$0xff] %v117_v21  ;;  %149 = vst [vmem:[%s263_s3 + $0x28] sm:$0xff] %v133_v22 }

// kernel: lstm_model_forward.5
= control target key start
LH: loop header
LB: loop body
LE: loop exit
PB: predicated region body
PF: predicated region fallthrough
CT: control target
= control target key end

     0   :  { %vm12_vm0 = vcmask 261120   ;;  %v1094_v0 = vmov 0.0   ;;  %vm1095_vm1 = vmmov 0   ;;  %s1096_s15 = smov 64   ;;  %s1097_s16 = smov 32   ;;  %vm869_vm2 = vcmask 257024   ;;  %s1334_s1 = inlined_call_operand.vmem [shape: bf16[32,128], index: 1, kind: input, shape index: {}]   ;;  %s1335_s0 = inlined_call_operand.vmem [shape: f32[8,8,128], index: 0, kind: input, shape index: {}]   ;;  %s1336_s2 = inlined_call_operand.vmem [shape: bf16[8,8,32], index: 2, kind: output, shape index: {}]  }
   0x1   :  { %945 = vmatprep.subr.bf16.mxu0 %v1094_v0  ;;  %v1014_v1 = vld [vmem:[%s1334_s1] sm:$0xff]   ;;  %949 = vmatprep.mubr.msk.bf16.mxu0 %vm1095_vm1, %v1094_v0  ;;  %13 = vst.msk [vmem:[#allocation3] sm:$0xff] %vm12_vm0, %v1094_v0  ;;  %14 = vst.msk [vmem:[#allocation4] sm:$0xff] %vm12_vm0, %v1094_v0  ;;  %v1015_v2 = vld [vmem:[%s1334_s1 + $0x8] sm:$0xff]   ;;  %s1098_s17 = smov 96  }
   0x2   :  { %953 = vmatprep.subr.bf16.mxu1 %v1094_v0  ;;  %957 = vmatprep.mubr.msk.bf16.mxu1 %vm1095_vm1, %v1094_v0  ;;  %v15_v5 = vld [vmem:[%s1335_s0] sm:$0xff]  ;;  %v1017_v25 = vld [vmem:[%s1334_s1 + $0x8] sm:$0xff]  }
   0x3   :  { %946 = vmatpush3.bf16.msra.mxu0 %v1014_v1  ;;  %v1016_v24 = vld [vmem:[%s1334_s1] sm:$0xff]   ;;  %v886_v35 = vld [vmem:[%s1335_s0 + $0x8] sm:$0xff]  ;;  %v891_v1 = vld [vmem:[%s1335_s0 + $0x10] sm:$0xff] }
   0x4   :  { %947 = vmatprep.subr.bf16.mxu0 %v1094_v0  ;;  %954 = vmatpush3.bf16.msra.mxu1 %v1016_v24  ;;  %v1018_v53 = vld [vmem:[%s1334_s1] sm:$0xff]   ;;  %v1019_v54 = vld [vmem:[%s1334_s1 + $0x8] sm:$0xff]  }
   0x5   :  { %955 = vmatprep.subr.bf16.mxu1 %v1094_v0 }
   0x7   :  { %948 = vmatpush3.bf16.msra.mxu0 %v1015_v2 }
   0x8   :  { %v16_v3 = vld [vmem:[#allocation3] sm:$0xff]  ;;  %961 = vmatprep.subr.bf16.mxu0 %v1094_v0  ;;  %v85_v12 = vld [vmem:[#allocation4] sm:$0xff]  ;;  %956 = vmatpush3.bf16.msra.mxu1 %v1017_v25 }
   0x9   :  { %v17_v4 = vpack.c.bf16 %v16_v3, %v16_v3  ;;  %969 = vmatprep.subr.bf16.mxu1 %v1094_v0 }
   0xb   :  { %950 = vmatmul.mubr.msk.bf16.vlgmr.msra.gmra.mrb[0].mxu0 %vm12_vm0, %v17_v4 }
   0xc   :  { %965 = vmatprep.mubr.msk.bf16.mxu0 %vm1095_vm1, %v1094_v0  ;;  %962 = vmatpush3.bf16.msra.mxu0 %v1018_v53 }
   0xd   :  { %963 = vmatprep.subr.bf16.mxu0 %v1094_v0 }
  0x10   :  { %964 = vmatpush3.bf16.msra.mxu0 %v1019_v54 }
  0x11   :  { %977 = vmatprep.subr.bf16.mxu0 %v1094_v0 }
  0xde   :  { %v71_v6 = vpop.f32.mrb[0].mxu0 }
  0xdf   :  { %v77_v7 = vadd.f32 %v71_v6, %v15_v5  ;;  %v951_v8 = vpop.f32.mrb[1].mxu0 }
  0xe0   :  { %v74_v9 = vpop.f32.mrb[2].mxu0 }
  0xe1   :  { %1030 = vtanh.f32 %v77_v7  ;;  %v952_v10 = vpop.f32.mrb[3].mxu0  ;;  %v885_v13 = vmul.f32 -1.442695, %v77_v7 }
  0xe3   :  { %1032 = vpow2.f32 %v885_v13 }
  0xeb   :  { %v1031_v11 = vpop.eup %1030 }
  0xec   :  { %92 = vrot.lane.b32.xlu0 %v1031_v11, %s1096_s15 }
  0xed   :  { %v1033_v14 = vpop.eup %1032 }
  0xee   :  { %v81_v15 = vadd.f32 1.0, %v1033_v14 }
  0xf0   :  { %87 = vrot.lane.b32.xlu0 %v85_v12, %s1097_s16  ;;  %1034 = vrcp.f32 %v81_v15 }
  0xfa   :  { %v1035_v16 = vpop.eup %1034 }
 0x15e   :  { %v93_v17 = vpop.permute.xlu0 %92 }
 0x15f   :  { %v95_v18 = vmul.f32 %v1035_v16, %v93_v17 }
 0x161   :  { %97 = vrot.lane.b32.xlu1 %v95_v18, %s1097_s16 }
 0x162   :  { %v88_v19 = vpop.permute.xlu0 %87 }
 0x163   :  { %v90_v20 = vmul.f32 %v1035_v16, %v88_v19  ;;  %v1020_v19 = vld [vmem:[%s1334_s1] sm:$0xff]  }
 0x1d3   :  { %v98_v21 = vpop.permute.xlu1 %97 }
 0x1d4   :  { %v100_v22 = vadd.f32 %v98_v21, %v90_v20  ;;  %v1021_v20 = vld [vmem:[%s1334_s1 + $0x8] sm:$0xff]  }
 0x1d6   :  { %1036 = vtanh.f32 %v100_v22 }
 0x1e0   :  { %v1037_v23 = vpop.eup %1036 }
 0x1e1   :  { %103 = vrot.lane.b32.xlu1 %v1037_v23, %s1096_s15 }
 0x1e5   :  { %108 = vrot.lane.b32.xlu1 %v100_v22, %s1098_s17 }
 0x253   :  { %v104_v26 = vpop.permute.xlu1 %103 }
 0x254   :  { %v106_v27 = vmul.f32 %v1035_v16, %v104_v26 }
 0x256   :  { %113 = vrot.lane.b32.xlu0 %v106_v27, %s1097_s16 }
 0x257   :  { %v109_v28 = vpop.permute.xlu1 %108 }
 0x258   :  { %111 = vst.msk [vmem:[#allocation4] sm:$0xff] %vm12_vm0, %v109_v28 }
 0x25f   :  { %v189_v29 = vld [vmem:[#allocation4] sm:$0xff] }
 0x260   :  { %191 = vrot.lane.b32.xlu1 %v189_v29, %s1097_s16 }
 0x2c8   :  { %v114_v30 = vpop.permute.xlu0 %113 }
 0x2c9   :  { %116 = vst.msk [vmem:[#allocation3] sm:$0xff] %vm12_vm0, %v114_v30  ;;  %117 = vst.msk [vmem:[#allocation2] sm:$0xff] %vm12_vm0, %v114_v30  ;;  %v896_v30 = vld [vmem:[%s1335_s0 + $0x18] sm:$0xff] }
 0x2d0   :  { %v853_v31 = vld [vmem:[#allocation2] sm:$0xff] }
 0x2d1   :  { %v120_v32 = vld [vmem:[#allocation3] sm:$0xff]  ;;  %v861_v33 = vpack.c.bf16 %v853_v31, %v853_v31 }
 0x2d2   :  { %v121_v34 = vpack.c.bf16 %v120_v32, %v120_v32  ;;  %v192_v48 = vpop.permute.xlu1 %191 }
 0x2d3   :  { %870 = vst.msk [vmem:[%s1336_s2] sm:$0xf] %vm869_vm2, %v861_v33 }
 0x2d4   :  { %958 = vmatmul.mubr.msk.bf16.vlgmr.msra.gmra.mrb[0].mxu1 %vm12_vm0, %v121_v34 }
 0x2d5   :  { %973 = vmatprep.mubr.msk.bf16.mxu1 %vm1095_vm1, %v1094_v0  ;;  %970 = vmatpush3.bf16.msra.mxu1 %v1020_v19 }
 0x2d6   :  { %971 = vmatprep.subr.bf16.mxu1 %v1094_v0 }
 0x2d9   :  { %972 = vmatpush3.bf16.msra.mxu1 %v1021_v20 }
 0x2da   :  { %985 = vmatprep.subr.bf16.mxu1 %v1094_v0 }
 0x3a7   :  { %v175_v36 = vpop.f32.mrb[0].mxu1 }
 0x3a8   :  { %v181_v37 = vadd.f32 %v886_v35, %v175_v36  ;;  %v959_v38 = vpop.f32.mrb[1].mxu1 }
 0x3a9   :  { %v178_v39 = vpop.f32.mrb[2].mxu1 }
 0x3aa   :  { %1038 = vtanh.f32 %v181_v37  ;;  %v960_v40 = vpop.f32.mrb[3].mxu1  ;;  %v890_v42 = vmul.f32 -1.442695, %v181_v37 }
 0x3ac   :  { %1040 = vpow2.f32 %v890_v42 }
 0x3b4   :  { %v1039_v41 = vpop.eup %1038 }
 0x3b5   :  { %196 = vrot.lane.b32.xlu0 %v1039_v41, %s1096_s15 }
 0x3b6   :  { %v1041_v43 = vpop.eup %1040 }
 0x3b7   :  { %v185_v44 = vadd.f32 1.0, %v1041_v43 }
 0x3b9   :  { %1042 = vrcp.f32 %v185_v44 }
 0x3c3   :  { %v1043_v45 = vpop.eup %1042 }
 0x3c4   :  { %v194_v49 = vmul.f32 %v1043_v45, %v192_v48  ;;  %v1022_v48 = vld [vmem:[%s1334_s1] sm:$0xff]  }
 0x427   :  { %v197_v46 = vpop.permute.xlu0 %196 }
 0x428   :  { %v199_v47 = vmul.f32 %v1043_v45, %v197_v46 }
 0x42a   :  { %201 = vrot.lane.b32.xlu0 %v199_v47, %s1097_s16 }
 0x49c   :  { %v202_v50 = vpop.permute.xlu0 %201 }
 0x49d   :  { %v204_v51 = vadd.f32 %v202_v50, %v194_v49  ;;  %v1023_v49 = vld [vmem:[%s1334_s1 + $0x8] sm:$0xff]  }
 0x49f   :  { %1044 = vtanh.f32 %v204_v51 }
 0x4a9   :  { %v1045_v52 = vpop.eup %1044 }
 0x4aa   :  { %207 = vrot.lane.b32.xlu1 %v1045_v52, %s1096_s15 }
 0x4ae   :  { %212 = vrot.lane.b32.xlu1 %v204_v51, %s1098_s17 }
 0x51c   :  { %v208_v55 = vpop.permute.xlu1 %207 }
 0x51d   :  { %v210_v56 = vmul.f32 %v1043_v45, %v208_v55 }
 0x51f   :  { %217 = vrot.lane.b32.xlu0 %v210_v56, %s1097_s16 }
 0x520   :  { %v213_v57 = vpop.permute.xlu1 %212 }
 0x521   :  { %215 = vst.msk [vmem:[#allocation4] sm:$0xff] %vm12_vm0, %v213_v57 }
 0x528   :  { %v294_v58 = vld [vmem:[#allocation4] sm:$0xff] }
 0x529   :  { %296 = vrot.lane.b32.xlu1 %v294_v58, %s1097_s16 }
 0x591   :  { %v218_v59 = vpop.permute.xlu0 %217 }
 0x592   :  { %220 = vst.msk [vmem:[#allocation3] sm:$0xff] %vm12_vm0, %v218_v59  ;;  %222 = vst.msk [vmem:[#allocation2 + $0x8] sm:$0xff] %vm12_vm0, %v218_v59  ;;  %v901_v59 = vld [vmem:[%s1335_s0 + $0x20] sm:$0xff] }
 0x599   :  { %v854_v60 = vld [vmem:[#allocation2 + $0x8] sm:$0xff]  ;;  %v225_v61 = vld [vmem:[#allocation3] sm:$0xff] }
 0x59a   :  { %v862_v62 = vpack.c.bf16 %v854_v60, %v854_v60  ;;  %v226_v63 = vpack.c.bf16 %v225_v61, %v225_v61 }
 0x59b   :  { %v297_v14 = vpop.permute.xlu1 %296 }
 0x59c   :  { %871 = vst.msk [vmem:[%s1336_s2 + $0x4] sm:$0xf] %vm869_vm2, %v862_v62  ;;  %966 = vmatmul.mubr.msk.bf16.vlgmr.msra.gmra.mrb[4].mxu0 %vm12_vm0, %v226_v63 }
 0x59d   :  { %981 = vmatprep.mubr.msk.bf16.mxu0 %vm1095_vm1, %v1094_v0  ;;  %978 = vmatpush3.bf16.msra.mxu0 %v1022_v48 }
 0x59e   :  { %979 = vmatprep.subr.bf16.mxu0 %v1094_v0 }
 0x5a1   :  { %980 = vmatpush3.bf16.msra.mxu0 %v1023_v49 }
 0x5a2   :  { %993 = vmatprep.subr.bf16.mxu0 %v1094_v0 }
 0x66f   :  { %v280_v2 = vpop.f32.mrb[4].mxu0 }
 0x670   :  { %v286_v3 = vadd.f32 %v891_v1, %v280_v2  ;;  %v967_v4 = vpop.f32.mrb[5].mxu0 }
 0x671   :  { %v283_v5 = vpop.f32.mrb[6].mxu0 }
 0x672   :  { %1046 = vtanh.f32 %v286_v3  ;;  %v968_v6 = vpop.f32.mrb[7].mxu0  ;;  %v895_v8 = vmul.f32 -1.442695, %v286_v3 }
 0x674   :  { %1048 = vpow2.f32 %v895_v8 }
 0x67c   :  { %v1047_v7 = vpop.eup %1046 }
 0x67d   :  { %301 = vrot.lane.b32.xlu0 %v1047_v7, %s1096_s15 }
 0x67e   :  { %v1049_v9 = vpop.eup %1048 }
 0x67f   :  { %v290_v10 = vadd.f32 1.0, %v1049_v9 }
 0x681   :  { %1050 = vrcp.f32 %v290_v10 }
 0x68b   :  { %v1051_v11 = vpop.eup %1050 }
 0x68c   :  { %v299_v15 = vmul.f32 %v1051_v11, %v297_v14  ;;  %v1024_v14 = vld [vmem:[%s1334_s1] sm:$0xff]  }
 0x6ef   :  { %v302_v12 = vpop.permute.xlu0 %301 }
 0x6f0   :  { %v304_v13 = vmul.f32 %v1051_v11, %v302_v12 }
 0x6f2   :  { %306 = vrot.lane.b32.xlu0 %v304_v13, %s1097_s16 }
 0x764   :  { %v307_v16 = vpop.permute.xlu0 %306 }
 0x765   :  { %v309_v17 = vadd.f32 %v307_v16, %v299_v15  ;;  %v1025_v15 = vld [vmem:[%s1334_s1 + $0x8] sm:$0xff]  }
 0x767   :  { %1052 = vtanh.f32 %v309_v17 }
 0x771   :  { %v1053_v18 = vpop.eup %1052 }
 0x772   :  { %312 = vrot.lane.b32.xlu1 %v1053_v18, %s1096_s15 }
 0x776   :  { %317 = vrot.lane.b32.xlu1 %v309_v17, %s1098_s17 }
 0x7e4   :  { %v313_v21 = vpop.permute.xlu1 %312 }
 0x7e5   :  { %v315_v22 = vmul.f32 %v1051_v11, %v313_v21 }
 0x7e7   :  { %322 = vrot.lane.b32.xlu0 %v315_v22, %s1097_s16 }
 0x7e8   :  { %v318_v23 = vpop.permute.xlu1 %317 }
 0x7e9   :  { %320 = vst.msk [vmem:[#allocation4] sm:$0xff] %vm12_vm0, %v318_v23 }
 0x7f0   :  { %v399_v24 = vld [vmem:[#allocation4] sm:$0xff] }
 0x7f1   :  { %401 = vrot.lane.b32.xlu1 %v399_v24, %s1097_s16 }
 0x859   :  { %v323_v25 = vpop.permute.xlu0 %322 }
 0x85a   :  { %325 = vst.msk [vmem:[#allocation3] sm:$0xff] %vm12_vm0, %v323_v25  ;;  %327 = vst.msk [vmem:[#allocation2 + $0x10] sm:$0xff] %vm12_vm0, %v323_v25  ;;  %v906_v25 = vld [vmem:[%s1335_s0 + $0x28] sm:$0xff] }
 0x861   :  { %v855_v26 = vld [vmem:[#allocation2 + $0x10] sm:$0xff]  ;;  %v330_v27 = vld [vmem:[#allocation3] sm:$0xff] }
 0x862   :  { %v863_v28 = vpack.c.bf16 %v855_v26, %v855_v26  ;;  %v331_v29 = vpack.c.bf16 %v330_v27, %v330_v27 }
 0x863   :  { %v402_v43 = vpop.permute.xlu1 %401 }
 0x864   :  { %872 = vst.msk [vmem:[%s1336_s2 + $0x8] sm:$0xf] %vm869_vm2, %v863_v28  ;;  %974 = vmatmul.mubr.msk.bf16.vlgmr.msra.gmra.mrb[4].mxu1 %vm12_vm0, %v331_v29 }
 0x865   :  { %989 = vmatprep.mubr.msk.bf16.mxu1 %vm1095_vm1, %v1094_v0  ;;  %986 = vmatpush3.bf16.msra.mxu1 %v1024_v14 }
 0x866   :  { %987 = vmatprep.subr.bf16.mxu1 %v1094_v0 }
 0x869   :  { %988 = vmatpush3.bf16.msra.mxu1 %v1025_v15 }
 0x86a   :  { %1001 = vmatprep.subr.bf16.mxu1 %v1094_v0 }
 0x937   :  { %v385_v31 = vpop.f32.mrb[4].mxu1 }
 0x938   :  { %v391_v32 = vadd.f32 %v896_v30, %v385_v31  ;;  %v975_v33 = vpop.f32.mrb[5].mxu1 }
 0x939   :  { %v388_v34 = vpop.f32.mrb[6].mxu1 }
 0x93a   :  { %1054 = vtanh.f32 %v391_v32  ;;  %v976_v35 = vpop.f32.mrb[7].mxu1  ;;  %v900_v37 = vmul.f32 -1.442695, %v391_v32 }
 0x93c   :  { %1056 = vpow2.f32 %v900_v37 }
 0x944   :  { %v1055_v36 = vpop.eup %1054 }
 0x945   :  { %406 = vrot.lane.b32.xlu0 %v1055_v36, %s1096_s15 }
 0x946   :  { %v1057_v38 = vpop.eup %1056 }
 0x947   :  { %v395_v39 = vadd.f32 1.0, %v1057_v38 }
 0x949   :  { %1058 = vrcp.f32 %v395_v39 }
 0x953   :  { %v1059_v40 = vpop.eup %1058 }
 0x954   :  { %v404_v44 = vmul.f32 %v1059_v40, %v402_v43  ;;  %v1026_v43 = vld [vmem:[%s1334_s1] sm:$0xff]  }
 0x9b7   :  { %v407_v41 = vpop.permute.xlu0 %406 }
 0x9b8   :  { %v409_v42 = vmul.f32 %v1059_v40, %v407_v41 }
 0x9ba   :  { %411 = vrot.lane.b32.xlu0 %v409_v42, %s1097_s16 }
 0xa2c   :  { %v412_v45 = vpop.permute.xlu0 %411 }
 0xa2d   :  { %v414_v46 = vadd.f32 %v412_v45, %v404_v44  ;;  %v1027_v44 = vld [vmem:[%s1334_s1 + $0x8] sm:$0xff]  }
 0xa2f   :  { %1060 = vtanh.f32 %v414_v46 }
 0xa39   :  { %v1061_v47 = vpop.eup %1060 }
 0xa3a   :  { %417 = vrot.lane.b32.xlu1 %v1061_v47, %s1096_s15 }
 0xa3e   :  { %422 = vrot.lane.b32.xlu1 %v414_v46, %s1098_s17 }
 0xaac   :  { %v418_v50 = vpop.permute.xlu1 %417 }
 0xaad   :  { %v420_v51 = vmul.f32 %v1059_v40, %v418_v50 }
 0xaaf   :  { %427 = vrot.lane.b32.xlu0 %v420_v51, %s1097_s16 }
 0xab0   :  { %v423_v52 = vpop.permute.xlu1 %422 }
 0xab1   :  { %425 = vst.msk [vmem:[#allocation4] sm:$0xff] %vm12_vm0, %v423_v52 }
 0xab8   :  { %v504_v53 = vld [vmem:[#allocation4] sm:$0xff] }
 0xab9   :  { %506 = vrot.lane.b32.xlu1 %v504_v53, %s1097_s16 }
 0xb21   :  { %v428_v54 = vpop.permute.xlu0 %427 }
 0xb22   :  { %430 = vst.msk [vmem:[#allocation3] sm:$0xff] %vm12_vm0, %v428_v54  ;;  %432 = vst.msk [vmem:[#allocation2 + $0x18] sm:$0xff] %vm12_vm0, %v428_v54  ;;  %v911_v54 = vld [vmem:[%s1335_s0 + $0x30] sm:$0xff] }
 0xb29   :  { %v856_v55 = vld [vmem:[#allocation2 + $0x18] sm:$0xff]  ;;  %v435_v56 = vld [vmem:[#allocation3] sm:$0xff] }
 0xb2a   :  { %v864_v57 = vpack.c.bf16 %v856_v55, %v856_v55  ;;  %v436_v58 = vpack.c.bf16 %v435_v56, %v435_v56 }
 0xb2b   :  { %v507_v9 = vpop.permute.xlu1 %506 }
 0xb2c   :  { %873 = vst.msk [vmem:[%s1336_s2 + $0xc] sm:$0xf] %vm869_vm2, %v864_v57  ;;  %982 = vmatmul.mubr.msk.bf16.vlgmr.msra.gmra.mrb[8].mxu0 %vm12_vm0, %v436_v58 }
 0xb2d   :  { %997 = vmatprep.mubr.msk.bf16.mxu0 %vm1095_vm1, %v1094_v0  ;;  %994 = vmatpush3.bf16.msra.mxu0 %v1026_v43 }
 0xb2e   :  { %995 = vmatprep.subr.bf16.mxu0 %v1094_v0 }
 0xb31   :  { %996 = vmatpush3.bf16.msra.mxu0 %v1027_v44 }
 0xbff   :  { %v490_v60 = vpop.f32.mrb[8].mxu0 }
 0xc00   :  { %v496_v61 = vadd.f32 %v901_v59, %v490_v60  ;;  %v983_v62 = vpop.f32.mrb[9].mxu0 }
 0xc01   :  { %v493_v63 = vpop.f32.mrb[10].mxu0 }
 0xc02   :  { %1062 = vtanh.f32 %v496_v61  ;;  %v984_v1 = vpop.f32.mrb[11].mxu0  ;;  %v905_v3 = vmul.f32 -1.442695, %v496_v61 }
 0xc04   :  { %1064 = vpow2.f32 %v905_v3 }
 0xc0c   :  { %v1063_v2 = vpop.eup %1062 }
 0xc0d   :  { %511 = vrot.lane.b32.xlu0 %v1063_v2, %s1096_s15 }
 0xc0e   :  { %v1065_v4 = vpop.eup %1064 }
 0xc0f   :  { %v500_v5 = vadd.f32 1.0, %v1065_v4 }
 0xc11   :  { %1066 = vrcp.f32 %v500_v5 }
 0xc1b   :  { %v1067_v6 = vpop.eup %1066 }
 0xc1c   :  { %v509_v10 = vmul.f32 %v1067_v6, %v507_v9  ;;  %v1028_v9 = vld [vmem:[%s1334_s1] sm:$0xff]  }
 0xc7f   :  { %v512_v7 = vpop.permute.xlu0 %511 }
 0xc80   :  { %v514_v8 = vmul.f32 %v1067_v6, %v512_v7 }
 0xc82   :  { %516 = vrot.lane.b32.xlu0 %v514_v8, %s1097_s16 }
 0xcf4   :  { %v517_v11 = vpop.permute.xlu0 %516 }
 0xcf5   :  { %v519_v12 = vadd.f32 %v517_v11, %v509_v10  ;;  %v1029_v10 = vld [vmem:[%s1334_s1 + $0x8] sm:$0xff]  }
 0xcf7   :  { %1068 = vtanh.f32 %v519_v12 }
 0xd01   :  { %v1069_v13 = vpop.eup %1068 }
 0xd02   :  { %522 = vrot.lane.b32.xlu1 %v1069_v13, %s1096_s15 }
 0xd06   :  { %527 = vrot.lane.b32.xlu1 %v519_v12, %s1098_s17 }
 0xd74   :  { %v523_v16 = vpop.permute.xlu1 %522 }
 0xd75   :  { %v525_v17 = vmul.f32 %v1067_v6, %v523_v16 }
 0xd77   :  { %532 = vrot.lane.b32.xlu0 %v525_v17, %s1097_s16 }
 0xd78   :  { %v528_v18 = vpop.permute.xlu1 %527 }
 0xd79   :  { %530 = vst.msk [vmem:[#allocation4] sm:$0xff] %vm12_vm0, %v528_v18 }
 0xd80   :  { %v609_v19 = vld [vmem:[#allocation4] sm:$0xff] }
 0xd81   :  { %611 = vrot.lane.b32.xlu1 %v609_v19, %s1097_s16  ;;  %v916_v19 = vld [vmem:[%s1335_s0 + $0x38] sm:$0xff] }
 0xde9   :  { %v533_v20 = vpop.permute.xlu0 %532 }
 0xdea   :  { %535 = vst.msk [vmem:[#allocation3] sm:$0xff] %vm12_vm0, %v533_v20  ;;  %537 = vst.msk [vmem:[#allocation2 + $0x20] sm:$0xff] %vm12_vm0, %v533_v20 }
 0xdf1   :  { %v857_v21 = vld [vmem:[#allocation2 + $0x20] sm:$0xff] }
 0xdf2   :  { %v540_v22 = vld [vmem:[#allocation3] sm:$0xff]  ;;  %v865_v23 = vpack.c.bf16 %v857_v21, %v857_v21 }
 0xdf3   :  { %v541_v24 = vpack.c.bf16 %v540_v22, %v540_v22  ;;  %v612_v38 = vpop.permute.xlu1 %611 }
 0xdf4   :  { %874 = vst.msk [vmem:[%s1336_s2 + $0x10] sm:$0xf] %vm869_vm2, %v865_v23 }
 0xdf5   :  { %990 = vmatmul.mubr.msk.bf16.vlgmr.msra.gmra.mrb[8].mxu1 %vm12_vm0, %v541_v24 }
 0xdf6   :  { %1005 = vmatprep.mubr.msk.bf16.mxu1 %vm1095_vm1, %v1094_v0  ;;  %1002 = vmatpush3.bf16.msra.mxu1 %v1028_v9 }
 0xdf7   :  { %1003 = vmatprep.subr.bf16.mxu1 %v1094_v0 }
 0xdfa   :  { %1004 = vmatpush3.bf16.msra.mxu1 %v1029_v10 }
 0xec8   :  { %v595_v26 = vpop.f32.mrb[8].mxu1 }
 0xec9   :  { %v601_v27 = vadd.f32 %v906_v25, %v595_v26  ;;  %v991_v28 = vpop.f32.mrb[9].mxu1 }
 0xeca   :  { %v598_v29 = vpop.f32.mrb[10].mxu1 }
 0xecb   :  { %1070 = vtanh.f32 %v601_v27  ;;  %v992_v30 = vpop.f32.mrb[11].mxu1  ;;  %v910_v32 = vmul.f32 -1.442695, %v601_v27 }
 0xecd   :  { %1072 = vpow2.f32 %v910_v32 }
 0xed5   :  { %v1071_v31 = vpop.eup %1070 }
 0xed6   :  { %616 = vrot.lane.b32.xlu0 %v1071_v31, %s1096_s15 }
 0xed7   :  { %v1073_v33 = vpop.eup %1072 }
 0xed8   :  { %v605_v34 = vadd.f32 1.0, %v1073_v33 }
 0xeda   :  { %1074 = vrcp.f32 %v605_v34 }
 0xee4   :  { %v1075_v35 = vpop.eup %1074 }
 0xee5   :  { %v614_v39 = vmul.f32 %v1075_v35, %v612_v38 }
 0xf48   :  { %v617_v36 = vpop.permute.xlu0 %616 }
 0xf49   :  { %v619_v37 = vmul.f32 %v1075_v35, %v617_v36 }
 0xf4b   :  { %621 = vrot.lane.b32.xlu0 %v619_v37, %s1097_s16 }
 0xfbd   :  { %v622_v40 = vpop.permute.xlu0 %621 }
 0xfbe   :  { %v624_v41 = vadd.f32 %v622_v40, %v614_v39 }
 0xfc0   :  { %1076 = vtanh.f32 %v624_v41 }
 0xfca   :  { %v1077_v42 = vpop.eup %1076 }
 0xfcb   :  { %627 = vrot.lane.b32.xlu1 %v1077_v42, %s1096_s15 }
 0xfcf   :  { %632 = vrot.lane.b32.xlu1 %v624_v41, %s1098_s17 }
0x103d   :  { %v628_v45 = vpop.permute.xlu1 %627 }
0x103e   :  { %v630_v46 = vmul.f32 %v1075_v35, %v628_v45 }
0x1040   :  { %637 = vrot.lane.b32.xlu0 %v630_v46, %s1097_s16 }
0x1041   :  { %v633_v47 = vpop.permute.xlu1 %632 }
0x1042   :  { %635 = vst.msk [vmem:[#allocation4] sm:$0xff] %vm12_vm0, %v633_v47 }
0x1049   :  { %v714_v48 = vld [vmem:[#allocation4] sm:$0xff] }
0x104a   :  { %716 = vrot.lane.b32.xlu1 %v714_v48, %s1097_s16 }
0x10b2   :  { %v638_v49 = vpop.permute.xlu0 %637 }
0x10b3   :  { %640 = vst.msk [vmem:[#allocation3] sm:$0xff] %vm12_vm0, %v638_v49  ;;  %642 = vst.msk [vmem:[#allocation2 + $0x28] sm:$0xff] %vm12_vm0, %v638_v49 }
0x10ba   :  { %v858_v50 = vld [vmem:[#allocation2 + $0x28] sm:$0xff]  ;;  %v645_v51 = vld [vmem:[#allocation3] sm:$0xff] }
0x10bb   :  { %v866_v52 = vpack.c.bf16 %v858_v50, %v858_v50  ;;  %v646_v53 = vpack.c.bf16 %v645_v51, %v645_v51 }
0x10bc   :  { %v717_v4 = vpop.permute.xlu1 %716 }
0x10bd   :  { %875 = vst.msk [vmem:[%s1336_s2 + $0x14] sm:$0xf] %vm869_vm2, %v866_v52  ;;  %998 = vmatmul.mubr.msk.bf16.vlgmr.msra.gmra.mrb[12].mxu0 %vm12_vm0, %v646_v53 }
0x1190   :  { %v700_v55 = vpop.f32.mrb[12].mxu0 }
0x1191   :  { %v706_v56 = vadd.f32 %v911_v54, %v700_v55  ;;  %v999_v57 = vpop.f32.mrb[13].mxu0 }
0x1192   :  { %v703_v58 = vpop.f32.mrb[14].mxu0 }
0x1193   :  { %1078 = vtanh.f32 %v706_v56  ;;  %v1000_v59 = vpop.f32.mrb[15].mxu0  ;;  %v915_v61 = vmul.f32 -1.442695, %v706_v56 }
0x1195   :  { %1080 = vpow2.f32 %v915_v61 }
0x119d   :  { %v1079_v60 = vpop.eup %1078 }
0x119e   :  { %721 = vrot.lane.b32.xlu0 %v1079_v60, %s1096_s15 }
0x119f   :  { %v1081_v62 = vpop.eup %1080 }
0x11a0   :  { %v710_v63 = vadd.f32 1.0, %v1081_v62 }
0x11a2   :  { %1082 = vrcp.f32 %v710_v63 }
0x11ac   :  { %v1083_v1 = vpop.eup %1082 }
0x11ad   :  { %v719_v5 = vmul.f32 %v1083_v1, %v717_v4 }
0x1210   :  { %v722_v2 = vpop.permute.xlu0 %721 }
0x1211   :  { %v724_v3 = vmul.f32 %v1083_v1, %v722_v2 }
0x1213   :  { %726 = vrot.lane.b32.xlu0 %v724_v3, %s1097_s16 }
0x1285   :  { %v727_v6 = vpop.permute.xlu0 %726 }
0x1286   :  { %v729_v7 = vadd.f32 %v727_v6, %v719_v5 }
0x1288   :  { %1084 = vtanh.f32 %v729_v7 }
0x1292   :  { %v1085_v8 = vpop.eup %1084 }
0x1293   :  { %732 = vrot.lane.b32.xlu1 %v1085_v8, %s1096_s15 }
0x1297   :  { %737 = vrot.lane.b32.xlu1 %v729_v7, %s1098_s17 }
0x1305   :  { %v733_v11 = vpop.permute.xlu1 %732 }
0x1306   :  { %v735_v12 = vmul.f32 %v1083_v1, %v733_v11 }
0x1308   :  { %742 = vrot.lane.b32.xlu0 %v735_v12, %s1097_s16 }
0x1309   :  { %v738_v13 = vpop.permute.xlu1 %737 }
0x130a   :  { %740 = vst.msk [vmem:[#allocation4] sm:$0xff] %vm12_vm0, %v738_v13 }
0x1311   :  { %v819_v14 = vld [vmem:[#allocation4] sm:$0xff] }
0x1312   :  { %821 = vrot.lane.b32.xlu1 %v819_v14, %s1097_s16 }
0x137a   :  { %v743_v15 = vpop.permute.xlu0 %742 }
0x137b   :  { %745 = vst.msk [vmem:[#allocation3] sm:$0xff] %vm12_vm0, %v743_v15  ;;  %747 = vst.msk [vmem:[#allocation2 + $0x30] sm:$0xff] %vm12_vm0, %v743_v15 }
0x1382   :  { %v859_v0 = vld [vmem:[#allocation2 + $0x30] sm:$0xff]  ;;  %v750_v16 = vld [vmem:[#allocation3] sm:$0xff] }
0x1383   :  { %v867_v17 = vpack.c.bf16 %v859_v0, %v859_v0  ;;  %v751_v18 = vpack.c.bf16 %v750_v16, %v750_v16 }
0x1384   :  { %v822_v32 = vpop.permute.xlu1 %821 }
0x1385   :  { %876 = vst.msk [vmem:[%s1336_s2 + $0x18] sm:$0xf] %vm869_vm2, %v867_v17  ;;  %1006 = vmatmul.mubr.msk.bf16.vlgmr.msra.gmra.mrb[12].mxu1 %vm12_vm0, %v751_v18 }
0x1458   :  { %v805_v20 = vpop.f32.mrb[12].mxu1 }
0x1459   :  { %v811_v21 = vadd.f32 %v916_v19, %v805_v20  ;;  %v1007_v22 = vpop.f32.mrb[13].mxu1 }
0x145a   :  { %v808_v23 = vpop.f32.mrb[14].mxu1 }
0x145b   :  { %1086 = vtanh.f32 %v811_v21  ;;  %v1008_v24 = vpop.f32.mrb[15].mxu1  ;;  %v920_v26 = vmul.f32 -1.442695, %v811_v21 }
0x145d   :  { %1088 = vpow2.f32 %v920_v26 }
0x1465   :  { %v1087_v25 = vpop.eup %1086 }
0x1466   :  { %826 = vrot.lane.b32.xlu0 %v1087_v25, %s1096_s15 }
0x1467   :  { %v1089_v27 = vpop.eup %1088 }
0x1468   :  { %v815_v28 = vadd.f32 1.0, %v1089_v27 }
0x146a   :  { %1090 = vrcp.f32 %v815_v28 }
0x1474   :  { %v1091_v29 = vpop.eup %1090 }
0x1475   :  { %v824_v33 = vmul.f32 %v1091_v29, %v822_v32 }
0x14d8   :  { %v827_v30 = vpop.permute.xlu0 %826 }
0x14d9   :  { %v829_v31 = vmul.f32 %v1091_v29, %v827_v30 }
0x14db   :  { %831 = vrot.lane.b32.xlu0 %v829_v31, %s1097_s16 }
0x154d   :  { %v832_v34 = vpop.permute.xlu0 %831 }
0x154e   :  { %v834_v35 = vadd.f32 %v832_v34, %v824_v33 }
0x1550   :  { %1092 = vtanh.f32 %v834_v35 }
0x155a   :  { %v1093_v36 = vpop.eup %1092 }
0x155b   :  { %837 = vrot.lane.b32.xlu1 %v1093_v36, %s1096_s15 }
0x155f   :  { %842 = vrot.lane.b32.xlu1 %v834_v35, %s1098_s17 }
0x15cd   :  { %v838_v37 = vpop.permute.xlu1 %837 }
0x15ce   :  { %v840_v38 = vmul.f32 %v1091_v29, %v838_v37 }
0x15d0   :  { %847 = vrot.lane.b32.xlu0 %v840_v38, %s1097_s16 }
0x15d1   :  { %v843_v39 = vpop.permute.xlu1 %842 }
0x15d2   :  { %845 = vst.msk [vmem:[#allocation4] sm:$0xff] %vm12_vm0, %v843_v39 }
0x1642   :  { %v848_v40 = vpop.permute.xlu0 %847 }
0x1643   :  { %850 = vst.msk [vmem:[#allocation3] sm:$0xff] %vm12_vm0, %v848_v40  ;;  %852 = vst.msk [vmem:[#allocation2 + $0x38] sm:$0xff] %vm12_vm0, %v848_v40 }
0x164a   :  { %v860_v41 = vld [vmem:[#allocation2 + $0x38] sm:$0xff] }
0x164b   :  { %v868_v42 = vpack.c.bf16 %v860_v41, %v860_v41 }
0x164d   :  { %877 = vst.msk [vmem:[%s1336_s2 + $0x1c] sm:$0xf] %vm869_vm2, %v868_v42 }

// kernel: lstm_model_forward.7
= control target key start
LH: loop header
LB: loop body
LE: loop exit
PB: predicated region body
PF: predicated region fallthrough
CT: control target
= control target key end

     0   :  { %vm18_vm0 = vcmask 261120   ;;  %v1223_v0 = vmov 0.0   ;;  %vm1224_vm1 = vmmov 0   ;;  %s1225_s21 = smov 64   ;;  %s1226_s22 = smov 32   ;;  %vm971_vm2 = vcmask 31744   ;;  %s1496_s1 = inlined_call_operand.vmem [shape: bf16[32,128], index: 1, kind: input, shape index: {}]   ;;  %s1497_s0 = inlined_call_operand.vmem [shape: f32[8,8,128], index: 0, kind: input, shape index: {}]   ;;  %s1498_s2 = inlined_call_operand.vmem [shape: bf16[32,4], index: 2, kind: input, shape index: {}]   ;;  %s1499_s3 = inlined_call_operand.vmem [shape: f32[1,4], index: 3, kind: input, shape index: {}]   ;;  %s1500_s4 = inlined_call_operand.vmem [shape: f32[8,8,4], index: 4, kind: output, shape index: {}]  }
   0x1   :  { %1060 = vmatprep.subr.bf16.mxu1 %v1223_v0  ;;  %v1141_v1 = vld [vmem:[%s1496_s1] sm:$0xff]   ;;  %1064 = vmatprep.mubr.msk.bf16.mxu1 %vm1224_vm1, %v1223_v0  ;;  %19 = vst.msk [vmem:[#allocation3] sm:$0xff] %vm18_vm0, %v1223_v0  ;;  %20 = vst.msk [vmem:[#allocation4] sm:$0xff] %vm18_vm0, %v1223_v0  ;;  %v1142_v2 = vld [vmem:[%s1496_s1 + $0x8] sm:$0xff]   ;;  %s1227_s23 = smov 96  }
   0x2   :  { %1076 = vmatprep.subr.bf16.mxu0 %v1223_v0  ;;  %1080 = vmatprep.mubr.msk.bf16.mxu0 %vm1224_vm1, %v1223_v0  ;;  %v21_v5 = vld [vmem:[%s1497_s0] sm:$0xff]  ;;  %v1144_v25 = vld [vmem:[%s1496_s1 + $0x8] sm:$0xff]   ;;  %v993_v60 = vld [vmem:[%s1497_s0 + $0x10] sm:$0xff] }
   0x3   :  { %1061 = vmatpush3.bf16.msra.mxu1 %v1141_v1  ;;  %v1143_v24 = vld [vmem:[%s1496_s1] sm:$0xff]   ;;  %v988_v33 = vld [vmem:[%s1497_s0 + $0x8] sm:$0xff] }
   0x4   :  { %1062 = vmatprep.subr.bf16.mxu1 %v1223_v0  ;;  %v1145_v51 = vld [vmem:[%s1496_s1] sm:$0xff]   ;;  %v1146_v52 = vld [vmem:[%s1496_s1 + $0x8] sm:$0xff]  }
   0x5   :  { %1077 = vmatpush3.bf16.msra.mxu0 %v1145_v51  ;;  %v1003_v51 = vld [vmem:[%s1497_s0 + $0x20] sm:$0xff] }
   0x6   :  { %1078 = vmatprep.subr.bf16.mxu0 %v1223_v0 }
   0x7   :  { %1063 = vmatpush3.bf16.msra.mxu1 %v1142_v2 }
   0x8   :  { %v22_v3 = vld [vmem:[#allocation3] sm:$0xff]  ;;  %1068 = vmatprep.subr.bf16.mxu1 %v1223_v0  ;;  %v91_v12 = vld [vmem:[#allocation4] sm:$0xff] }
   0x9   :  { %v23_v4 = vpack.c.bf16 %v22_v3, %v22_v3  ;;  %1079 = vmatpush3.bf16.msra.mxu0 %v1146_v52 }
   0xa   :  { %1092 = vmatprep.subr.bf16.mxu0 %v1223_v0 }
   0xb   :  { %1065 = vmatmul.mubr.msk.bf16.vlgmr.msra.gmra.mrb[0].mxu1 %vm18_vm0, %v23_v4 }
   0xc   :  { %1072 = vmatprep.mubr.msk.bf16.mxu1 %vm1224_vm1, %v1223_v0  ;;  %1069 = vmatpush3.bf16.msra.mxu1 %v1143_v24  ;;  %v998_v24 = vld [vmem:[%s1497_s0 + $0x18] sm:$0xff] }
   0xd   :  { %1070 = vmatprep.subr.bf16.mxu1 %v1223_v0 }
  0x10   :  { %1071 = vmatpush3.bf16.msra.mxu1 %v1144_v25 }
  0x11   :  { %1084 = vmatprep.subr.bf16.mxu1 %v1223_v0 }
  0xde   :  { %v77_v6 = vpop.f32.mrb[0].mxu1 }
  0xdf   :  { %v83_v7 = vadd.f32 %v77_v6, %v21_v5  ;;  %v1066_v8 = vpop.f32.mrb[1].mxu1 }
  0xe0   :  { %v80_v9 = vpop.f32.mrb[2].mxu1 }
  0xe1   :  { %1159 = vtanh.f32 %v83_v7  ;;  %v1067_v10 = vpop.f32.mrb[3].mxu1  ;;  %v987_v13 = vmul.f32 -1.442695, %v83_v7 }
  0xe3   :  { %1161 = vpow2.f32 %v987_v13 }
  0xeb   :  { %v1160_v11 = vpop.eup %1159 }
  0xec   :  { %98 = vrot.lane.b32.xlu0 %v1160_v11, %s1225_s21 }
  0xed   :  { %v1162_v14 = vpop.eup %1161 }
  0xee   :  { %v87_v15 = vadd.f32 1.0, %v1162_v14 }
  0xf0   :  { %93 = vrot.lane.b32.xlu0 %v91_v12, %s1226_s22  ;;  %1163 = vrcp.f32 %v87_v15  ;;  %v1147_v15 = vld [vmem:[%s1496_s1] sm:$0xff]  }
  0xfa   :  { %v1164_v16 = vpop.eup %1163 }
 0x15e   :  { %v99_v17 = vpop.permute.xlu0 %98 }
 0x15f   :  { %v101_v18 = vmul.f32 %v1164_v16, %v99_v17 }
 0x161   :  { %103 = vrot.lane.b32.xlu1 %v101_v18, %s1226_s22 }
 0x162   :  { %v94_v19 = vpop.permute.xlu0 %93 }
 0x163   :  { %v96_v20 = vmul.f32 %v1164_v16, %v94_v19 }
 0x1d3   :  { %v104_v21 = vpop.permute.xlu1 %103 }
 0x1d4   :  { %v106_v22 = vadd.f32 %v104_v21, %v96_v20 }
 0x1d6   :  { %1165 = vtanh.f32 %v106_v22 }
 0x1e0   :  { %v1166_v23 = vpop.eup %1165 }
 0x1e1   :  { %109 = vrot.lane.b32.xlu1 %v1166_v23, %s1225_s21 }
 0x1e5   :  { %114 = vrot.lane.b32.xlu1 %v106_v22, %s1227_s23 }
 0x253   :  { %v110_v26 = vpop.permute.xlu1 %109 }
 0x254   :  { %v112_v27 = vmul.f32 %v1164_v16, %v110_v26  ;;  %v1148_v16 = vld [vmem:[%s1496_s1 + $0x8] sm:$0xff]  }
 0x256   :  { %119 = vrot.lane.b32.xlu0 %v112_v27, %s1226_s22 }
 0x257   :  { %v115_v28 = vpop.permute.xlu1 %114 }
 0x258   :  { %117 = vst.msk [vmem:[#allocation4] sm:$0xff] %vm18_vm0, %v115_v28 }
 0x25f   :  { %v195_v29 = vld [vmem:[#allocation4] sm:$0xff] }
 0x260   :  { %197 = vrot.lane.b32.xlu1 %v195_v29, %s1226_s22 }
 0x2c8   :  { %v120_v30 = vpop.permute.xlu0 %119 }
 0x2c9   :  { %122 = vst.msk [vmem:[#allocation3] sm:$0xff] %vm18_vm0, %v120_v30  ;;  %123 = vst.msk [vmem:[#allocation2] sm:$0xff] %vm18_vm0, %v120_v30 }
 0x2d0   :  { %v126_v31 = vld [vmem:[#allocation3] sm:$0xff] }
 0x2d1   :  { %v127_v32 = vpack.c.bf16 %v126_v31, %v126_v31 }
 0x2d2   :  { %v198_v46 = vpop.permute.xlu1 %197 }
 0x2d3   :  { %1073 = vmatmul.mubr.msk.bf16.vlgmr.msra.gmra.mrb[4].mxu1 %vm18_vm0, %v127_v32 }
 0x2d4   :  { %1088 = vmatprep.mubr.msk.bf16.mxu1 %vm1224_vm1, %v1223_v0  ;;  %1085 = vmatpush3.bf16.msra.mxu1 %v1147_v15  ;;  %v1008_v15 = vld [vmem:[%s1497_s0 + $0x28] sm:$0xff] }
 0x2d5   :  { %1086 = vmatprep.subr.bf16.mxu1 %v1223_v0 }
 0x2d8   :  { %1087 = vmatpush3.bf16.msra.mxu1 %v1148_v16 }
 0x2d9   :  { %1100 = vmatprep.subr.bf16.mxu1 %v1223_v0 }
 0x3a6   :  { %v181_v34 = vpop.f32.mrb[4].mxu1 }
 0x3a7   :  { %v187_v35 = vadd.f32 %v988_v33, %v181_v34  ;;  %v1074_v36 = vpop.f32.mrb[5].mxu1 }
 0x3a8   :  { %v184_v37 = vpop.f32.mrb[6].mxu1 }
 0x3a9   :  { %1167 = vtanh.f32 %v187_v35  ;;  %v1075_v38 = vpop.f32.mrb[7].mxu1  ;;  %v992_v40 = vmul.f32 -1.442695, %v187_v35 }
 0x3ab   :  { %1169 = vpow2.f32 %v992_v40 }
 0x3b3   :  { %v1168_v39 = vpop.eup %1167 }
 0x3b4   :  { %202 = vrot.lane.b32.xlu0 %v1168_v39, %s1225_s21 }
 0x3b5   :  { %v1170_v41 = vpop.eup %1169 }
 0x3b6   :  { %v191_v42 = vadd.f32 1.0, %v1170_v41 }
 0x3b8   :  { %1171 = vrcp.f32 %v191_v42  ;;  %v1149_v42 = vld [vmem:[%s1496_s1] sm:$0xff]  }
 0x3c2   :  { %v1172_v43 = vpop.eup %1171 }
 0x3c3   :  { %v200_v47 = vmul.f32 %v1172_v43, %v198_v46 }
 0x426   :  { %v203_v44 = vpop.permute.xlu0 %202 }
 0x427   :  { %v205_v45 = vmul.f32 %v1172_v43, %v203_v44 }
 0x429   :  { %207 = vrot.lane.b32.xlu0 %v205_v45, %s1226_s22 }
 0x49b   :  { %v208_v48 = vpop.permute.xlu0 %207 }
 0x49c   :  { %v210_v49 = vadd.f32 %v208_v48, %v200_v47 }
 0x49e   :  { %1173 = vtanh.f32 %v210_v49 }
 0x4a8   :  { %v1174_v50 = vpop.eup %1173 }
 0x4a9   :  { %213 = vrot.lane.b32.xlu1 %v1174_v50, %s1225_s21 }
 0x4ad   :  { %218 = vrot.lane.b32.xlu1 %v210_v49, %s1227_s23 }
 0x51b   :  { %v214_v53 = vpop.permute.xlu1 %213 }
 0x51c   :  { %v216_v54 = vmul.f32 %v1172_v43, %v214_v53  ;;  %v1150_v43 = vld [vmem:[%s1496_s1 + $0x8] sm:$0xff]  }
 0x51e   :  { %223 = vrot.lane.b32.xlu0 %v216_v54, %s1226_s22 }
 0x51f   :  { %v219_v55 = vpop.permute.xlu1 %218 }
 0x520   :  { %221 = vst.msk [vmem:[#allocation4] sm:$0xff] %vm18_vm0, %v219_v55 }
 0x527   :  { %v300_v56 = vld [vmem:[#allocation4] sm:$0xff] }
 0x528   :  { %302 = vrot.lane.b32.xlu1 %v300_v56, %s1226_s22 }
 0x590   :  { %v224_v57 = vpop.permute.xlu0 %223 }
 0x591   :  { %226 = vst.msk [vmem:[#allocation3] sm:$0xff] %vm18_vm0, %v224_v57  ;;  %228 = vst.msk [vmem:[#allocation2 + $0x8] sm:$0xff] %vm18_vm0, %v224_v57 }
 0x598   :  { %v231_v58 = vld [vmem:[#allocation3] sm:$0xff] }
 0x599   :  { %v232_v59 = vpack.c.bf16 %v231_v58, %v231_v58 }
 0x59a   :  { %v303_v10 = vpop.permute.xlu1 %302 }
 0x59b   :  { %1081 = vmatmul.mubr.msk.bf16.vlgmr.msra.gmra.mrb[0].mxu0 %vm18_vm0, %v232_v59 }
 0x59c   :  { %1096 = vmatprep.mubr.msk.bf16.mxu0 %vm1224_vm1, %v1223_v0  ;;  %1093 = vmatpush3.bf16.msra.mxu0 %v1149_v42 }
 0x59d   :  { %1094 = vmatprep.subr.bf16.mxu0 %v1223_v0 }
 0x5a0   :  { %1095 = vmatpush3.bf16.msra.mxu0 %v1150_v43 }
 0x5a1   :  { %1108 = vmatprep.subr.bf16.mxu0 %v1223_v0 }
 0x66e   :  { %v286_v61 = vpop.f32.mrb[0].mxu0 }
 0x66f   :  { %v292_v62 = vadd.f32 %v993_v60, %v286_v61  ;;  %v1082_v63 = vpop.f32.mrb[1].mxu0 }
 0x670   :  { %v289_v1 = vpop.f32.mrb[2].mxu0 }
 0x671   :  { %1175 = vtanh.f32 %v292_v62  ;;  %v1083_v2 = vpop.f32.mrb[3].mxu0  ;;  %v997_v4 = vmul.f32 -1.442695, %v292_v62 }
 0x673   :  { %1177 = vpow2.f32 %v997_v4 }
 0x67b   :  { %v1176_v3 = vpop.eup %1175 }
 0x67c   :  { %307 = vrot.lane.b32.xlu0 %v1176_v3, %s1225_s21 }
 0x67d   :  { %v1178_v5 = vpop.eup %1177 }
 0x67e   :  { %v296_v6 = vadd.f32 1.0, %v1178_v5 }
 0x680   :  { %1179 = vrcp.f32 %v296_v6  ;;  %v1151_v6 = vld [vmem:[%s1496_s1] sm:$0xff]  }
 0x68a   :  { %v1180_v7 = vpop.eup %1179 }
 0x68b   :  { %v305_v11 = vmul.f32 %v1180_v7, %v303_v10 }
 0x6ee   :  { %v308_v8 = vpop.permute.xlu0 %307 }
 0x6ef   :  { %v310_v9 = vmul.f32 %v1180_v7, %v308_v8 }
 0x6f1   :  { %312 = vrot.lane.b32.xlu0 %v310_v9, %s1226_s22 }
 0x763   :  { %v313_v12 = vpop.permute.xlu0 %312 }
 0x764   :  { %v315_v13 = vadd.f32 %v313_v12, %v305_v11 }
 0x766   :  { %1181 = vtanh.f32 %v315_v13 }
 0x770   :  { %v1182_v14 = vpop.eup %1181 }
 0x771   :  { %318 = vrot.lane.b32.xlu1 %v1182_v14, %s1225_s21 }
 0x775   :  { %323 = vrot.lane.b32.xlu1 %v315_v13, %s1227_s23 }
 0x7e3   :  { %v319_v17 = vpop.permute.xlu1 %318 }
 0x7e4   :  { %v321_v18 = vmul.f32 %v1180_v7, %v319_v17  ;;  %v1152_v7 = vld [vmem:[%s1496_s1 + $0x8] sm:$0xff]  }
 0x7e6   :  { %328 = vrot.lane.b32.xlu0 %v321_v18, %s1226_s22 }
 0x7e7   :  { %v324_v19 = vpop.permute.xlu1 %323 }
 0x7e8   :  { %326 = vst.msk [vmem:[#allocation4] sm:$0xff] %vm18_vm0, %v324_v19 }
 0x7ef   :  { %v405_v20 = vld [vmem:[#allocation4] sm:$0xff] }
 0x7f0   :  { %407 = vrot.lane.b32.xlu1 %v405_v20, %s1226_s22 }
 0x858   :  { %v329_v21 = vpop.permute.xlu0 %328 }
 0x859   :  { %331 = vst.msk [vmem:[#allocation3] sm:$0xff] %vm18_vm0, %v329_v21  ;;  %333 = vst.msk [vmem:[#allocation2 + $0x10] sm:$0xff] %vm18_vm0, %v329_v21 }
 0x860   :  { %v336_v22 = vld [vmem:[#allocation3] sm:$0xff] }
 0x861   :  { %v337_v23 = vpack.c.bf16 %v336_v22, %v336_v22 }
 0x862   :  { %v408_v37 = vpop.permute.xlu1 %407 }
 0x863   :  { %1089 = vmatmul.mubr.msk.bf16.vlgmr.msra.gmra.mrb[8].mxu1 %vm18_vm0, %v337_v23 }
 0x864   :  { %1104 = vmatprep.mubr.msk.bf16.mxu1 %vm1224_vm1, %v1223_v0  ;;  %1101 = vmatpush3.bf16.msra.mxu1 %v1151_v6 }
 0x865   :  { %1102 = vmatprep.subr.bf16.mxu1 %v1223_v0 }
 0x868   :  { %1103 = vmatpush3.bf16.msra.mxu1 %v1152_v7 }
 0x869   :  { %1116 = vmatprep.subr.bf16.mxu1 %v1223_v0 }
 0x936   :  { %v391_v25 = vpop.f32.mrb[8].mxu1 }
 0x937   :  { %v397_v26 = vadd.f32 %v998_v24, %v391_v25  ;;  %v1090_v27 = vpop.f32.mrb[9].mxu1 }
 0x938   :  { %v394_v28 = vpop.f32.mrb[10].mxu1 }
 0x939   :  { %1183 = vtanh.f32 %v397_v26  ;;  %v1091_v29 = vpop.f32.mrb[11].mxu1  ;;  %v1002_v31 = vmul.f32 -1.442695, %v397_v26 }
 0x93b   :  { %1185 = vpow2.f32 %v1002_v31 }
 0x943   :  { %v1184_v30 = vpop.eup %1183 }
 0x944   :  { %412 = vrot.lane.b32.xlu0 %v1184_v30, %s1225_s21 }
 0x945   :  { %v1186_v32 = vpop.eup %1185 }
 0x946   :  { %v401_v33 = vadd.f32 1.0, %v1186_v32 }
 0x948   :  { %1187 = vrcp.f32 %v401_v33  ;;  %v1153_v33 = vld [vmem:[%s1496_s1] sm:$0xff]  }
 0x952   :  { %v1188_v34 = vpop.eup %1187 }
 0x953   :  { %v410_v38 = vmul.f32 %v1188_v34, %v408_v37 }
 0x9b6   :  { %v413_v35 = vpop.permute.xlu0 %412 }
 0x9b7   :  { %v415_v36 = vmul.f32 %v1188_v34, %v413_v35  ;;  %v1155_v35 = vld [vmem:[%s1498_s2] sm:$0xff]  }
 0x9b9   :  { %417 = vrot.lane.b32.xlu0 %v415_v36, %s1226_s22 }
 0xa2b   :  { %v418_v39 = vpop.permute.xlu0 %417 }
 0xa2c   :  { %v420_v40 = vadd.f32 %v418_v39, %v410_v38 }
 0xa2e   :  { %1189 = vtanh.f32 %v420_v40 }
 0xa38   :  { %v1190_v41 = vpop.eup %1189 }
 0xa39   :  { %423 = vrot.lane.b32.xlu1 %v1190_v41, %s1225_s21  ;;  %v860_v41 = vld [vmem:[#allocation2 + $0x8] sm:$0xff] }
 0xa3d   :  { %428 = vrot.lane.b32.xlu1 %v420_v40, %s1227_s23 }
 0xaab   :  { %v424_v44 = vpop.permute.xlu1 %423 }
 0xaac   :  { %v426_v45 = vmul.f32 %v1188_v34, %v424_v44  ;;  %v1154_v34 = vld [vmem:[%s1496_s1 + $0x8] sm:$0xff]   ;;  %v859_v44 = vld [vmem:[#allocation2] sm:$0xff] }
 0xaae   :  { %433 = vrot.lane.b32.xlu0 %v426_v45, %s1226_s22  ;;  %v1156_v45 = vld [vmem:[%s1498_s2 + $0x8] sm:$0xff]  }
 0xaaf   :  { %v429_v46 = vpop.permute.xlu1 %428 }
 0xab0   :  { %431 = vst.msk [vmem:[#allocation4] sm:$0xff] %vm18_vm0, %v429_v46  ;;  %v867_v46 = vpack.c.bf16 %v860_v41, %v859_v44 }
 0xab7   :  { %v510_v47 = vld [vmem:[#allocation4] sm:$0xff] }
 0xab8   :  { %512 = vrot.lane.b32.xlu1 %v510_v47, %s1226_s22 }
 0xb20   :  { %v434_v48 = vpop.permute.xlu0 %433 }
 0xb21   :  { %436 = vst.msk [vmem:[#allocation3] sm:$0xff] %vm18_vm0, %v434_v48  ;;  %438 = vst.msk [vmem:[#allocation2 + $0x18] sm:$0xff] %vm18_vm0, %v434_v48 }
 0xb28   :  { %v441_v49 = vld [vmem:[#allocation3] sm:$0xff]  ;;  %v862_v47 = vld [vmem:[#allocation2 + $0x18] sm:$0xff] }
 0xb29   :  { %v442_v50 = vpack.c.bf16 %v441_v49, %v441_v49  ;;  %v861_v49 = vld [vmem:[#allocation2 + $0x10] sm:$0xff] }
 0xb2a   :  { %v513_v1 = vpop.permute.xlu1 %512 }
 0xb2b   :  { %1097 = vmatmul.mubr.msk.bf16.vlgmr.msra.gmra.mrb[4].mxu0 %vm18_vm0, %v442_v50  ;;  %v868_v50 = vpack.c.bf16 %v862_v47, %v861_v49 }
 0xb2c   :  { %1112 = vmatprep.mubr.msk.bf16.mxu0 %vm1224_vm1, %v1223_v0  ;;  %1109 = vmatpush3.bf16.msra.mxu0 %v1153_v33 }
 0xb2d   :  { %1110 = vmatprep.subr.bf16.mxu0 %v1223_v0 }
 0xb30   :  { %1111 = vmatpush3.bf16.msra.mxu0 %v1154_v34 }
 0xb31   :  { %1124 = vmatprep.subr.bf16.mxu0 %v1155_v35 }
 0xbfe   :  { %v496_v52 = vpop.f32.mrb[4].mxu0 }
 0xbff   :  { %v502_v53 = vadd.f32 %v1003_v51, %v496_v52  ;;  %v1098_v54 = vpop.f32.mrb[5].mxu0 }
 0xc00   :  { %v499_v55 = vpop.f32.mrb[6].mxu0 }
 0xc01   :  { %1191 = vtanh.f32 %v502_v53  ;;  %v1099_v56 = vpop.f32.mrb[7].mxu0  ;;  %v1007_v58 = vmul.f32 -1.442695, %v502_v53  ;;  %v1013_v53 = vld [vmem:[%s1497_s0 + $0x30] sm:$0xff] }
 0xc03   :  { %1193 = vpow2.f32 %v1007_v58 }
 0xc0b   :  { %v1192_v57 = vpop.eup %1191 }
 0xc0c   :  { %517 = vrot.lane.b32.xlu0 %v1192_v57, %s1225_s21 }
 0xc0d   :  { %v1194_v59 = vpop.eup %1193 }
 0xc0e   :  { %v506_v60 = vadd.f32 1.0, %v1194_v59  ;;  %v1425_v59 = vld [vmem:[%s1499_s3] ss:$0 sm:$0xff] }
 0xc10   :  { %1195 = vrcp.f32 %v506_v60 }
 0xc1a   :  { %v1196_v61 = vpop.eup %1195 }
 0xc1b   :  { %v515_v2 = vmul.f32 %v1196_v61, %v513_v1 }
 0xc7e   :  { %v518_v62 = vpop.permute.xlu0 %517 }
 0xc7f   :  { %v520_v63 = vmul.f32 %v1196_v61, %v518_v62 }
 0xc81   :  { %522 = vrot.lane.b32.xlu0 %v520_v63, %s1226_s22 }
 0xcf3   :  { %v523_v3 = vpop.permute.xlu0 %522 }
 0xcf4   :  { %v525_v4 = vadd.f32 %v523_v3, %v515_v2 }
 0xcf6   :  { %1197 = vtanh.f32 %v525_v4 }
 0xd00   :  { %v1198_v5 = vpop.eup %1197 }
 0xd01   :  { %528 = vrot.lane.b32.xlu1 %v1198_v5, %s1225_s21 }
 0xd05   :  { %533 = vrot.lane.b32.xlu1 %v525_v4, %s1227_s23 }
 0xd73   :  { %v529_v8 = vpop.permute.xlu1 %528 }
 0xd74   :  { %v531_v9 = vmul.f32 %v1196_v61, %v529_v8 }
 0xd76   :  { %538 = vrot.lane.b32.xlu0 %v531_v9, %s1226_s22 }
 0xd77   :  { %v534_v10 = vpop.permute.xlu1 %533 }
 0xd78   :  { %536 = vst.msk [vmem:[#allocation4] sm:$0xff] %vm18_vm0, %v534_v10 }
 0xd7f   :  { %v615_v11 = vld [vmem:[#allocation4] sm:$0xff] }
 0xd80   :  { %617 = vrot.lane.b32.xlu1 %v615_v11, %s1226_s22 }
 0xde8   :  { %v539_v12 = vpop.permute.xlu0 %538 }
 0xde9   :  { %541 = vst.msk [vmem:[#allocation3] sm:$0xff] %vm18_vm0, %v539_v12  ;;  %543 = vst.msk [vmem:[#allocation2 + $0x20] sm:$0xff] %vm18_vm0, %v539_v12 }
 0xdf0   :  { %v546_v13 = vld [vmem:[#allocation3] sm:$0xff] }
 0xdf1   :  { %v547_v14 = vpack.c.bf16 %v546_v13, %v546_v13  ;;  %v863_v51 = vld [vmem:[#allocation2 + $0x20] sm:$0xff] }
 0xdf2   :  { %v618_v28 = vpop.permute.xlu1 %617 }
 0xdf3   :  { %1105 = vmatmul.mubr.msk.bf16.vlgmr.msra.gmra.mrb[12].mxu1 %vm18_vm0, %v547_v14 }
 0xdf4   :  { %1120 = vmatprep.mubr.msk.bf16.mxu1 %vm1224_vm1, %v1223_v0 }
 0xec6   :  { %v601_v16 = vpop.f32.mrb[12].mxu1 }
 0xec7   :  { %v607_v17 = vadd.f32 %v1008_v15, %v601_v16  ;;  %v1106_v18 = vpop.f32.mrb[13].mxu1 }
 0xec8   :  { %v604_v19 = vpop.f32.mrb[14].mxu1  ;;  %v1158_v18 = vld [vmem:[%s1496_s1 + $0x8] sm:$0xff]  }
 0xec9   :  { %1199 = vtanh.f32 %v607_v17  ;;  %v1107_v20 = vpop.f32.mrb[15].mxu1  ;;  %v1012_v22 = vmul.f32 -1.442695, %v607_v17  ;;  %v1157_v17 = vld [vmem:[%s1496_s1] sm:$0xff]  }
 0xeca   :  { %1117 = vmatpush3.bf16.msra.mxu1 %v1157_v17 }
 0xecb   :  { %1201 = vpow2.f32 %v1012_v22  ;;  %1118 = vmatprep.subr.bf16.mxu1 %v1223_v0  ;;  %v1018_v0 = vld [vmem:[%s1497_s0 + $0x38] sm:$0xff] }
 0xece   :  { %1119 = vmatpush3.bf16.msra.mxu1 %v1158_v18 }
 0xed3   :  { %v1200_v21 = vpop.eup %1199 }
 0xed4   :  { %622 = vrot.lane.b32.xlu0 %v1200_v21, %s1225_s21 }
 0xed5   :  { %v1202_v23 = vpop.eup %1201 }
 0xed6   :  { %v611_v24 = vadd.f32 1.0, %v1202_v23 }
 0xed8   :  { %1203 = vrcp.f32 %v611_v24 }
 0xee2   :  { %v1204_v25 = vpop.eup %1203 }
 0xee3   :  { %v620_v29 = vmul.f32 %v1204_v25, %v618_v28 }
 0xf46   :  { %v623_v26 = vpop.permute.xlu0 %622 }
 0xf47   :  { %v625_v27 = vmul.f32 %v1204_v25, %v623_v26 }
 0xf49   :  { %627 = vrot.lane.b32.xlu0 %v625_v27, %s1226_s22 }
 0xfbb   :  { %v628_v30 = vpop.permute.xlu0 %627 }
 0xfbc   :  { %v630_v31 = vadd.f32 %v628_v30, %v620_v29 }
 0xfbe   :  { %1205 = vtanh.f32 %v630_v31 }
 0xfc8   :  { %v1206_v32 = vpop.eup %1205 }
 0xfc9   :  { %633 = vrot.lane.b32.xlu1 %v1206_v32, %s1225_s21 }
 0xfcd   :  { %638 = vrot.lane.b32.xlu1 %v630_v31, %s1227_s23 }
0x103b   :  { %v634_v36 = vpop.permute.xlu1 %633 }
0x103c   :  { %v636_v37 = vmul.f32 %v1204_v25, %v634_v36 }
0x103e   :  { %643 = vrot.lane.b32.xlu0 %v636_v37, %s1226_s22 }
0x103f   :  { %v639_v38 = vpop.permute.xlu1 %638 }
0x1040   :  { %641 = vst.msk [vmem:[#allocation4] sm:$0xff] %vm18_vm0, %v639_v38 }
0x1047   :  { %v720_v39 = vld [vmem:[#allocation4] sm:$0xff] }
0x1048   :  { %722 = vrot.lane.b32.xlu1 %v720_v39, %s1226_s22 }
0x10b0   :  { %v644_v40 = vpop.permute.xlu0 %643 }
0x10b1   :  { %646 = vst.msk [vmem:[#allocation3] sm:$0xff] %vm18_vm0, %v644_v40  ;;  %648 = vst.msk [vmem:[#allocation2 + $0x28] sm:$0xff] %vm18_vm0, %v644_v40 }
0x10b8   :  { %v651_v42 = vld [vmem:[#allocation3] sm:$0xff]  ;;  %v864_v48 = vld [vmem:[#allocation2 + $0x28] sm:$0xff] }
0x10b9   :  { %v652_v43 = vpack.c.bf16 %v651_v42, %v651_v42  ;;  %v869_v52 = vpack.c.bf16 %v864_v48, %v863_v51 }
0x10ba   :  { %v723_v12 = vpop.permute.xlu1 %722 }
0x10bb   :  { %1113 = vmatmul.mubr.msk.bf16.vlgmr.msra.gmra.mrb[8].mxu0 %vm18_vm0, %v652_v43 }
0x10bc   :  { %1125 = vmatpush3.bf16.msra.mxu0 %v1155_v35  ;;  %1128 = vmatprep.mubr.msk.bf16.mxu0 %vm18_vm0, %v867_v46 }
0x10bd   :  { %1126 = vmatprep.subr.bf16.mxu0 %v1156_v45 }
0x10c0   :  { %1127 = vmatpush3.bf16.msra.mxu0 %v1156_v45 }
0x10c3   :  { %1129 = vmatmul.mubr.msk.bf16.vlgmr.msra.gmra.mrb[12].mxu0 %vm18_vm0, %v868_v50 }
0x10c4   :  { %1132 = vmatprep.mubr.msk.bf16.mxu0 %vm18_vm0, %v869_v52 }
0x118e   :  { %v706_v54 = vpop.f32.mrb[8].mxu0 }
0x118f   :  { %v712_v55 = vadd.f32 %v1013_v53, %v706_v54  ;;  %v1114_v56 = vpop.f32.mrb[9].mxu0 }
0x1190   :  { %v709_v57 = vpop.f32.mrb[10].mxu0 }
0x1191   :  { %1207 = vtanh.f32 %v712_v55  ;;  %v1115_v58 = vpop.f32.mrb[11].mxu0  ;;  %v1017_v6 = vmul.f32 -1.442695, %v712_v55 }
0x1193   :  { %1209 = vpow2.f32 %v1017_v6 }
0x1196   :  { %v1130_v60 = vpop.f32.mrb[12].mxu0 }
0x1197   :  { %v949_v61 = vadd.f32 %v1130_v60, %v1425_v59  ;;  %v940_v62 = vpop.f32.mrb[13].mxu0 }
0x1198   :  { %v941_v63 = vadd.f32 %v1425_v59, %v940_v62  ;;  %v1131_v1 = vpop.f32.mrb[14].mxu0 }
0x1199   :  { %974 = vst.msk [vmem:[%s1500_s4 + $0x10] sm:$0xff] %vm971_vm2, %v949_v61  ;;  %v952_v2 = vadd.f32 %v1131_v1, %v1425_v59  ;;  %v943_v3 = vpop.f32.mrb[15].mxu0 }
0x119a   :  { %972 = vst.msk [vmem:[%s1500_s4] sm:$0xff] %vm971_vm2, %v941_v63  ;;  %v944_v4 = vadd.f32 %v1425_v59, %v943_v3 }
0x119b   :  { %v1208_v5 = vpop.eup %1207  ;;  %975 = vst.msk [vmem:[%s1500_s4 + $0x18] sm:$0xff] %vm971_vm2, %v952_v2 }
0x119c   :  { %973 = vst.msk [vmem:[%s1500_s4 + $0x8] sm:$0xff] %vm971_vm2, %v944_v4  ;;  %727 = vrot.lane.b32.xlu0 %v1208_v5, %s1225_s21 }
0x119d   :  { %v1210_v7 = vpop.eup %1209 }
0x119e   :  { %v716_v8 = vadd.f32 1.0, %v1210_v7 }
0x11a0   :  { %1211 = vrcp.f32 %v716_v8 }
0x11aa   :  { %v1212_v9 = vpop.eup %1211 }
0x11ab   :  { %v725_v13 = vmul.f32 %v1212_v9, %v723_v12 }
0x120e   :  { %v728_v10 = vpop.permute.xlu0 %727 }
0x120f   :  { %v730_v11 = vmul.f32 %v1212_v9, %v728_v10 }
0x1211   :  { %732 = vrot.lane.b32.xlu0 %v730_v11, %s1226_s22 }
0x1283   :  { %v733_v14 = vpop.permute.xlu0 %732 }
0x1284   :  { %v735_v15 = vadd.f32 %v733_v14, %v725_v13 }
0x1286   :  { %1213 = vtanh.f32 %v735_v15 }
0x1290   :  { %v1214_v16 = vpop.eup %1213 }
0x1291   :  { %738 = vrot.lane.b32.xlu1 %v1214_v16, %s1225_s21 }
0x1295   :  { %743 = vrot.lane.b32.xlu1 %v735_v15, %s1227_s23 }
0x1303   :  { %v739_v19 = vpop.permute.xlu1 %738 }
0x1304   :  { %v741_v20 = vmul.f32 %v1212_v9, %v739_v19 }
0x1306   :  { %748 = vrot.lane.b32.xlu0 %v741_v20, %s1226_s22 }
0x1307   :  { %v744_v21 = vpop.permute.xlu1 %743 }
0x1308   :  { %746 = vst.msk [vmem:[#allocation4] sm:$0xff] %vm18_vm0, %v744_v21 }
0x130f   :  { %v825_v22 = vld [vmem:[#allocation4] sm:$0xff] }
0x1310   :  { %827 = vrot.lane.b32.xlu1 %v825_v22, %s1226_s22 }
0x1378   :  { %v749_v23 = vpop.permute.xlu0 %748 }
0x1379   :  { %751 = vst.msk [vmem:[#allocation3] sm:$0xff] %vm18_vm0, %v749_v23  ;;  %753 = vst.msk [vmem:[#allocation2 + $0x30] sm:$0xff] %vm18_vm0, %v749_v23 }
0x1380   :  { %v756_v24 = vld [vmem:[#allocation3] sm:$0xff]  ;;  %v865_v47 = vld [vmem:[#allocation2 + $0x30] sm:$0xff] }
0x1381   :  { %v757_v25 = vpack.c.bf16 %v756_v24, %v756_v24 }
0x1382   :  { %v828_v38 = vpop.permute.xlu1 %827 }
0x1383   :  { %1121 = vmatmul.mubr.msk.bf16.vlgmr.msra.gmra.mrb[16].mxu1 %vm18_vm0, %v757_v25 }
0x1456   :  { %v811_v26 = vpop.f32.mrb[16].mxu1 }
0x1457   :  { %v817_v27 = vadd.f32 %v1018_v0, %v811_v26  ;;  %v1122_v28 = vpop.f32.mrb[17].mxu1 }
0x1458   :  { %v814_v29 = vpop.f32.mrb[18].mxu1 }
0x1459   :  { %1215 = vtanh.f32 %v817_v27  ;;  %v1123_v30 = vpop.f32.mrb[19].mxu1  ;;  %v1022_v32 = vmul.f32 -1.442695, %v817_v27 }
0x145b   :  { %1217 = vpow2.f32 %v1022_v32 }
0x1463   :  { %v1216_v31 = vpop.eup %1215 }
0x1464   :  { %832 = vrot.lane.b32.xlu0 %v1216_v31, %s1225_s21 }
0x1465   :  { %v1218_v33 = vpop.eup %1217 }
0x1466   :  { %v821_v34 = vadd.f32 1.0, %v1218_v33 }
0x1468   :  { %1219 = vrcp.f32 %v821_v34 }
0x1472   :  { %v1220_v35 = vpop.eup %1219 }
0x1473   :  { %v830_v39 = vmul.f32 %v1220_v35, %v828_v38 }
0x14d6   :  { %v833_v36 = vpop.permute.xlu0 %832 }
0x14d7   :  { %v835_v37 = vmul.f32 %v1220_v35, %v833_v36 }
0x14d9   :  { %837 = vrot.lane.b32.xlu0 %v835_v37, %s1226_s22 }
0x154b   :  { %v838_v40 = vpop.permute.xlu0 %837 }
0x154c   :  { %v840_v41 = vadd.f32 %v838_v40, %v830_v39 }
0x154e   :  { %1221 = vtanh.f32 %v840_v41 }
0x1558   :  { %v1222_v42 = vpop.eup %1221 }
0x1559   :  { %843 = vrot.lane.b32.xlu1 %v1222_v42, %s1225_s21 }
0x155d   :  { %848 = vrot.lane.b32.xlu1 %v840_v41, %s1227_s23 }
0x15cb   :  { %v844_v43 = vpop.permute.xlu1 %843 }
0x15cc   :  { %v846_v44 = vmul.f32 %v1220_v35, %v844_v43 }
0x15ce   :  { %853 = vrot.lane.b32.xlu0 %v846_v44, %s1226_s22 }
0x15cf   :  { %v849_v45 = vpop.permute.xlu1 %848 }
0x15d0   :  { %851 = vst.msk [vmem:[#allocation4] sm:$0xff] %vm18_vm0, %v849_v45 }
0x1640   :  { %v854_v46 = vpop.permute.xlu0 %853 }
0x1641   :  { %856 = vst.msk [vmem:[#allocation3] sm:$0xff] %vm18_vm0, %v854_v46  ;;  %858 = vst.msk [vmem:[#allocation2 + $0x38] sm:$0xff] %vm18_vm0, %v854_v46 }
0x1648   :  { %v866_v48 = vld [vmem:[#allocation2 + $0x38] sm:$0xff] }
0x1649   :  { %v870_v49 = vpack.c.bf16 %v866_v48, %v865_v47 }
0x164b   :  { %1133 = vmatmul.mubr.msk.bf16.gmra.mrb[16].mxu0 %vm18_vm0, %v870_v49 }
0x171e   :  { %v1134_v50 = vpop.f32.mrb[16].mxu0 }
0x171f   :  { %v965_v51 = vadd.f32 %v1134_v50, %v1425_v59  ;;  %v956_v52 = vpop.f32.mrb[17].mxu0 }
0x1720   :  { %v957_v53 = vadd.f32 %v1425_v59, %v956_v52  ;;  %v1135_v54 = vpop.f32.mrb[18].mxu0 }
0x1721   :  { %978 = vst.msk [vmem:[%s1500_s4 + $0x30] sm:$0xff] %vm971_vm2, %v965_v51  ;;  %v968_v55 = vadd.f32 %v1135_v54, %v1425_v59  ;;  %v959_v56 = vpop.f32.mrb[19].mxu0 }
0x1722   :  { %976 = vst.msk [vmem:[%s1500_s4 + $0x20] sm:$0xff] %vm971_vm2, %v957_v53  ;;  %v960_v57 = vadd.f32 %v1425_v59, %v959_v56 }
0x1723   :  { %979 = vst.msk [vmem:[%s1500_s4 + $0x38] sm:$0xff] %vm971_vm2, %v968_v55 }
0x1724   :  { %977 = vst.msk [vmem:[%s1500_s4 + $0x28] sm:$0xff] %vm971_vm2, %v960_v57 }

</bundles_post_ra>
